<compile_context>
chip_gen: v6e
topology: v6e:2x2x1
jax: 0.10.0
libtpu: 0.0.40
codegen_flags: <defaults>
</compile_context>

<pallas_src>
import jax
import jax.numpy as jnp
from jax import lax
from jax.experimental import pallas as pl
from jax.experimental.pallas import tpu as pltpu


# ----------------------------------------------------------------------------
# Fused kernel: preprocess + normalize + conv surrogate + postprocess
# ----------------------------------------------------------------------------
def _ml_collisions_kernel(f_ref, mean_f_ref, inv_std_f_ref, mean_fdf_ref,
                          std_fdf_ref, w_ref, out_ref, fnp_ref):
    # Layouts (node-minor: nodes are the lane dim):
    #   f_ref / out_ref : (C, H, W, nb)       data block
    #   stats           : (C, H, W+1, 1)      broadcast over node lanes
    #   w_ref           : (C*C*9,) f32 SMEM   conv weights (bias folded in stats)
    #   fnp_ref scratch : (C, H+2, W+3, nb)   zero-bordered normalized image
    C, H, W, nb = f_ref.shape
    Wp = W + 1                                     # replicate-padded width

    # ---- zero only the 1-wide borders of the scratch; the interior is fully
    #      overwritten below.  Re-done every grid step -> megacore-safe. ------
    z_h = jnp.zeros((C, 1, Wp + 2, nb), jnp.float32)
    fnp_ref[:, 0:1, :, :] = z_h
    fnp_ref[:, H + 1:H + 2, :, :] = z_h
    z_w = jnp.zeros((C, H, 1, nb), jnp.float32)
    fnp_ref[:, 1:H + 1, 0:1, :] = z_w
    fnp_ref[:, 1:H + 1, Wp + 1:Wp + 2, :] = z_w

    # ---- preprocess (clamp) + normalize, one H row at a time ----------------
    def _norm_row(h, carry):
        xrow = jnp.maximum(f_ref[:, h], 0.0)                  # (C, W, nb) fpre row
        m_i = mean_f_ref[:, h, :W, :]                         # (C, W, 1)
        s_i = inv_std_f_ref[:, h, :W, :]
        fnp_ref[:, h + 1, 1:W + 1, :] = (xrow - m_i) * s_i
        # replicate-padded column (fnorm column index W), with its own stats
        xl = xrow[:, W - 1:W, :]                              # (C, 1, nb)
        fnp_ref[:, h + 1, W + 1:W + 2, :] = (
            (xl - mean_f_ref[:, h, W:, :]) * inv_std_f_ref[:, h, W:, :])
        return carry

    lax.fori_loop(0, H, _norm_row, 0)

    # ---- 3x3 SAME conv (model surrogate) + de-normalize + subtract fpre -----
    # Output channel `co` is the OUTERMOST loop -> a single live (W, nb)
    # accumulator (a handful of vregs), finalized/stored before the next
    # channel, so the 144-tap loop never spills the register file.
    # TODO(synk): for larger channel counts switch to bf16 MXU dots.
    def _conv_row(h, carry):
        xrow = jnp.maximum(f_ref[:, h], 0.0)                  # (C, W, nb) fpre row
        for co in range(C):
            acc = jnp.zeros((W, nb), jnp.float32)
            for ci in range(C):
                for dy in range(3):
                    for dx in range(3):
                        wgt = w_ref[((co * C + ci) * 3 + dy) * 3 + dx]
                        acc = acc + wgt * fnp_ref[ci, h + dy, dx:dx + W, :]
            d = (acc * std_fdf_ref[co, h, :W, :]
                 + mean_fdf_ref[co, h, :W, :]       # conv bias already folded in
                 - xrow[co])                        # subtract fpre (cropped cols)
            out_ref[co, h] = d
        return carry

    lax.fori_loop(0, H, _conv_row, 0)


# ----------------------------------------------------------------------------
# Wrapper
# ----------------------------------------------------------------------------
def _pick_nb(n_nodes, nb_max):
    # Node-block size: full N when small; else a multiple of 128 lanes, capped
    # at nb_max, and sized so there are >= 2 blocks (feeds both v7x TCs).
    if n_nodes <= 128:
        return n_nodes
    half = -(-((n_nodes + 1) // 2) // 128) * 128       # ceil(ceil(N/2)/128)*128
    nb = max(128, min(nb_max, half))
    return (nb // 128) * 128


def ml_collisions_forward(f, mean_f, std_f, mean_fdf, std_fdf, conv_w, conv_b,
                          *, nb_max=512, node_minor=False):
    # f      : (C, H, N, W) module layout, or (C, H, W, N) if node_minor=True.
    # stats  : (1, C, H, W+1) each ; conv_w: (C, C, 3, 3) ; conv_b: (C,)
    # Returns df with the same node layout as the input f.
    if node_minor:
        f_nm = f.astype(jnp.float32)                         # (C, H, W, N)
        C, H, W, N = f_nm.shape
    else:
        C, H, N, W = f.shape
        # TODO(synk): keep the distribution node-minor across time steps in the
        #             caller so these two boundary HBM transposes disappear.
        f_nm = jnp.transpose(f.astype(jnp.float32), (0, 1, 3, 2))
    Wp = W + 1

    def _r(s):                                               # (1,C,H,Wp)->(C,H,Wp,1)
        return s.astype(jnp.float32).reshape(C, H, Wp, 1)

    std_fdf32 = std_fdf.astype(jnp.float32)
    mean_f_r = _r(mean_f)
    inv_std_f_r = _r(1.0 / std_f.astype(jnp.float32))        # reciprocal hoisted
    # fold conv bias into the de-normalization offset: y*std + (mean + b*std)
    mean_fdf_r = _r(mean_fdf.astype(jnp.float32)
                    + conv_b.astype(jnp.float32).reshape(1, C, 1, 1) * std_fdf32)
    std_fdf_r = _r(std_fdf32)
    w_flat = conv_w.astype(jnp.float32).reshape(-1)          # (C*C*9,) -> SMEM

    nb = _pick_nb(N, nb_max)
    grid = (pl.cdiv(N, nb),)

    data_spec = pl.BlockSpec((C, H, W, nb), lambda g: (0, 0, 0, g))
    stat_spec = pl.BlockSpec((C, H, Wp, 1), lambda g: (0, 0, 0, 0))
    smem_spec = pl.BlockSpec(memory_space=pltpu.MemorySpace.SMEM)

    out_nm = pl.pallas_call(
        _ml_collisions_kernel,
        out_shape=jax.ShapeDtypeStruct((C, H, W, N), jnp.float32),
        grid=grid,
        in_specs=[data_spec, stat_spec, stat_spec, stat_spec, stat_spec,
                  smem_spec],
        out_specs=data_spec,
        scratch_shapes=[pltpu.VMEM((C, H + 2, Wp + 2, nb), jnp.float32)],
        compiler_params=pltpu.CompilerParams(
            dimension_semantics=("parallel",),      # v7x: node blocks on 2 TCs
            vmem_limit_bytes=48 * 1024 * 1024),     # ~11 MB working set @ nb=512
    )(f_nm, mean_f_r, inv_std_f_r, mean_fdf_r, std_fdf_r, w_flat)

    if node_minor:
        return out_nm
    return jnp.transpose(out_nm, (0, 1, 3, 2))


# ----------------------------------------------------------------------------
# Pure-JAX reference (for correctness check)
# ----------------------------------------------------------------------------
def _ref_forward(f, mean_f, std_f, mean_fdf, std_fdf, conv_w, conv_b):
    fp = jnp.maximum(jnp.transpose(f, (2, 0, 1, 3)), 0.0)
    fpre = jnp.pad(fp, ((0, 0), (0, 0), (0, 0), (0, 1)), mode='edge')
    fnorm = (fpre - mean_f) / std_f
    y = jax.lax.conv_general_dilated(
        fnorm, conv_w, (1, 1), 'SAME',
        dimension_numbers=('NCHW', 'OIHW', 'NCHW'),
        precision=jax.lax.Precision.HIGHEST)
    y = y + conv_b[None, :, None, None]
    df = (y * std_fdf + mean_fdf - fpre)[:, :, :, :-1]
    return jnp.transpose(df, (1, 2, 0, 3))


if __name__ == "__main__":
    # small synthetic shapes: C=4 targets, H=16 (v_par), N=2 nodes, W=15 (v_perp)
    C, H, N, W = 4, 16, 2, 15
    Wp = W + 1

    key = jax.random.PRNGKey(0)
    ks = jax.random.split(key, 7)
    f        = jax.random.normal(ks[0], (C, H, N, W), jnp.float32)
    mean_f   = 0.1 * jax.random.normal(ks[1], (1, C, H, Wp), jnp.float32)
    std_f    = 1.0 + 0.1 * jax.random.uniform(ks[2], (1, C, H, Wp), jnp.float32)
    mean_fdf = 0.1 * jax.random.normal(ks[3], (1, C, H, Wp), jnp.float32)
    std_fdf  = 1.0 + 0.1 * jax.random.uniform(ks[4], (1, C, H, Wp), jnp.float32)
    conv_w   = 0.1 * jax.random.normal(ks[5], (C, C, 3, 3), jnp.float32)
    conv_b   = 0.01 * jax.random.normal(ks[6], (C,), jnp.float32)

    ref = _ref_forward(f, mean_f, std_f, mean_fdf, std_fdf, conv_w, conv_b)
    out = ml_collisions_forward(f, mean_f, std_f, mean_fdf, std_fdf, conv_w, conv_b)
    out = jax.block_until_ready(out)
    assert out.shape == (C, H, N, W), out.shape
    err = float(jnp.max(jnp.abs(out - ref)))
    assert err < 1e-3, err

    # multi-block grid (>128 nodes -> 128-lane node blocks, partial last block)
    N2 = 320
    f2 = jax.random.normal(jax.random.PRNGKey(1), (C, H, N2, W), jnp.float32)
    ref2 = _ref_forward(f2, mean_f, std_f, mean_fdf, std_fdf, conv_w, conv_b)
    out2 = ml_collisions_forward(f2, mean_f, std_f, mean_fdf, std_fdf,
                                 conv_w, conv_b, nb_max=128)
    out2 = jax.block_until_ready(out2)
    err2 = float(jnp.max(jnp.abs(out2 - ref2)))
    assert err2 < 1e-3, err2

    # node-minor fast path (caller keeps nodes in the lane dim; no transposes)
    f2_nm = jnp.transpose(f2, (0, 1, 3, 2))
    out3 = ml_collisions_forward(f2_nm, mean_f, std_f, mean_fdf, std_fdf,
                                 conv_w, conv_b, nb_max=128, node_minor=True)
    out3 = jax.block_until_ready(out3)
    err3 = float(jnp.max(jnp.abs(jnp.transpose(out3, (0, 1, 3, 2)) - ref2)))
    assert err3 < 1e-3, err3

    print("KERNEL_OK")
</pallas_src>

<mosaic_0001>
module attributes {stable_mosaic.version = 11 : i64} {
  func.func @_ml_collisions_kernel(%arg0: i32, %arg1: memref<4x16x15x2xf32, #tpu.memory_space<vmem>>, %arg2: memref<4x16x16x1xf32, #tpu.memory_space<vmem>>, %arg3: memref<4x16x16x1xf32, #tpu.memory_space<vmem>>, %arg4: memref<4x16x16x1xf32, #tpu.memory_space<vmem>>, %arg5: memref<4x16x16x1xf32, #tpu.memory_space<vmem>>, %arg6: memref<144xf32, #tpu.memory_space<smem>>, %arg7: memref<4x16x15x2xf32, #tpu.memory_space<vmem>>, %arg8: memref<4x18x18x2xf32, #tpu.memory_space<vmem>>) attributes {dimension_semantics = [#tpu.dimension_semantics<parallel>], iteration_bounds = array<i64: 1>, scalar_prefetch = 0 : i64, scratch_operands = 1 : i64, tpu.core_type = #tpu.core_type<tc>, window_params = [{transform_indices = @transform_0, window_bounds = array<i64: 4, 16, 15, 2>}, {pipeline_mode = #tpu.pipeline_mode<synchronous>, transform_indices = @transform_1, window_bounds = array<i64: 4, 16, 16, 1>}, {pipeline_mode = #tpu.pipeline_mode<synchronous>, transform_indices = @transform_2, window_bounds = array<i64: 4, 16, 16, 1>}, {pipeline_mode = #tpu.pipeline_mode<synchronous>, transform_indices = @transform_3, window_bounds = array<i64: 4, 16, 16, 1>}, {pipeline_mode = #tpu.pipeline_mode<synchronous>, transform_indices = @transform_4, window_bounds = array<i64: 4, 16, 16, 1>}, {transform_indices = @transform_5, window_bounds = array<i64: 144>}, {transform_indices = @transform_6, window_bounds = array<i64: 4, 16, 15, 2>}]} {
    %cst = arith.constant 0.000000e+00 : f32
    %0 = vector.broadcast %cst : f32 to vector<4x1x18x2xf32>
    %c0 = arith.constant 0 : index
    %c0_0 = arith.constant 0 : index
    %c0_1 = arith.constant 0 : index
    %c0_2 = arith.constant 0 : index
    %1 = vector.load %arg8[%c0, %c0_0, %c0_1, %c0_2] : memref<4x18x18x2xf32, #tpu.memory_space<vmem>>, vector<4x1x18x2xf32>
    tpu.vector_store %arg8[%c0, %c0_0, %c0_1, %c0_2], %0 {strides = array<i32>} : memref<4x18x18x2xf32, #tpu.memory_space<vmem>>, vector<4x1x18x2xf32>,
    %c0_3 = arith.constant 0 : index
    %c17 = arith.constant 17 : index
    %c0_4 = arith.constant 0 : index
    %c0_5 = arith.constant 0 : index
    %2 = vector.load %arg8[%c0_3, %c17, %c0_4, %c0_5] : memref<4x18x18x2xf32, #tpu.memory_space<vmem>>, vector<4x1x18x2xf32>
    tpu.vector_store %arg8[%c0_3, %c17, %c0_4, %c0_5], %0 {strides = array<i32>} : memref<4x18x18x2xf32, #tpu.memory_space<vmem>>, vector<4x1x18x2xf32>,
    %cst_6 = arith.constant 0.000000e+00 : f32
    %3 = vector.broadcast %cst_6 : f32 to vector<4x16x1x2xf32>
    %c0_7 = arith.constant 0 : index
    %c1 = arith.constant 1 : index
    %c0_8 = arith.constant 0 : index
    %c0_9 = arith.constant 0 : index
    %4 = vector.load %arg8[%c0_7, %c1, %c0_8, %c0_9] : memref<4x18x18x2xf32, #tpu.memory_space<vmem>>, vector<4x16x1x2xf32>
    tpu.vector_store %arg8[%c0_7, %c1, %c0_8, %c0_9], %3 {strides = array<i32>} : memref<4x18x18x2xf32, #tpu.memory_space<vmem>>, vector<4x16x1x2xf32>,
    %c0_10 = arith.constant 0 : index
    %c1_11 = arith.constant 1 : index
    %c17_12 = arith.constant 17 : index
    %c0_13 = arith.constant 0 : index
    %5 = vector.load %arg8[%c0_10, %c1_11, %c17_12, %c0_13] : memref<4x18x18x2xf32, #tpu.memory_space<vmem>>, vector<4x16x1x2xf32>
    tpu.vector_store %arg8[%c0_10, %c1_11, %c17_12, %c0_13], %3 {strides = array<i32>} : memref<4x18x18x2xf32, #tpu.memory_space<vmem>>, vector<4x16x1x2xf32>,
    %c0_i32 = arith.constant 0 : i32
    %c16_i32 = arith.constant 16 : i32
    %6 = arith.addi %c0_i32, %c16_i32 : i32
    %c1_i32 = arith.constant 1 : i32
    scf.for %arg9 = %c0_i32 to %6 step %c1_i32  : i32 {
      %c0_19 = arith.constant 0 : index
      %8 = arith.index_cast %arg9 : i32 to index
      %c0_20 = arith.constant 0 : index
      %c0_21 = arith.constant 0 : index
      %9 = vector.load %arg1[%c0_19, %8, %c0_20, %c0_21] : memref<4x16x15x2xf32, #tpu.memory_space<vmem>>, vector<4x1x15x2xf32>
      %10 = vector.shape_cast %9 : vector<4x1x15x2xf32> to vector<4x15x2xf32>
      %cst_22 = arith.constant 0.000000e+00 : f32
      %11 = vector.broadcast %cst_22 : f32 to vector<4x15x2xf32>
      %12 = arith.maximumf %10, %11 : vector<4x15x2xf32>
      %c0_23 = arith.constant 0 : index
      %13 = arith.index_cast %arg9 : i32 to index
      %c0_24 = arith.constant 0 : index
      %c0_25 = arith.constant 0 : index
      %14 = vector.load %arg2[%c0_23, %13, %c0_24, %c0_25] : memref<4x16x16x1xf32, #tpu.memory_space<vmem>>, vector<4x1x15x1xf32>
      %15 = vector.shape_cast %14 : vector<4x1x15x1xf32> to vector<4x15x1xf32>
      %c0_26 = arith.constant 0 : index
      %16 = arith.index_cast %arg9 : i32 to index
      %c0_27 = arith.constant 0 : index
      %c0_28 = arith.constant 0 : index
      %17 = vector.load %arg3[%c0_26, %16, %c0_27, %c0_28] : memref<4x16x16x1xf32, #tpu.memory_space<vmem>>, vector<4x1x15x1xf32>
      %18 = vector.shape_cast %17 : vector<4x1x15x1xf32> to vector<4x15x1xf32>
      %19 = vector.broadcast %15 : vector<4x15x1xf32> to vector<4x15x2xf32>
      %20 = arith.subf %12, %19 : vector<4x15x2xf32>
      %21 = vector.broadcast %18 : vector<4x15x1xf32> to vector<4x15x2xf32>
      %22 = arith.mulf %20, %21 : vector<4x15x2xf32>
      %c1_i32_29 = arith.constant 1 : i32
      %23 = arith.addi %arg9, %c1_i32_29 : i32
      %c0_30 = arith.constant 0 : index
      %24 = arith.index_cast %23 : i32 to index
      %c1_31 = arith.constant 1 : index
      %c0_32 = arith.constant 0 : index
      %25 = vector.load %arg8[%c0_30, %24, %c1_31, %c0_32] : memref<4x18x18x2xf32, #tpu.memory_space<vmem>>, vector<4x1x15x2xf32>
      %26 = vector.shape_cast %25 : vector<4x1x15x2xf32> to vector<4x15x2xf32>
      %27 = vector.shape_cast %22 : vector<4x15x2xf32> to vector<4x1x15x2xf32>
      tpu.vector_store %arg8[%c0_30, %24, %c1_31, %c0_32], %27 {strides = array<i32>} : memref<4x18x18x2xf32, #tpu.memory_space<vmem>>, vector<4x1x15x2xf32>,
      %28 = vector.extract_strided_slice %12 {offsets = [0, 14, 0], sizes = [4, 1, 2], strides = [1, 1, 1]} : vector<4x15x2xf32> to vector<4x1x2xf32>
      %c0_33 = arith.constant 0 : index
      %29 = arith.index_cast %arg9 : i32 to index
      %c15 = arith.constant 15 : index
      %c0_34 = arith.constant 0 : index
      %30 = vector.load %arg2[%c0_33, %29, %c15, %c0_34] : memref<4x16x16x1xf32, #tpu.memory_space<vmem>>, vector<4x1x1x1xf32>
      %31 = vector.shape_cast %30 : vector<4x1x1x1xf32> to vector<4x1x1xf32>
      %32 = vector.broadcast %31 : vector<4x1x1xf32> to vector<4x1x2xf32>
      %33 = arith.subf %28, %32 : vector<4x1x2xf32>
      %c0_35 = arith.constant 0 : index
      %34 = arith.index_cast %arg9 : i32 to index
      %c15_36 = arith.constant 15 : index
      %c0_37 = arith.constant 0 : index
      %35 = vector.load %arg3[%c0_35, %34, %c15_36, %c0_37] : memref<4x16x16x1xf32, #tpu.memory_space<vmem>>, vector<4x1x1x1xf32>
      %36 = vector.shape_cast %35 : vector<4x1x1x1xf32> to vector<4x1x1xf32>
      %37 = vector.broadcast %36 : vector<4x1x1xf32> to vector<4x1x2xf32>
      %38 = arith.mulf %33, %37 : vector<4x1x2xf32>
      %c1_i32_38 = arith.constant 1 : i32
      %39 = arith.addi %arg9, %c1_i32_38 : i32
      %c0_39 = arith.constant 0 : index
      %40 = arith.index_cast %39 : i32 to index
      %c16 = arith.constant 16 : index
      %c0_40 = arith.constant 0 : index
      %41 = vector.load %arg8[%c0_39, %40, %c16, %c0_40] : memref<4x18x18x2xf32, #tpu.memory_space<vmem>>, vector<4x1x1x2xf32>
      %42 = vector.shape_cast %41 : vector<4x1x1x2xf32> to vector<4x1x2xf32>
      %43 = vector.shape_cast %38 : vector<4x1x2xf32> to vector<4x1x1x2xf32>
      tpu.vector_store %arg8[%c0_39, %40, %c16, %c0_40], %43 {strides = array<i32>} : memref<4x18x18x2xf32, #tpu.memory_space<vmem>>, vector<4x1x1x2xf32>,
    }
    %c16_i32_14 = arith.constant 16 : i32
    %c0_i32_15 = arith.constant 0 : i32
    %c16_i32_16 = arith.constant 16 : i32
    %7 = arith.addi %c0_i32_15, %c16_i32_16 : i32
    %c1_i32_17 = arith.constant 1 : i32
    scf.for %arg9 = %c0_i32_15 to %7 step %c1_i32_17  : i32 {
      %c0_19 = arith.constant 0 : index
      %8 = arith.index_cast %arg9 : i32 to index
      %c0_20 = arith.constant 0 : index
      %c0_21 = arith.constant 0 : index
      %9 = vector.load %arg1[%c0_19, %8, %c0_20, %c0_21] : memref<4x16x15x2xf32, #tpu.memory_space<vmem>>, vector<4x1x15x2xf32>
      %10 = vector.shape_cast %9 : vector<4x1x15x2xf32> to vector<4x15x2xf32>
      %cst_22 = arith.constant 0.000000e+00 : f32
      %11 = vector.broadcast %cst_22 : f32 to vector<4x15x2xf32>
      %12 = arith.maximumf %10, %11 : vector<4x15x2xf32>
      %cst_23 = arith.constant 0.000000e+00 : f32
      %13 = vector.broadcast %cst_23 : f32 to vector<15x2xf32>
      %c0_24 = arith.constant 0 : index
      %14 = memref.load %arg6[%c0_24] : memref<144xf32, #tpu.memory_space<smem>>
      %c0_i32_25 = arith.constant 0 : i32
      %15 = arith.addi %arg9, %c0_i32_25 : i32
      %c0_26 = arith.constant 0 : index
      %16 = arith.index_cast %15 : i32 to index
      %c0_27 = arith.constant 0 : index
      %c0_28 = arith.constant 0 : index
      %17 = vector.load %arg8[%c0_26, %16, %c0_27, %c0_28] : memref<4x18x18x2xf32, #tpu.memory_space<vmem>>, vector<1x1x15x2xf32>
      %18 = vector.shape_cast %17 : vector<1x1x15x2xf32> to vector<15x2xf32>
      %19 = vector.broadcast %14 : f32 to vector<15x2xf32>
      %20 = arith.mulf %19, %18 : vector<15x2xf32>
      %21 = arith.addf %13, %20 : vector<15x2xf32>
      %c1_29 = arith.constant 1 : index
      %22 = memref.load %arg6[%c1_29] : memref<144xf32, #tpu.memory_space<smem>>
      %c0_i32_30 = arith.constant 0 : i32
      %23 = arith.addi %arg9, %c0_i32_30 : i32
      %c0_31 = arith.constant 0 : index
      %24 = arith.index_cast %23 : i32 to index
      %c1_32 = arith.constant 1 : index
      %c0_33 = arith.constant 0 : index
      %25 = vector.load %arg8[%c0_31, %24, %c1_32, %c0_33] : memref<4x18x18x2xf32, #tpu.memory_space<vmem>>, vector<1x1x15x2xf32>
      %26 = vector.shape_cast %25 : vector<1x1x15x2xf32> to vector<15x2xf32>
      %27 = vector.broadcast %22 : f32 to vector<15x2xf32>
      %28 = arith.mulf %27, %26 : vector<15x2xf32>
      %29 = arith.addf %21, %28 : vector<15x2xf32>
      %c2 = arith.constant 2 : index
      %30 = memref.load %arg6[%c2] : memref<144xf32, #tpu.memory_space<smem>>
      %c0_i32_34 = arith.constant 0 : i32
      %31 = arith.addi %arg9, %c0_i32_34 : i32
      %c0_35 = arith.constant 0 : index
      %32 = arith.index_cast %31 : i32 to index
      %c2_36 = arith.constant 2 : index
      %c0_37 = arith.constant 0 : index
      %33 = vector.load %arg8[%c0_35, %32, %c2_36, %c0_37] : memref<4x18x18x2xf32, #tpu.memory_space<vmem>>, vector<1x1x15x2xf32>
      %34 = vector.shape_cast %33 : vector<1x1x15x2xf32> to vector<15x2xf32>
      %35 = vector.broadcast %30 : f32 to vector<15x2xf32>
      %36 = arith.mulf %35, %34 : vector<15x2xf32>
      %37 = arith.addf %29, %36 : vector<15x2xf32>
      %c3 = arith.constant 3 : index
      %38 = memref.load %arg6[%c3] : memref<144xf32, #tpu.memory_space<smem>>
      %c1_i32_38 = arith.constant 1 : i32
      %39 = arith.addi %arg9, %c1_i32_38 : i32
      %c0_39 = arith.constant 0 : index
      %40 = arith.index_cast %39 : i32 to index
      %c0_40 = arith.constant 0 : index
      %c0_41 = arith.constant 0 : index
      %41 = vector.load %arg8[%c0_39, %40, %c0_40, %c0_41] : memref<4x18x18x2xf32, #tpu.memory_space<vmem>>, vector<1x1x15x2xf32>
      %42 = vector.shape_cast %41 : vector<1x1x15x2xf32> to vector<15x2xf32>
      %43 = vector.broadcast %38 : f32 to vector<15x2xf32>
      %44 = arith.mulf %43, %42 : vector<15x2xf32>
      %45 = arith.addf %37, %44 : vector<15x2xf32>
      %c4 = arith.constant 4 : index
      %46 = memref.load %arg6[%c4] : memref<144xf32, #tpu.memory_space<smem>>
      %c1_i32_42 = arith.constant 1 : i32
      %47 = arith.addi %arg9, %c1_i32_42 : i32
      %c0_43 = arith.constant 0 : index
      %48 = arith.index_cast %47 : i32 to index
      %c1_44 = arith.constant 1 : index
      %c0_45 = arith.constant 0 : index
      %49 = vector.load %arg8[%c0_43, %48, %c1_44, %c0_45] : memref<4x18x18x2xf32, #tpu.memory_space<vmem>>, vector<1x1x15x2xf32>
      %50 = vector.shape_cast %49 : vector<1x1x15x2xf32> to vector<15x2xf32>
      %51 = vector.broadcast %46 : f32 to vector<15x2xf32>
      %52 = arith.mulf %51, %50 : vector<15x2xf32>
      %53 = arith.addf %45, %52 : vector<15x2xf32>
      %c5 = arith.constant 5 : index
      %54 = memref.load %arg6[%c5] : memref<144xf32, #tpu.memory_space<smem>>
      %c1_i32_46 = arith.constant 1 : i32
      %55 = arith.addi %arg9, %c1_i32_46 : i32
      %c0_47 = arith.constant 0 : index
      %56 = arith.index_cast %55 : i32 to index
      %c2_48 = arith.constant 2 : index
      %c0_49 = arith.constant 0 : index
      %57 = vector.load %arg8[%c0_47, %56, %c2_48, %c0_49] : memref<4x18x18x2xf32, #tpu.memory_space<vmem>>, vector<1x1x15x2xf32>
      %58 = vector.shape_cast %57 : vector<1x1x15x2xf32> to vector<15x2xf32>
      %59 = vector.broadcast %54 : f32 to vector<15x2xf32>
      %60 = arith.mulf %59, %58 : vector<15x2xf32>
      %61 = arith.addf %53, %60 : vector<15x2xf32>
      %c6 = arith.constant 6 : index
      %62 = memref.load %arg6[%c6] : memref<144xf32, #tpu.memory_space<smem>>
      %c2_i32 = arith.constant 2 : i32
      %63 = arith.addi %arg9, %c2_i32 : i32
      %c0_50 = arith.constant 0 : index
      %64 = arith.index_cast %63 : i32 to index
      %c0_51 = arith.constant 0 : index
      %c0_52 = arith.constant 0 : index
      %65 = vector.load %arg8[%c0_50, %64, %c0_51, %c0_52] : memref<4x18x18x2xf32, #tpu.memory_space<vmem>>, vector<1x1x15x2xf32>
      %66 = vector.shape_cast %65 : vector<1x1x15x2xf32> to vector<15x2xf32>
      %67 = vector.broadcast %62 : f32 to vector<15x2xf32>
      %68 = arith.mulf %67, %66 : vector<15x2xf32>
      %69 = arith.addf %61, %68 : vector<15x2xf32>
      %c7 = arith.constant 7 : index
      %70 = memref.load %arg6[%c7] : memref<144xf32, #tpu.memory_space<smem>>
      %c2_i32_53 = arith.constant 2 : i32
      %71 = arith.addi %arg9, %c2_i32_53 : i32
      %c0_54 = arith.constant 0 : index
      %72 = arith.index_cast %71 : i32 to index
      %c1_55 = arith.constant 1 : index
      %c0_56 = arith.constant 0 : index
      %73 = vector.load %arg8[%c0_54, %72, %c1_55, %c0_56] : memref<4x18x18x2xf32, #tpu.memory_space<vmem>>, vector<1x1x15x2xf32>
      %74 = vector.shape_cast %73 : vector<1x1x15x2xf32> to vector<15x2xf32>
      %75 = vector.broadcast %70 : f32 to vector<15x2xf32>
      %76 = arith.mulf %75, %74 : vector<15x2xf32>
      %77 = arith.addf %69, %76 : vector<15x2xf32>
      %c8 = arith.constant 8 : index
      %78 = memref.load %arg6[%c8] : memref<144xf32, #tpu.memory_space<smem>>
      %c2_i32_57 = arith.constant 2 : i32
      %79 = arith.addi %arg9, %c2_i32_57 : i32
      %c0_58 = arith.constant 0 : index
      %80 = arith.index_cast %79 : i32 to index
      %c2_59 = arith.constant 2 : index
      %c0_60 = arith.constant 0 : index
      %81 = vector.load %arg8[%c0_58, %80, %c2_59, %c0_60] : memref<4x18x18x2xf32, #tpu.memory_space<vmem>>, vector<1x1x15x2xf32>
      %82 = vector.shape_cast %81 : vector<1x1x15x2xf32> to vector<15x2xf32>
      %83 = vector.broadcast %78 : f32 to vector<15x2xf32>
      %84 = arith.mulf %83, %82 : vector<15x2xf32>
      %85 = arith.addf %77, %84 : vector<15x2xf32>
      %c9 = arith.constant 9 : index
      %86 = memref.load %arg6[%c9] : memref<144xf32, #tpu.memory_space<smem>>
      %c0_i32_61 = arith.constant 0 : i32
      %87 = arith.addi %arg9, %c0_i32_61 : i32
      %c1_62 = arith.constant 1 : index
      %88 = arith.index_cast %87 : i32 to index
      %c0_63 = arith.constant 0 : index
      %c0_64 = arith.constant 0 : index
      %89 = vector.load %arg8[%c1_62, %88, %c0_63, %c0_64] : memref<4x18x18x2xf32, #tpu.memory_space<vmem>>, vector<1x1x15x2xf32>
      %90 = vector.shape_cast %89 : vector<1x1x15x2xf32> to vector<15x2xf32>
      %91 = vector.broadcast %86 : f32 to vector<15x2xf32>
      %92 = arith.mulf %91, %90 : vector<15x2xf32>
      %93 = arith.addf %85, %92 : vector<15x2xf32>
      %c10 = arith.constant 10 : index
      %94 = memref.load %arg6[%c10] : memref<144xf32, #tpu.memory_space<smem>>
      %c0_i32_65 = arith.constant 0 : i32
      %95 = arith.addi %arg9, %c0_i32_65 : i32
      %c1_66 = arith.constant 1 : index
      %96 = arith.index_cast %95 : i32 to index
      %c1_67 = arith.constant 1 : index
      %c0_68 = arith.constant 0 : index
      %97 = vector.load %arg8[%c1_66, %96, %c1_67, %c0_68] : memref<4x18x18x2xf32, #tpu.memory_space<vmem>>, vector<1x1x15x2xf32>
      %98 = vector.shape_cast %97 : vector<1x1x15x2xf32> to vector<15x2xf32>
      %99 = vector.broadcast %94 : f32 to vector<15x2xf32>
      %100 = arith.mulf %99, %98 : vector<15x2xf32>
      %101 = arith.addf %93, %100 : vector<15x2xf32>
      %c11 = arith.constant 11 : index
      %102 = memref.load %arg6[%c11] : memref<144xf32, #tpu.memory_space<smem>>
      %c0_i32_69 = arith.constant 0 : i32
      %103 = arith.addi %arg9, %c0_i32_69 : i32
      %c1_70 = arith.constant 1 : index
      %104 = arith.index_cast %103 : i32 to index
      %c2_71 = arith.constant 2 : index
      %c0_72 = arith.constant 0 : index
      %105 = vector.load %arg8[%c1_70, %104, %c2_71, %c0_72] : memref<4x18x18x2xf32, #tpu.memory_space<vmem>>, vector<1x1x15x2xf32>
      %106 = vector.shape_cast %105 : vector<1x1x15x2xf32> to vector<15x2xf32>
      %107 = vector.broadcast %102 : f32 to vector<15x2xf32>
      %108 = arith.mulf %107, %106 : vector<15x2xf32>
      %109 = arith.addf %101, %108 : vector<15x2xf32>
      %c12 = arith.constant 12 : index
      %110 = memref.load %arg6[%c12] : memref<144xf32, #tpu.memory_space<smem>>
      %c1_i32_73 = arith.constant 1 : i32
      %111 = arith.addi %arg9, %c1_i32_73 : i32
      %c1_74 = arith.constant 1 : index
      %112 = arith.index_cast %111 : i32 to index
      %c0_75 = arith.constant 0 : index
      %c0_76 = arith.constant 0 : index
      %113 = vector.load %arg8[%c1_74, %112, %c0_75, %c0_76] : memref<4x18x18x2xf32, #tpu.memory_space<vmem>>, vector<1x1x15x2xf32>
      %114 = vector.shape_cast %113 : vector<1x1x15x2xf32> to vector<15x2xf32>
      %115 = vector.broadcast %110 : f32 to vector<15x2xf32>
      %116 = arith.mulf %115, %114 : vector<15x2xf32>
      %117 = arith.addf %109, %116 : vector<15x2xf32>
      %c13 = arith.constant 13 : index
      %118 = memref.load %arg6[%c13] : memref<144xf32, #tpu.memory_space<smem>>
      %c1_i32_77 = arith.constant 1 : i32
      %119 = arith.addi %arg9, %c1_i32_77 : i32
      %c1_78 = arith.constant 1 : index
      %120 = arith.index_cast %119 : i32 to index
      %c1_79 = arith.constant 1 : index
      %c0_80 = arith.constant 0 : index
      %121 = vector.load %arg8[%c1_78, %120, %c1_79, %c0_80] : memref<4x18x18x2xf32, #tpu.memory_space<vmem>>, vector<1x1x15x2xf32>
      %122 = vector.shape_cast %121 : vector<1x1x15x2xf32> to vector<15x2xf32>
      %123 = vector.broadcast %118 : f32 to vector<15x2xf32>
      %124 = arith.mulf %123, %122 : vector<15x2xf32>
      %125 = arith.addf %117, %124 : vector<15x2xf32>
      %c14 = arith.constant 14 : index
      %126 = memref.load %arg6[%c14] : memref<144xf32, #tpu.memory_space<smem>>
      %c1_i32_81 = arith.constant 1 : i32
      %127 = arith.addi %arg9, %c1_i32_81 : i32
      %c1_82 = arith.constant 1 : index
      %128 = arith.index_cast %127 : i32 to index
      %c2_83 = arith.constant 2 : index
      %c0_84 = arith.constant 0 : index
      %129 = vector.load %arg8[%c1_82, %128, %c2_83, %c0_84] : memref<4x18x18x2xf32, #tpu.memory_space<vmem>>, vector<1x1x15x2xf32>
      %130 = vector.shape_cast %129 : vector<1x1x15x2xf32> to vector<15x2xf32>
      %131 = vector.broadcast %126 : f32 to vector<15x2xf32>
      %132 = arith.mulf %131, %130 : vector<15x2xf32>
      %133 = arith.addf %125, %132 : vector<15x2xf32>
      %c15 = arith.constant 15 : index
      %134 = memref.load %arg6[%c15] : memref<144xf32, #tpu.memory_space<smem>>
      %c2_i32_85 = arith.constant 2 : i32
      %135 = arith.addi %arg9, %c2_i32_85 : i32
      %c1_86 = arith.constant 1 : index
      %136 = arith.index_cast %135 : i32 to index
      %c0_87 = arith.constant 0 : index
      %c0_88 = arith.constant 0 : index
      %137 = vector.load %arg8[%c1_86, %136, %c0_87, %c0_88] : memref<4x18x18x2xf32, #tpu.memory_space<vmem>>, vector<1x1x15x2xf32>
      %138 = vector.shape_cast %137 : vector<1x1x15x2xf32> to vector<15x2xf32>
      %139 = vector.broadcast %134 : f32 to vector<15x2xf32>
      %140 = arith.mulf %139, %138 : vector<15x2xf32>
      %141 = arith.addf %133, %140 : vector<15x2xf32>
      %c16 = arith.constant 16 : index
      %142 = memref.load %arg6[%c16] : memref<144xf32, #tpu.memory_space<smem>>
      %c2_i32_89 = arith.constant 2 : i32
      %143 = arith.addi %arg9, %c2_i32_89 : i32
      %c1_90 = arith.constant 1 : index
      %144 = arith.index_cast %143 : i32 to index
      %c1_91 = arith.constant 1 : index
      %c0_92 = arith.constant 0 : index
      %145 = vector.load %arg8[%c1_90, %144, %c1_91, %c0_92] : memref<4x18x18x2xf32, #tpu.memory_space<vmem>>, vector<1x1x15x2xf32>
      %146 = vector.shape_cast %145 : vector<1x1x15x2xf32> to vector<15x2xf32>
      %147 = vector.broadcast %142 : f32 to vector<15x2xf32>
      %148 = arith.mulf %147, %146 : vector<15x2xf32>
      %149 = arith.addf %141, %148 : vector<15x2xf32>
      %c17_93 = arith.constant 17 : index
      %150 = memref.load %arg6[%c17_93] : memref<144xf32, #tpu.memory_space<smem>>
      %c2_i32_94 = arith.constant 2 : i32
      %151 = arith.addi %arg9, %c2_i32_94 : i32
      %c1_95 = arith.constant 1 : index
      %152 = arith.index_cast %151 : i32 to index
      %c2_96 = arith.constant 2 : index
      %c0_97 = arith.constant 0 : index
      %153 = vector.load %arg8[%c1_95, %152, %c2_96, %c0_97] : memref<4x18x18x2xf32, #tpu.memory_space<vmem>>, vector<1x1x15x2xf32>
      %154 = vector.shape_cast %153 : vector<1x1x15x2xf32> to vector<15x2xf32>
      %155 = vector.broadcast %150 : f32 to vector<15x2xf32>
      %156 = arith.mulf %155, %154 : vector<15x2xf32>
      %157 = arith.addf %149, %156 : vector<15x2xf32>
      %c18 = arith.constant 18 : index
      %158 = memref.load %arg6[%c18] : memref<144xf32, #tpu.memory_space<smem>>
      %c0_i32_98 = arith.constant 0 : i32
      %159 = arith.addi %arg9, %c0_i32_98 : i32
      %c2_99 = arith.constant 2 : index
      %160 = arith.index_cast %159 : i32 to index
      %c0_100 = arith.constant 0 : index
      %c0_101 = arith.constant 0 : index
      %161 = vector.load %arg8[%c2_99, %160, %c0_100, %c0_101] : memref<4x18x18x2xf32, #tpu.memory_space<vmem>>, vector<1x1x15x2xf32>
      %162 = vector.shape_cast %161 : vector<1x1x15x2xf32> to vector<15x2xf32>
      %163 = vector.broadcast %158 : f32 to vector<15x2xf32>
      %164 = arith.mulf %163, %162 : vector<15x2xf32>
      %165 = arith.addf %157, %164 : vector<15x2xf32>
      %c19 = arith.constant 19 : index
      %166 = memref.load %arg6[%c19] : memref<144xf32, #tpu.memory_space<smem>>
      %c0_i32_102 = arith.constant 0 : i32
      %167 = arith.addi %arg9, %c0_i32_102 : i32
      %c2_103 = arith.constant 2 : index
      %168 = arith.index_cast %167 : i32 to index
      %c1_104 = arith.constant 1 : index
      %c0_105 = arith.constant 0 : index
      %169 = vector.load %arg8[%c2_103, %168, %c1_104, %c0_105] : memref<4x18x18x2xf32, #tpu.memory_space<vmem>>, vector<1x1x15x2xf32>
      %170 = vector.shape_cast %169 : vector<1x1x15x2xf32> to vector<15x2xf32>
      %171 = vector.broadcast %166 : f32 to vector<15x2xf32>
      %172 = arith.mulf %171, %170 : vector<15x2xf32>
      %173 = arith.addf %165, %172 : vector<15x2xf32>
      %c20 = arith.constant 20 : index
      %174 = memref.load %arg6[%c20] : memref<144xf32, #tpu.memory_space<smem>>
      %c0_i32_106 = arith.constant 0 : i32
      %175 = arith.addi %arg9, %c0_i32_106 : i32
      %c2_107 = arith.constant 2 : index
      %176 = arith.index_cast %175 : i32 to index
      %c2_108 = arith.constant 2 : index
      %c0_109 = arith.constant 0 : index
      %177 = vector.load %arg8[%c2_107, %176, %c2_108, %c0_109] : memref<4x18x18x2xf32, #tpu.memory_space<vmem>>, vector<1x1x15x2xf32>
      %178 = vector.shape_cast %177 : vector<1x1x15x2xf32> to vector<15x2xf32>
      %179 = vector.broadcast %174 : f32 to vector<15x2xf32>
      %180 = arith.mulf %179, %178 : vector<15x2xf32>
      %181 = arith.addf %173, %180 : vector<15x2xf32>
      %c21 = arith.constant 21 : index
      %182 = memref.load %arg6[%c21] : memref<144xf32, #tpu.memory_space<smem>>
      %c1_i32_110 = arith.constant 1 : i32
      %183 = arith.addi %arg9, %c1_i32_110 : i32
      %c2_111 = arith.constant 2 : index
      %184 = arith.index_cast %183 : i32 to index
      %c0_112 = arith.constant 0 : index
      %c0_113 = arith.constant 0 : index
      %185 = vector.load %arg8[%c2_111, %184, %c0_112, %c0_113] : memref<4x18x18x2xf32, #tpu.memory_space<vmem>>, vector<1x1x15x2xf32>
      %186 = vector.shape_cast %185 : vector<1x1x15x2xf32> to vector<15x2xf32>
      %187 = vector.broadcast %182 : f32 to vector<15x2xf32>
      %188 = arith.mulf %187, %186 : vector<15x2xf32>
      %189 = arith.addf %181, %188 : vector<15x2xf32>
      %c22 = arith.constant 22 : index
      %190 = memref.load %arg6[%c22] : memref<144xf32, #tpu.memory_space<smem>>
      %c1_i32_114 = arith.constant 1 : i32
      %191 = arith.addi %arg9, %c1_i32_114 : i32
      %c2_115 = arith.constant 2 : index
      %192 = arith.index_cast %191 : i32 to index
      %c1_116 = arith.constant 1 : index
      %c0_117 = arith.constant 0 : index
      %193 = vector.load %arg8[%c2_115, %192, %c1_116, %c0_117] : memref<4x18x18x2xf32, #tpu.memory_space<vmem>>, vector<1x1x15x2xf32>
      %194 = vector.shape_cast %193 : vector<1x1x15x2xf32> to vector<15x2xf32>
      %195 = vector.broadcast %190 : f32 to vector<15x2xf32>
      %196 = arith.mulf %195, %194 : vector<15x2xf32>
      %197 = arith.addf %189, %196 : vector<15x2xf32>
      %c23 = arith.constant 23 : index
      %198 = memref.load %arg6[%c23] : memref<144xf32, #tpu.memory_space<smem>>
      %c1_i32_118 = arith.constant 1 : i32
      %199 = arith.addi %arg9, %c1_i32_118 : i32
      %c2_119 = arith.constant 2 : index
      %200 = arith.index_cast %199 : i32 to index
      %c2_120 = arith.constant 2 : index
      %c0_121 = arith.constant 0 : index
      %201 = vector.load %arg8[%c2_119, %200, %c2_120, %c0_121] : memref<4x18x18x2xf32, #tpu.memory_space<vmem>>, vector<1x1x15x2xf32>
      %202 = vector.shape_cast %201 : vector<1x1x15x2xf32> to vector<15x2xf32>
      %203 = vector.broadcast %198 : f32 to vector<15x2xf32>
      %204 = arith.mulf %203, %202 : vector<15x2xf32>
      %205 = arith.addf %197, %204 : vector<15x2xf32>
      %c24 = arith.constant 24 : index
      %206 = memref.load %arg6[%c24] : memref<144xf32, #tpu.memory_space<smem>>
      %c2_i32_122 = arith.constant 2 : i32
      %207 = arith.addi %arg9, %c2_i32_122 : i32
      %c2_123 = arith.constant 2 : index
      %208 = arith.index_cast %207 : i32 to index
      %c0_124 = arith.constant 0 : index
      %c0_125 = arith.constant 0 : index
      %209 = vector.load %arg8[%c2_123, %208, %c0_124, %c0_125] : memref<4x18x18x2xf32, #tpu.memory_space<vmem>>, vector<1x1x15x2xf32>
      %210 = vector.shape_cast %209 : vector<1x1x15x2xf32> to vector<15x2xf32>
      %211 = vector.broadcast %206 : f32 to vector<15x2xf32>
      %212 = arith.mulf %211, %210 : vector<15x2xf32>
      %213 = arith.addf %205, %212 : vector<15x2xf32>
      %c25 = arith.constant 25 : index
      %214 = memref.load %arg6[%c25] : memref<144xf32, #tpu.memory_space<smem>>
      %c2_i32_126 = arith.constant 2 : i32
      %215 = arith.addi %arg9, %c2_i32_126 : i32
      %c2_127 = arith.constant 2 : index
      %216 = arith.index_cast %215 : i32 to index
      %c1_128 = arith.constant 1 : index
      %c0_129 = arith.constant 0 : index
      %217 = vector.load %arg8[%c2_127, %216, %c1_128, %c0_129] : memref<4x18x18x2xf32, #tpu.memory_space<vmem>>, vector<1x1x15x2xf32>
      %218 = vector.shape_cast %217 : vector<1x1x15x2xf32> to vector<15x2xf32>
      %219 = vector.broadcast %214 : f32 to vector<15x2xf32>
      %220 = arith.mulf %219, %218 : vector<15x2xf32>
      %221 = arith.addf %213, %220 : vector<15x2xf32>
      %c26 = arith.constant 26 : index
      %222 = memref.load %arg6[%c26] : memref<144xf32, #tpu.memory_space<smem>>
      %c2_i32_130 = arith.constant 2 : i32
      %223 = arith.addi %arg9, %c2_i32_130 : i32
      %c2_131 = arith.constant 2 : index
      %224 = arith.index_cast %223 : i32 to index
      %c2_132 = arith.constant 2 : index
      %c0_133 = arith.constant 0 : index
      %225 = vector.load %arg8[%c2_131, %224, %c2_132, %c0_133] : memref<4x18x18x2xf32, #tpu.memory_space<vmem>>, vector<1x1x15x2xf32>
      %226 = vector.shape_cast %225 : vector<1x1x15x2xf32> to vector<15x2xf32>
      %227 = vector.broadcast %222 : f32 to vector<15x2xf32>
      %228 = arith.mulf %227, %226 : vector<15x2xf32>
      %229 = arith.addf %221, %228 : vector<15x2xf32>
      %c27 = arith.constant 27 : index
      %230 = memref.load %arg6[%c27] : memref<144xf32, #tpu.memory_space<smem>>
      %c0_i32_134 = arith.constant 0 : i32
      %231 = arith.addi %arg9, %c0_i32_134 : i32
      %c3_135 = arith.constant 3 : index
      %232 = arith.index_cast %231 : i32 to index
      %c0_136 = arith.constant 0 : index
      %c0_137 = arith.constant 0 : index
      %233 = vector.load %arg8[%c3_135, %232, %c0_136, %c0_137] : memref<4x18x18x2xf32, #tpu.memory_space<vmem>>, vector<1x1x15x2xf32>
      %234 = vector.shape_cast %233 : vector<1x1x15x2xf32> to vector<15x2xf32>
      %235 = vector.broadcast %230 : f32 to vector<15x2xf32>
      %236 = arith.mulf %235, %234 : vector<15x2xf32>
      %237 = arith.addf %229, %236 : vector<15x2xf32>
      %c28 = arith.constant 28 : index
      %238 = memref.load %arg6[%c28] : memref<144xf32, #tpu.memory_space<smem>>
      %c0_i32_138 = arith.constant 0 : i32
      %239 = arith.addi %arg9, %c0_i32_138 : i32
      %c3_139 = arith.constant 3 : index
      %240 = arith.index_cast %239 : i32 to index
      %c1_140 = arith.constant 1 : index
      %c0_141 = arith.constant 0 : index
      %241 = vector.load %arg8[%c3_139, %240, %c1_140, %c0_141] : memref<4x18x18x2xf32, #tpu.memory_space<vmem>>, vector<1x1x15x2xf32>
      %242 = vector.shape_cast %241 : vector<1x1x15x2xf32> to vector<15x2xf32>
      %243 = vector.broadcast %238 : f32 to vector<15x2xf32>
      %244 = arith.mulf %243, %242 : vector<15x2xf32>
      %245 = arith.addf %237, %244 : vector<15x2xf32>
      %c29 = arith.constant 29 : index
      %246 = memref.load %arg6[%c29] : memref<144xf32, #tpu.memory_space<smem>>
      %c0_i32_142 = arith.constant 0 : i32
      %247 = arith.addi %arg9, %c0_i32_142 : i32
      %c3_143 = arith.constant 3 : index
      %248 = arith.index_cast %247 : i32 to index
      %c2_144 = arith.constant 2 : index
      %c0_145 = arith.constant 0 : index
      %249 = vector.load %arg8[%c3_143, %248, %c2_144, %c0_145] : memref<4x18x18x2xf32, #tpu.memory_space<vmem>>, vector<1x1x15x2xf32>
      %250 = vector.shape_cast %249 : vector<1x1x15x2xf32> to vector<15x2xf32>
      %251 = vector.broadcast %246 : f32 to vector<15x2xf32>
      %252 = arith.mulf %251, %250 : vector<15x2xf32>
      %253 = arith.addf %245, %252 : vector<15x2xf32>
      %c30 = arith.constant 30 : index
      %254 = memref.load %arg6[%c30] : memref<144xf32, #tpu.memory_space<smem>>
      %c1_i32_146 = arith.constant 1 : i32
      %255 = arith.addi %arg9, %c1_i32_146 : i32
      %c3_147 = arith.constant 3 : index
      %256 = arith.index_cast %255 : i32 to index
      %c0_148 = arith.constant 0 : index
      %c0_149 = arith.constant 0 : index
      %257 = vector.load %arg8[%c3_147, %256, %c0_148, %c0_149] : memref<4x18x18x2xf32, #tpu.memory_space<vmem>>, vector<1x1x15x2xf32>
      %258 = vector.shape_cast %257 : vector<1x1x15x2xf32> to vector<15x2xf32>
      %259 = vector.broadcast %254 : f32 to vector<15x2xf32>
      %260 = arith.mulf %259, %258 : vector<15x2xf32>
      %261 = arith.addf %253, %260 : vector<15x2xf32>
      %c31 = arith.constant 31 : index
      %262 = memref.load %arg6[%c31] : memref<144xf32, #tpu.memory_space<smem>>
      %c1_i32_150 = arith.constant 1 : i32
      %263 = arith.addi %arg9, %c1_i32_150 : i32
      %c3_151 = arith.constant 3 : index
      %264 = arith.index_cast %263 : i32 to index
      %c1_152 = arith.constant 1 : index
      %c0_153 = arith.constant 0 : index
      %265 = vector.load %arg8[%c3_151, %264, %c1_152, %c0_153] : memref<4x18x18x2xf32, #tpu.memory_space<vmem>>, vector<1x1x15x2xf32>
      %266 = vector.shape_cast %265 : vector<1x1x15x2xf32> to vector<15x2xf32>
      %267 = vector.broadcast %262 : f32 to vector<15x2xf32>
      %268 = arith.mulf %267, %266 : vector<15x2xf32>
      %269 = arith.addf %261, %268 : vector<15x2xf32>
      %c32 = arith.constant 32 : index
      %270 = memref.load %arg6[%c32] : memref<144xf32, #tpu.memory_space<smem>>
      %c1_i32_154 = arith.constant 1 : i32
      %271 = arith.addi %arg9, %c1_i32_154 : i32
      %c3_155 = arith.constant 3 : index
      %272 = arith.index_cast %271 : i32 to index
      %c2_156 = arith.constant 2 : index
      %c0_157 = arith.constant 0 : index
      %273 = vector.load %arg8[%c3_155, %272, %c2_156, %c0_157] : memref<4x18x18x2xf32, #tpu.memory_space<vmem>>, vector<1x1x15x2xf32>
      %274 = vector.shape_cast %273 : vector<1x1x15x2xf32> to vector<15x2xf32>
      %275 = vector.broadcast %270 : f32 to vector<15x2xf32>
      %276 = arith.mulf %275, %274 : vector<15x2xf32>
      %277 = arith.addf %269, %276 : vector<15x2xf32>
      %c33 = arith.constant 33 : index
      %278 = memref.load %arg6[%c33] : memref<144xf32, #tpu.memory_space<smem>>
      %c2_i32_158 = arith.constant 2 : i32
      %279 = arith.addi %arg9, %c2_i32_158 : i32
      %c3_159 = arith.constant 3 : index
      %280 = arith.index_cast %279 : i32 to index
      %c0_160 = arith.constant 0 : index
      %c0_161 = arith.constant 0 : index
      %281 = vector.load %arg8[%c3_159, %280, %c0_160, %c0_161] : memref<4x18x18x2xf32, #tpu.memory_space<vmem>>, vector<1x1x15x2xf32>
      %282 = vector.shape_cast %281 : vector<1x1x15x2xf32> to vector<15x2xf32>
      %283 = vector.broadcast %278 : f32 to vector<15x2xf32>
      %284 = arith.mulf %283, %282 : vector<15x2xf32>
      %285 = arith.addf %277, %284 : vector<15x2xf32>
      %c34 = arith.constant 34 : index
      %286 = memref.load %arg6[%c34] : memref<144xf32, #tpu.memory_space<smem>>
      %c2_i32_162 = arith.constant 2 : i32
      %287 = arith.addi %arg9, %c2_i32_162 : i32
      %c3_163 = arith.constant 3 : index
      %288 = arith.index_cast %287 : i32 to index
      %c1_164 = arith.constant 1 : index
      %c0_165 = arith.constant 0 : index
      %289 = vector.load %arg8[%c3_163, %288, %c1_164, %c0_165] : memref<4x18x18x2xf32, #tpu.memory_space<vmem>>, vector<1x1x15x2xf32>
      %290 = vector.shape_cast %289 : vector<1x1x15x2xf32> to vector<15x2xf32>
      %291 = vector.broadcast %286 : f32 to vector<15x2xf32>
      %292 = arith.mulf %291, %290 : vector<15x2xf32>
      %293 = arith.addf %285, %292 : vector<15x2xf32>
      %c35 = arith.constant 35 : index
      %294 = memref.load %arg6[%c35] : memref<144xf32, #tpu.memory_space<smem>>
      %c2_i32_166 = arith.constant 2 : i32
      %295 = arith.addi %arg9, %c2_i32_166 : i32
      %c3_167 = arith.constant 3 : index
      %296 = arith.index_cast %295 : i32 to index
      %c2_168 = arith.constant 2 : index
      %c0_169 = arith.constant 0 : index
      %297 = vector.load %arg8[%c3_167, %296, %c2_168, %c0_169] : memref<4x18x18x2xf32, #tpu.memory_space<vmem>>, vector<1x1x15x2xf32>
      %298 = vector.shape_cast %297 : vector<1x1x15x2xf32> to vector<15x2xf32>
      %299 = vector.broadcast %294 : f32 to vector<15x2xf32>
      %300 = arith.mulf %299, %298 : vector<15x2xf32>
      %301 = arith.addf %293, %300 : vector<15x2xf32>
      %c0_170 = arith.constant 0 : index
      %302 = arith.index_cast %arg9 : i32 to index
      %c0_171 = arith.constant 0 : index
      %c0_172 = arith.constant 0 : index
      %303 = vector.load %arg5[%c0_170, %302, %c0_171, %c0_172] : memref<4x16x16x1xf32, #tpu.memory_space<vmem>>, vector<1x1x15x1xf32>
      %304 = vector.shape_cast %303 : vector<1x1x15x1xf32> to vector<15x1xf32>
      %305 = vector.broadcast %304 : vector<15x1xf32> to vector<15x2xf32>
      %306 = arith.mulf %301, %305 : vector<15x2xf32>
      %c0_173 = arith.constant 0 : index
      %307 = arith.index_cast %arg9 : i32 to index
      %c0_174 = arith.constant 0 : index
      %c0_175 = arith.constant 0 : index
      %308 = vector.load %arg4[%c0_173, %307, %c0_174, %c0_175] : memref<4x16x16x1xf32, #tpu.memory_space<vmem>>, vector<1x1x15x1xf32>
      %309 = vector.shape_cast %308 : vector<1x1x15x1xf32> to vector<15x1xf32>
      %310 = vector.broadcast %309 : vector<15x1xf32> to vector<15x2xf32>
      %311 = arith.addf %306, %310 : vector<15x2xf32>
      %312 = vector.extract_strided_slice %12 {offsets = [0, 0, 0], sizes = [1, 15, 2], strides = [1, 1, 1]} : vector<4x15x2xf32> to vector<1x15x2xf32>
      %313 = vector.shape_cast %312 : vector<1x15x2xf32> to vector<15x2xf32>
      %314 = arith.subf %311, %313 : vector<15x2xf32>
      %c0_176 = arith.constant 0 : index
      %315 = arith.index_cast %arg9 : i32 to index
      %c0_177 = arith.constant 0 : index
      %c0_178 = arith.constant 0 : index
      %316 = vector.load %arg7[%c0_176, %315, %c0_177, %c0_178] : memref<4x16x15x2xf32, #tpu.memory_space<vmem>>, vector<1x1x15x2xf32>
      %317 = vector.shape_cast %316 : vector<1x1x15x2xf32> to vector<15x2xf32>
      %318 = vector.shape_cast %314 : vector<15x2xf32> to vector<1x1x15x2xf32>
      tpu.vector_store %arg7[%c0_176, %315, %c0_177, %c0_178], %318 {strides = array<i32>} : memref<4x16x15x2xf32, #tpu.memory_space<vmem>>, vector<1x1x15x2xf32>,
      %cst_179 = arith.constant 0.000000e+00 : f32
      %319 = vector.broadcast %cst_179 : f32 to vector<15x2xf32>
      %c36 = arith.constant 36 : index
      %320 = memref.load %arg6[%c36] : memref<144xf32, #tpu.memory_space<smem>>
      %c0_i32_180 = arith.constant 0 : i32
      %321 = arith.addi %arg9, %c0_i32_180 : i32
      %c0_181 = arith.constant 0 : index
      %322 = arith.index_cast %321 : i32 to index
      %c0_182 = arith.constant 0 : index
      %c0_183 = arith.constant 0 : index
      %323 = vector.load %arg8[%c0_181, %322, %c0_182, %c0_183] : memref<4x18x18x2xf32, #tpu.memory_space<vmem>>, vector<1x1x15x2xf32>
      %324 = vector.shape_cast %323 : vector<1x1x15x2xf32> to vector<15x2xf32>
      %325 = vector.broadcast %320 : f32 to vector<15x2xf32>
      %326 = arith.mulf %325, %324 : vector<15x2xf32>
      %327 = arith.addf %319, %326 : vector<15x2xf32>
      %c37 = arith.constant 37 : index
      %328 = memref.load %arg6[%c37] : memref<144xf32, #tpu.memory_space<smem>>
      %c0_i32_184 = arith.constant 0 : i32
      %329 = arith.addi %arg9, %c0_i32_184 : i32
      %c0_185 = arith.constant 0 : index
      %330 = arith.index_cast %329 : i32 to index
      %c1_186 = arith.constant 1 : index
      %c0_187 = arith.constant 0 : index
      %331 = vector.load %arg8[%c0_185, %330, %c1_186, %c0_187] : memref<4x18x18x2xf32, #tpu.memory_space<vmem>>, vector<1x1x15x2xf32>
      %332 = vector.shape_cast %331 : vector<1x1x15x2xf32> to vector<15x2xf32>
      %333 = vector.broadcast %328 : f32 to vector<15x2xf32>
      %334 = arith.mulf %333, %332 : vector<15x2xf32>
      %335 = arith.addf %327, %334 : vector<15x2xf32>
      %c38 = arith.constant 38 : index
      %336 = memref.load %arg6[%c38] : memref<144xf32, #tpu.memory_space<smem>>
      %c0_i32_188 = arith.constant 0 : i32
      %337 = arith.addi %arg9, %c0_i32_188 : i32
      %c0_189 = arith.constant 0 : index
      %338 = arith.index_cast %337 : i32 to index
      %c2_190 = arith.constant 2 : index
      %c0_191 = arith.constant 0 : index
      %339 = vector.load %arg8[%c0_189, %338, %c2_190, %c0_191] : memref<4x18x18x2xf32, #tpu.memory_space<vmem>>, vector<1x1x15x2xf32>
      %340 = vector.shape_cast %339 : vector<1x1x15x2xf32> to vector<15x2xf32>
      %341 = vector.broadcast %336 : f32 to vector<15x2xf32>
      %342 = arith.mulf %341, %340 : vector<15x2xf32>
      %343 = arith.addf %335, %342 : vector<15x2xf32>
      %c39 = arith.constant 39 : index
      %344 = memref.load %arg6[%c39] : memref<144xf32, #tpu.memory_space<smem>>
      %c1_i32_192 = arith.constant 1 : i32
      %345 = arith.addi %arg9, %c1_i32_192 : i32
      %c0_193 = arith.constant 0 : index
      %346 = arith.index_cast %345 : i32 to index
      %c0_194 = arith.constant 0 : index
      %c0_195 = arith.constant 0 : index
      %347 = vector.load %arg8[%c0_193, %346, %c0_194, %c0_195] : memref<4x18x18x2xf32, #tpu.memory_space<vmem>>, vector<1x1x15x2xf32>
      %348 = vector.shape_cast %347 : vector<1x1x15x2xf32> to vector<15x2xf32>
      %349 = vector.broadcast %344 : f32 to vector<15x2xf32>
      %350 = arith.mulf %349, %348 : vector<15x2xf32>
      %351 = arith.addf %343, %350 : vector<15x2xf32>
      %c40 = arith.constant 40 : index
      %352 = memref.load %arg6[%c40] : memref<144xf32, #tpu.memory_space<smem>>
      %c1_i32_196 = arith.constant 1 : i32
      %353 = arith.addi %arg9, %c1_i32_196 : i32
      %c0_197 = arith.constant 0 : index
      %354 = arith.index_cast %353 : i32 to index
      %c1_198 = arith.constant 1 : index
      %c0_199 = arith.constant 0 : index
      %355 = vector.load %arg8[%c0_197, %354, %c1_198, %c0_199] : memref<4x18x18x2xf32, #tpu.memory_space<vmem>>, vector<1x1x15x2xf32>
      %356 = vector.shape_cast %355 : vector<1x1x15x2xf32> to vector<15x2xf32>
      %357 = vector.broadcast %352 : f32 to vector<15x2xf32>
      %358 = arith.mulf %357, %356 : vector<15x2xf32>
      %359 = arith.addf %351, %358 : vector<15x2xf32>
      %c41 = arith.constant 41 : index
      %360 = memref.load %arg6[%c41] : memref<144xf32, #tpu.memory_space<smem>>
      %c1_i32_200 = arith.constant 1 : i32
      %361 = arith.addi %arg9, %c1_i32_200 : i32
      %c0_201 = arith.constant 0 : index
      %362 = arith.index_cast %361 : i32 to index
      %c2_202 = arith.constant 2 : index
      %c0_203 = arith.constant 0 : index
      %363 = vector.load %arg8[%c0_201, %362, %c2_202, %c0_203] : memref<4x18x18x2xf32, #tpu.memory_space<vmem>>, vector<1x1x15x2xf32>
      %364 = vector.shape_cast %363 : vector<1x1x15x2xf32> to vector<15x2xf32>
      %365 = vector.broadcast %360 : f32 to vector<15x2xf32>
      %366 = arith.mulf %365, %364 : vector<15x2xf32>
      %367 = arith.addf %359, %366 : vector<15x2xf32>
      %c42 = arith.constant 42 : index
      %368 = memref.load %arg6[%c42] : memref<144xf32, #tpu.memory_space<smem>>
      %c2_i32_204 = arith.constant 2 : i32
      %369 = arith.addi %arg9, %c2_i32_204 : i32
      %c0_205 = arith.constant 0 : index
      %370 = arith.index_cast %369 : i32 to index
      %c0_206 = arith.constant 0 : index
      %c0_207 = arith.constant 0 : index
      %371 = vector.load %arg8[%c0_205, %370, %c0_206, %c0_207] : memref<4x18x18x2xf32, #tpu.memory_space<vmem>>, vector<1x1x15x2xf32>
      %372 = vector.shape_cast %371 : vector<1x1x15x2xf32> to vector<15x2xf32>
      %373 = vector.broadcast %368 : f32 to vector<15x2xf32>
      %374 = arith.mulf %373, %372 : vector<15x2xf32>
      %375 = arith.addf %367, %374 : vector<15x2xf32>
      %c43 = arith.constant 43 : index
      %376 = memref.load %arg6[%c43] : memref<144xf32, #tpu.memory_space<smem>>
      %c2_i32_208 = arith.constant 2 : i32
      %377 = arith.addi %arg9, %c2_i32_208 : i32
      %c0_209 = arith.constant 0 : index
      %378 = arith.index_cast %377 : i32 to index
      %c1_210 = arith.constant 1 : index
      %c0_211 = arith.constant 0 : index
      %379 = vector.load %arg8[%c0_209, %378, %c1_210, %c0_211] : memref<4x18x18x2xf32, #tpu.memory_space<vmem>>, vector<1x1x15x2xf32>
      %380 = vector.shape_cast %379 : vector<1x1x15x2xf32> to vector<15x2xf32>
      %381 = vector.broadcast %376 : f32 to vector<15x2xf32>
      %382 = arith.mulf %381, %380 : vector<15x2xf32>
      %383 = arith.addf %375, %382 : vector<15x2xf32>
      %c44 = arith.constant 44 : index
      %384 = memref.load %arg6[%c44] : memref<144xf32, #tpu.memory_space<smem>>
      %c2_i32_212 = arith.constant 2 : i32
      %385 = arith.addi %arg9, %c2_i32_212 : i32
      %c0_213 = arith.constant 0 : index
      %386 = arith.index_cast %385 : i32 to index
      %c2_214 = arith.constant 2 : index
      %c0_215 = arith.constant 0 : index
      %387 = vector.load %arg8[%c0_213, %386, %c2_214, %c0_215] : memref<4x18x18x2xf32, #tpu.memory_space<vmem>>, vector<1x1x15x2xf32>
      %388 = vector.shape_cast %387 : vector<1x1x15x2xf32> to vector<15x2xf32>
      %389 = vector.broadcast %384 : f32 to vector<15x2xf32>
      %390 = arith.mulf %389, %388 : vector<15x2xf32>
      %391 = arith.addf %383, %390 : vector<15x2xf32>
      %c45 = arith.constant 45 : index
      %392 = memref.load %arg6[%c45] : memref<144xf32, #tpu.memory_space<smem>>
      %c0_i32_216 = arith.constant 0 : i32
      %393 = arith.addi %arg9, %c0_i32_216 : i32
      %c1_217 = arith.constant 1 : index
      %394 = arith.index_cast %393 : i32 to index
      %c0_218 = arith.constant 0 : index
      %c0_219 = arith.constant 0 : index
      %395 = vector.load %arg8[%c1_217, %394, %c0_218, %c0_219] : memref<4x18x18x2xf32, #tpu.memory_space<vmem>>, vector<1x1x15x2xf32>
      %396 = vector.shape_cast %395 : vector<1x1x15x2xf32> to vector<15x2xf32>
      %397 = vector.broadcast %392 : f32 to vector<15x2xf32>
      %398 = arith.mulf %397, %396 : vector<15x2xf32>
      %399 = arith.addf %391, %398 : vector<15x2xf32>
      %c46 = arith.constant 46 : index
      %400 = memref.load %arg6[%c46] : memref<144xf32, #tpu.memory_space<smem>>
      %c0_i32_220 = arith.constant 0 : i32
      %401 = arith.addi %arg9, %c0_i32_220 : i32
      %c1_221 = arith.constant 1 : index
      %402 = arith.index_cast %401 : i32 to index
      %c1_222 = arith.constant 1 : index
      %c0_223 = arith.constant 0 : index
      %403 = vector.load %arg8[%c1_221, %402, %c1_222, %c0_223] : memref<4x18x18x2xf32, #tpu.memory_space<vmem>>, vector<1x1x15x2xf32>
      %404 = vector.shape_cast %403 : vector<1x1x15x2xf32> to vector<15x2xf32>
      %405 = vector.broadcast %400 : f32 to vector<15x2xf32>
      %406 = arith.mulf %405, %404 : vector<15x2xf32>
      %407 = arith.addf %399, %406 : vector<15x2xf32>
      %c47 = arith.constant 47 : index
      %408 = memref.load %arg6[%c47] : memref<144xf32, #tpu.memory_space<smem>>
      %c0_i32_224 = arith.constant 0 : i32
      %409 = arith.addi %arg9, %c0_i32_224 : i32
      %c1_225 = arith.constant 1 : index
      %410 = arith.index_cast %409 : i32 to index
      %c2_226 = arith.constant 2 : index
      %c0_227 = arith.constant 0 : index
      %411 = vector.load %arg8[%c1_225, %410, %c2_226, %c0_227] : memref<4x18x18x2xf32, #tpu.memory_space<vmem>>, vector<1x1x15x2xf32>
      %412 = vector.shape_cast %411 : vector<1x1x15x2xf32> to vector<15x2xf32>
      %413 = vector.broadcast %408 : f32 to vector<15x2xf32>
      %414 = arith.mulf %413, %412 : vector<15x2xf32>
      %415 = arith.addf %407, %414 : vector<15x2xf32>
      %c48 = arith.constant 48 : index
      %416 = memref.load %arg6[%c48] : memref<144xf32, #tpu.memory_space<smem>>
      %c1_i32_228 = arith.constant 1 : i32
      %417 = arith.addi %arg9, %c1_i32_228 : i32
      %c1_229 = arith.constant 1 : index
      %418 = arith.index_cast %417 : i32 to index
      %c0_230 = arith.constant 0 : index
      %c0_231 = arith.constant 0 : index
      %419 = vector.load %arg8[%c1_229, %418, %c0_230, %c0_231] : memref<4x18x18x2xf32, #tpu.memory_space<vmem>>, vector<1x1x15x2xf32>
      %420 = vector.shape_cast %419 : vector<1x1x15x2xf32> to vector<15x2xf32>
      %421 = vector.broadcast %416 : f32 to vector<15x2xf32>
      %422 = arith.mulf %421, %420 : vector<15x2xf32>
      %423 = arith.addf %415, %422 : vector<15x2xf32>
      %c49 = arith.constant 49 : index
      %424 = memref.load %arg6[%c49] : memref<144xf32, #tpu.memory_space<smem>>
      %c1_i32_232 = arith.constant 1 : i32
      %425 = arith.addi %arg9, %c1_i32_232 : i32
      %c1_233 = arith.constant 1 : index
      %426 = arith.index_cast %425 : i32 to index
      %c1_234 = arith.constant 1 : index
      %c0_235 = arith.constant 0 : index
      %427 = vector.load %arg8[%c1_233, %426, %c1_234, %c0_235] : memref<4x18x18x2xf32, #tpu.memory_space<vmem>>, vector<1x1x15x2xf32>
      %428 = vector.shape_cast %427 : vector<1x1x15x2xf32> to vector<15x2xf32>
      %429 = vector.broadcast %424 : f32 to vector<15x2xf32>
      %430 = arith.mulf %429, %428 : vector<15x2xf32>
      %431 = arith.addf %423, %430 : vector<15x2xf32>
      %c50 = arith.constant 50 : index
      %432 = memref.load %arg6[%c50] : memref<144xf32, #tpu.memory_space<smem>>
      %c1_i32_236 = arith.constant 1 : i32
      %433 = arith.addi %arg9, %c1_i32_236 : i32
      %c1_237 = arith.constant 1 : index
      %434 = arith.index_cast %433 : i32 to index
      %c2_238 = arith.constant 2 : index
      %c0_239 = arith.constant 0 : index
      %435 = vector.load %arg8[%c1_237, %434, %c2_238, %c0_239] : memref<4x18x18x2xf32, #tpu.memory_space<vmem>>, vector<1x1x15x2xf32>
      %436 = vector.shape_cast %435 : vector<1x1x15x2xf32> to vector<15x2xf32>
      %437 = vector.broadcast %432 : f32 to vector<15x2xf32>
      %438 = arith.mulf %437, %436 : vector<15x2xf32>
      %439 = arith.addf %431, %438 : vector<15x2xf32>
      %c51 = arith.constant 51 : index
      %440 = memref.load %arg6[%c51] : memref<144xf32, #tpu.memory_space<smem>>
      %c2_i32_240 = arith.constant 2 : i32
      %441 = arith.addi %arg9, %c2_i32_240 : i32
      %c1_241 = arith.constant 1 : index
      %442 = arith.index_cast %441 : i32 to index
      %c0_242 = arith.constant 0 : index
      %c0_243 = arith.constant 0 : index
      %443 = vector.load %arg8[%c1_241, %442, %c0_242, %c0_243] : memref<4x18x18x2xf32, #tpu.memory_space<vmem>>, vector<1x1x15x2xf32>
      %444 = vector.shape_cast %443 : vector<1x1x15x2xf32> to vector<15x2xf32>
      %445 = vector.broadcast %440 : f32 to vector<15x2xf32>
      %446 = arith.mulf %445, %444 : vector<15x2xf32>
      %447 = arith.addf %439, %446 : vector<15x2xf32>
      %c52 = arith.constant 52 : index
      %448 = memref.load %arg6[%c52] : memref<144xf32, #tpu.memory_space<smem>>
      %c2_i32_244 = arith.constant 2 : i32
      %449 = arith.addi %arg9, %c2_i32_244 : i32
      %c1_245 = arith.constant 1 : index
      %450 = arith.index_cast %449 : i32 to index
      %c1_246 = arith.constant 1 : index
      %c0_247 = arith.constant 0 : index
      %451 = vector.load %arg8[%c1_245, %450, %c1_246, %c0_247] : memref<4x18x18x2xf32, #tpu.memory_space<vmem>>, vector<1x1x15x2xf32>
      %452 = vector.shape_cast %451 : vector<1x1x15x2xf32> to vector<15x2xf32>
      %453 = vector.broadcast %448 : f32 to vector<15x2xf32>
      %454 = arith.mulf %453, %452 : vector<15x2xf32>
      %455 = arith.addf %447, %454 : vector<15x2xf32>
      %c53 = arith.constant 53 : index
      %456 = memref.load %arg6[%c53] : memref<144xf32, #tpu.memory_space<smem>>
      %c2_i32_248 = arith.constant 2 : i32
      %457 = arith.addi %arg9, %c2_i32_248 : i32
      %c1_249 = arith.constant 1 : index
      %458 = arith.index_cast %457 : i32 to index
      %c2_250 = arith.constant 2 : index
      %c0_251 = arith.constant 0 : index
      %459 = vector.load %arg8[%c1_249, %458, %c2_250, %c0_251] : memref<4x18x18x2xf32, #tpu.memory_space<vmem>>, vector<1x1x15x2xf32>
      %460 = vector.shape_cast %459 : vector<1x1x15x2xf32> to vector<15x2xf32>
      %461 = vector.broadcast %456 : f32 to vector<15x2xf32>
      %462 = arith.mulf %461, %460 : vector<15x2xf32>
      %463 = arith.addf %455, %462 : vector<15x2xf32>
      %c54 = arith.constant 54 : index
      %464 = memref.load %arg6[%c54] : memref<144xf32, #tpu.memory_space<smem>>
      %c0_i32_252 = arith.constant 0 : i32
      %465 = arith.addi %arg9, %c0_i32_252 : i32
      %c2_253 = arith.constant 2 : index
      %466 = arith.index_cast %465 : i32 to index
      %c0_254 = arith.constant 0 : index
      %c0_255 = arith.constant 0 : index
      %467 = vector.load %arg8[%c2_253, %466, %c0_254, %c0_255] : memref<4x18x18x2xf32, #tpu.memory_space<vmem>>, vector<1x1x15x2xf32>
      %468 = vector.shape_cast %467 : vector<1x1x15x2xf32> to vector<15x2xf32>
      %469 = vector.broadcast %464 : f32 to vector<15x2xf32>
      %470 = arith.mulf %469, %468 : vector<15x2xf32>
      %471 = arith.addf %463, %470 : vector<15x2xf32>
      %c55 = arith.constant 55 : index
      %472 = memref.load %arg6[%c55] : memref<144xf32, #tpu.memory_space<smem>>
      %c0_i32_256 = arith.constant 0 : i32
      %473 = arith.addi %arg9, %c0_i32_256 : i32
      %c2_257 = arith.constant 2 : index
      %474 = arith.index_cast %473 : i32 to index
      %c1_258 = arith.constant 1 : index
      %c0_259 = arith.constant 0 : index
      %475 = vector.load %arg8[%c2_257, %474, %c1_258, %c0_259] : memref<4x18x18x2xf32, #tpu.memory_space<vmem>>, vector<1x1x15x2xf32>
      %476 = vector.shape_cast %475 : vector<1x1x15x2xf32> to vector<15x2xf32>
      %477 = vector.broadcast %472 : f32 to vector<15x2xf32>
      %478 = arith.mulf %477, %476 : vector<15x2xf32>
      %479 = arith.addf %471, %478 : vector<15x2xf32>
      %c56 = arith.constant 56 : index
      %480 = memref.load %arg6[%c56] : memref<144xf32, #tpu.memory_space<smem>>
      %c0_i32_260 = arith.constant 0 : i32
      %481 = arith.addi %arg9, %c0_i32_260 : i32
      %c2_261 = arith.constant 2 : index
      %482 = arith.index_cast %481 : i32 to index
      %c2_262 = arith.constant 2 : index
      %c0_263 = arith.constant 0 : index
      %483 = vector.load %arg8[%c2_261, %482, %c2_262, %c0_263] : memref<4x18x18x2xf32, #tpu.memory_space<vmem>>, vector<1x1x15x2xf32>
      %484 = vector.shape_cast %483 : vector<1x1x15x2xf32> to vector<15x2xf32>
      %485 = vector.broadcast %480 : f32 to vector<15x2xf32>
      %486 = arith.mulf %485, %484 : vector<15x2xf32>
      %487 = arith.addf %479, %486 : vector<15x2xf32>
      %c57 = arith.constant 57 : index
      %488 = memref.load %arg6[%c57] : memref<144xf32, #tpu.memory_space<smem>>
      %c1_i32_264 = arith.constant 1 : i32
      %489 = arith.addi %arg9, %c1_i32_264 : i32
      %c2_265 = arith.constant 2 : index
      %490 = arith.index_cast %489 : i32 to index
      %c0_266 = arith.constant 0 : index
      %c0_267 = arith.constant 0 : index
      %491 = vector.load %arg8[%c2_265, %490, %c0_266, %c0_267] : memref<4x18x18x2xf32, #tpu.memory_space<vmem>>, vector<1x1x15x2xf32>
      %492 = vector.shape_cast %491 : vector<1x1x15x2xf32> to vector<15x2xf32>
      %493 = vector.broadcast %488 : f32 to vector<15x2xf32>
      %494 = arith.mulf %493, %492 : vector<15x2xf32>
      %495 = arith.addf %487, %494 : vector<15x2xf32>
      %c58 = arith.constant 58 : index
      %496 = memref.load %arg6[%c58] : memref<144xf32, #tpu.memory_space<smem>>
      %c1_i32_268 = arith.constant 1 : i32
      %497 = arith.addi %arg9, %c1_i32_268 : i32
      %c2_269 = arith.constant 2 : index
      %498 = arith.index_cast %497 : i32 to index
      %c1_270 = arith.constant 1 : index
      %c0_271 = arith.constant 0 : index
      %499 = vector.load %arg8[%c2_269, %498, %c1_270, %c0_271] : memref<4x18x18x2xf32, #tpu.memory_space<vmem>>, vector<1x1x15x2xf32>
      %500 = vector.shape_cast %499 : vector<1x1x15x2xf32> to vector<15x2xf32>
      %501 = vector.broadcast %496 : f32 to vector<15x2xf32>
      %502 = arith.mulf %501, %500 : vector<15x2xf32>
      %503 = arith.addf %495, %502 : vector<15x2xf32>
      %c59 = arith.constant 59 : index
      %504 = memref.load %arg6[%c59] : memref<144xf32, #tpu.memory_space<smem>>
      %c1_i32_272 = arith.constant 1 : i32
      %505 = arith.addi %arg9, %c1_i32_272 : i32
      %c2_273 = arith.constant 2 : index
      %506 = arith.index_cast %505 : i32 to index
      %c2_274 = arith.constant 2 : index
      %c0_275 = arith.constant 0 : index
      %507 = vector.load %arg8[%c2_273, %506, %c2_274, %c0_275] : memref<4x18x18x2xf32, #tpu.memory_space<vmem>>, vector<1x1x15x2xf32>
      %508 = vector.shape_cast %507 : vector<1x1x15x2xf32> to vector<15x2xf32>
      %509 = vector.broadcast %504 : f32 to vector<15x2xf32>
      %510 = arith.mulf %509, %508 : vector<15x2xf32>
      %511 = arith.addf %503, %510 : vector<15x2xf32>
      %c60 = arith.constant 60 : index
      %512 = memref.load %arg6[%c60] : memref<144xf32, #tpu.memory_space<smem>>
      %c2_i32_276 = arith.constant 2 : i32
      %513 = arith.addi %arg9, %c2_i32_276 : i32
      %c2_277 = arith.constant 2 : index
      %514 = arith.index_cast %513 : i32 to index
      %c0_278 = arith.constant 0 : index
      %c0_279 = arith.constant 0 : index
      %515 = vector.load %arg8[%c2_277, %514, %c0_278, %c0_279] : memref<4x18x18x2xf32, #tpu.memory_space<vmem>>, vector<1x1x15x2xf32>
      %516 = vector.shape_cast %515 : vector<1x1x15x2xf32> to vector<15x2xf32>
      %517 = vector.broadcast %512 : f32 to vector<15x2xf32>
      %518 = arith.mulf %517, %516 : vector<15x2xf32>
      %519 = arith.addf %511, %518 : vector<15x2xf32>
      %c61 = arith.constant 61 : index
      %520 = memref.load %arg6[%c61] : memref<144xf32, #tpu.memory_space<smem>>
      %c2_i32_280 = arith.constant 2 : i32
      %521 = arith.addi %arg9, %c2_i32_280 : i32
      %c2_281 = arith.constant 2 : index
      %522 = arith.index_cast %521 : i32 to index
      %c1_282 = arith.constant 1 : index
      %c0_283 = arith.constant 0 : index
      %523 = vector.load %arg8[%c2_281, %522, %c1_282, %c0_283] : memref<4x18x18x2xf32, #tpu.memory_space<vmem>>, vector<1x1x15x2xf32>
      %524 = vector.shape_cast %523 : vector<1x1x15x2xf32> to vector<15x2xf32>
      %525 = vector.broadcast %520 : f32 to vector<15x2xf32>
      %526 = arith.mulf %525, %524 : vector<15x2xf32>
      %527 = arith.addf %519, %526 : vector<15x2xf32>
      %c62 = arith.constant 62 : index
      %528 = memref.load %arg6[%c62] : memref<144xf32, #tpu.memory_space<smem>>
      %c2_i32_284 = arith.constant 2 : i32
      %529 = arith.addi %arg9, %c2_i32_284 : i32
      %c2_285 = arith.constant 2 : index
      %530 = arith.index_cast %529 : i32 to index
      %c2_286 = arith.constant 2 : index
      %c0_287 = arith.constant 0 : index
      %531 = vector.load %arg8[%c2_285, %530, %c2_286, %c0_287] : memref<4x18x18x2xf32, #tpu.memory_space<vmem>>, vector<1x1x15x2xf32>
      %532 = vector.shape_cast %531 : vector<1x1x15x2xf32> to vector<15x2xf32>
      %533 = vector.broadcast %528 : f32 to vector<15x2xf32>
      %534 = arith.mulf %533, %532 : vector<15x2xf32>
      %535 = arith.addf %527, %534 : vector<15x2xf32>
      %c63 = arith.constant 63 : index
      %536 = memref.load %arg6[%c63] : memref<144xf32, #tpu.memory_space<smem>>
      %c0_i32_288 = arith.constant 0 : i32
      %537 = arith.addi %arg9, %c0_i32_288 : i32
      %c3_289 = arith.constant 3 : index
      %538 = arith.index_cast %537 : i32 to index
      %c0_290 = arith.constant 0 : index
      %c0_291 = arith.constant 0 : index
      %539 = vector.load %arg8[%c3_289, %538, %c0_290, %c0_291] : memref<4x18x18x2xf32, #tpu.memory_space<vmem>>, vector<1x1x15x2xf32>
      %540 = vector.shape_cast %539 : vector<1x1x15x2xf32> to vector<15x2xf32>
      %541 = vector.broadcast %536 : f32 to vector<15x2xf32>
      %542 = arith.mulf %541, %540 : vector<15x2xf32>
      %543 = arith.addf %535, %542 : vector<15x2xf32>
      %c64 = arith.constant 64 : index
      %544 = memref.load %arg6[%c64] : memref<144xf32, #tpu.memory_space<smem>>
      %c0_i32_292 = arith.constant 0 : i32
      %545 = arith.addi %arg9, %c0_i32_292 : i32
      %c3_293 = arith.constant 3 : index
      %546 = arith.index_cast %545 : i32 to index
      %c1_294 = arith.constant 1 : index
      %c0_295 = arith.constant 0 : index
      %547 = vector.load %arg8[%c3_293, %546, %c1_294, %c0_295] : memref<4x18x18x2xf32, #tpu.memory_space<vmem>>, vector<1x1x15x2xf32>
      %548 = vector.shape_cast %547 : vector<1x1x15x2xf32> to vector<15x2xf32>
      %549 = vector.broadcast %544 : f32 to vector<15x2xf32>
      %550 = arith.mulf %549, %548 : vector<15x2xf32>
      %551 = arith.addf %543, %550 : vector<15x2xf32>
      %c65 = arith.constant 65 : index
      %552 = memref.load %arg6[%c65] : memref<144xf32, #tpu.memory_space<smem>>
      %c0_i32_296 = arith.constant 0 : i32
      %553 = arith.addi %arg9, %c0_i32_296 : i32
      %c3_297 = arith.constant 3 : index
      %554 = arith.index_cast %553 : i32 to index
      %c2_298 = arith.constant 2 : index
      %c0_299 = arith.constant 0 : index
      %555 = vector.load %arg8[%c3_297, %554, %c2_298, %c0_299] : memref<4x18x18x2xf32, #tpu.memory_space<vmem>>, vector<1x1x15x2xf32>
      %556 = vector.shape_cast %555 : vector<1x1x15x2xf32> to vector<15x2xf32>
      %557 = vector.broadcast %552 : f32 to vector<15x2xf32>
      %558 = arith.mulf %557, %556 : vector<15x2xf32>
      %559 = arith.addf %551, %558 : vector<15x2xf32>
      %c66 = arith.constant 66 : index
      %560 = memref.load %arg6[%c66] : memref<144xf32, #tpu.memory_space<smem>>
      %c1_i32_300 = arith.constant 1 : i32
      %561 = arith.addi %arg9, %c1_i32_300 : i32
      %c3_301 = arith.constant 3 : index
      %562 = arith.index_cast %561 : i32 to index
      %c0_302 = arith.constant 0 : index
      %c0_303 = arith.constant 0 : index
      %563 = vector.load %arg8[%c3_301, %562, %c0_302, %c0_303] : memref<4x18x18x2xf32, #tpu.memory_space<vmem>>, vector<1x1x15x2xf32>
      %564 = vector.shape_cast %563 : vector<1x1x15x2xf32> to vector<15x2xf32>
      %565 = vector.broadcast %560 : f32 to vector<15x2xf32>
      %566 = arith.mulf %565, %564 : vector<15x2xf32>
      %567 = arith.addf %559, %566 : vector<15x2xf32>
      %c67 = arith.constant 67 : index
      %568 = memref.load %arg6[%c67] : memref<144xf32, #tpu.memory_space<smem>>
      %c1_i32_304 = arith.constant 1 : i32
      %569 = arith.addi %arg9, %c1_i32_304 : i32
      %c3_305 = arith.constant 3 : index
      %570 = arith.index_cast %569 : i32 to index
      %c1_306 = arith.constant 1 : index
      %c0_307 = arith.constant 0 : index
      %571 = vector.load %arg8[%c3_305, %570, %c1_306, %c0_307] : memref<4x18x18x2xf32, #tpu.memory_space<vmem>>, vector<1x1x15x2xf32>
      %572 = vector.shape_cast %571 : vector<1x1x15x2xf32> to vector<15x2xf32>
      %573 = vector.broadcast %568 : f32 to vector<15x2xf32>
      %574 = arith.mulf %573, %572 : vector<15x2xf32>
      %575 = arith.addf %567, %574 : vector<15x2xf32>
      %c68 = arith.constant 68 : index
      %576 = memref.load %arg6[%c68] : memref<144xf32, #tpu.memory_space<smem>>
      %c1_i32_308 = arith.constant 1 : i32
      %577 = arith.addi %arg9, %c1_i32_308 : i32
      %c3_309 = arith.constant 3 : index
      %578 = arith.index_cast %577 : i32 to index
      %c2_310 = arith.constant 2 : index
      %c0_311 = arith.constant 0 : index
      %579 = vector.load %arg8[%c3_309, %578, %c2_310, %c0_311] : memref<4x18x18x2xf32, #tpu.memory_space<vmem>>, vector<1x1x15x2xf32>
      %580 = vector.shape_cast %579 : vector<1x1x15x2xf32> to vector<15x2xf32>
      %581 = vector.broadcast %576 : f32 to vector<15x2xf32>
      %582 = arith.mulf %581, %580 : vector<15x2xf32>
      %583 = arith.addf %575, %582 : vector<15x2xf32>
      %c69 = arith.constant 69 : index
      %584 = memref.load %arg6[%c69] : memref<144xf32, #tpu.memory_space<smem>>
      %c2_i32_312 = arith.constant 2 : i32
      %585 = arith.addi %arg9, %c2_i32_312 : i32
      %c3_313 = arith.constant 3 : index
      %586 = arith.index_cast %585 : i32 to index
      %c0_314 = arith.constant 0 : index
      %c0_315 = arith.constant 0 : index
      %587 = vector.load %arg8[%c3_313, %586, %c0_314, %c0_315] : memref<4x18x18x2xf32, #tpu.memory_space<vmem>>, vector<1x1x15x2xf32>
      %588 = vector.shape_cast %587 : vector<1x1x15x2xf32> to vector<15x2xf32>
      %589 = vector.broadcast %584 : f32 to vector<15x2xf32>
      %590 = arith.mulf %589, %588 : vector<15x2xf32>
      %591 = arith.addf %583, %590 : vector<15x2xf32>
      %c70 = arith.constant 70 : index
      %592 = memref.load %arg6[%c70] : memref<144xf32, #tpu.memory_space<smem>>
      %c2_i32_316 = arith.constant 2 : i32
      %593 = arith.addi %arg9, %c2_i32_316 : i32
      %c3_317 = arith.constant 3 : index
      %594 = arith.index_cast %593 : i32 to index
      %c1_318 = arith.constant 1 : index
      %c0_319 = arith.constant 0 : index
      %595 = vector.load %arg8[%c3_317, %594, %c1_318, %c0_319] : memref<4x18x18x2xf32, #tpu.memory_space<vmem>>, vector<1x1x15x2xf32>
      %596 = vector.shape_cast %595 : vector<1x1x15x2xf32> to vector<15x2xf32>
      %597 = vector.broadcast %592 : f32 to vector<15x2xf32>
      %598 = arith.mulf %597, %596 : vector<15x2xf32>
      %599 = arith.addf %591, %598 : vector<15x2xf32>
      %c71 = arith.constant 71 : index
      %600 = memref.load %arg6[%c71] : memref<144xf32, #tpu.memory_space<smem>>
      %c2_i32_320 = arith.constant 2 : i32
      %601 = arith.addi %arg9, %c2_i32_320 : i32
      %c3_321 = arith.constant 3 : index
      %602 = arith.index_cast %601 : i32 to index
      %c2_322 = arith.constant 2 : index
      %c0_323 = arith.constant 0 : index
      %603 = vector.load %arg8[%c3_321, %602, %c2_322, %c0_323] : memref<4x18x18x2xf32, #tpu.memory_space<vmem>>, vector<1x1x15x2xf32>
      %604 = vector.shape_cast %603 : vector<1x1x15x2xf32> to vector<15x2xf32>
      %605 = vector.broadcast %600 : f32 to vector<15x2xf32>
      %606 = arith.mulf %605, %604 : vector<15x2xf32>
      %607 = arith.addf %599, %606 : vector<15x2xf32>
      %c1_324 = arith.constant 1 : index
      %608 = arith.index_cast %arg9 : i32 to index
      %c0_325 = arith.constant 0 : index
      %c0_326 = arith.constant 0 : index
      %609 = vector.load %arg5[%c1_324, %608, %c0_325, %c0_326] : memref<4x16x16x1xf32, #tpu.memory_space<vmem>>, vector<1x1x15x1xf32>
      %610 = vector.shape_cast %609 : vector<1x1x15x1xf32> to vector<15x1xf32>
      %611 = vector.broadcast %610 : vector<15x1xf32> to vector<15x2xf32>
      %612 = arith.mulf %607, %611 : vector<15x2xf32>
      %c1_327 = arith.constant 1 : index
      %613 = arith.index_cast %arg9 : i32 to index
      %c0_328 = arith.constant 0 : index
      %c0_329 = arith.constant 0 : index
      %614 = vector.load %arg4[%c1_327, %613, %c0_328, %c0_329] : memref<4x16x16x1xf32, #tpu.memory_space<vmem>>, vector<1x1x15x1xf32>
      %615 = vector.shape_cast %614 : vector<1x1x15x1xf32> to vector<15x1xf32>
      %616 = vector.broadcast %615 : vector<15x1xf32> to vector<15x2xf32>
      %617 = arith.addf %612, %616 : vector<15x2xf32>
      %618 = vector.extract_strided_slice %12 {offsets = [1, 0, 0], sizes = [1, 15, 2], strides = [1, 1, 1]} : vector<4x15x2xf32> to vector<1x15x2xf32>
      %619 = vector.shape_cast %618 : vector<1x15x2xf32> to vector<15x2xf32>
      %620 = arith.subf %617, %619 : vector<15x2xf32>
      %c1_330 = arith.constant 1 : index
      %621 = arith.index_cast %arg9 : i32 to index
      %c0_331 = arith.constant 0 : index
      %c0_332 = arith.constant 0 : index
      %622 = vector.load %arg7[%c1_330, %621, %c0_331, %c0_332] : memref<4x16x15x2xf32, #tpu.memory_space<vmem>>, vector<1x1x15x2xf32>
      %623 = vector.shape_cast %622 : vector<1x1x15x2xf32> to vector<15x2xf32>
      %624 = vector.shape_cast %620 : vector<15x2xf32> to vector<1x1x15x2xf32>
      tpu.vector_store %arg7[%c1_330, %621, %c0_331, %c0_332], %624 {strides = array<i32>} : memref<4x16x15x2xf32, #tpu.memory_space<vmem>>, vector<1x1x15x2xf32>,
      %cst_333 = arith.constant 0.000000e+00 : f32
      %625 = vector.broadcast %cst_333 : f32 to vector<15x2xf32>
      %c72 = arith.constant 72 : index
      %626 = memref.load %arg6[%c72] : memref<144xf32, #tpu.memory_space<smem>>
      %c0_i32_334 = arith.constant 0 : i32
      %627 = arith.addi %arg9, %c0_i32_334 : i32
      %c0_335 = arith.constant 0 : index
      %628 = arith.index_cast %627 : i32 to index
      %c0_336 = arith.constant 0 : index
      %c0_337 = arith.constant 0 : index
      %629 = vector.load %arg8[%c0_335, %628, %c0_336, %c0_337] : memref<4x18x18x2xf32, #tpu.memory_space<vmem>>, vector<1x1x15x2xf32>
      %630 = vector.shape_cast %629 : vector<1x1x15x2xf32> to vector<15x2xf32>
      %631 = vector.broadcast %626 : f32 to vector<15x2xf32>
      %632 = arith.mulf %631, %630 : vector<15x2xf32>
      %633 = arith.addf %625, %632 : vector<15x2xf32>
      %c73 = arith.constant 73 : index
      %634 = memref.load %arg6[%c73] : memref<144xf32, #tpu.memory_space<smem>>
      %c0_i32_338 = arith.constant 0 : i32
      %635 = arith.addi %arg9, %c0_i32_338 : i32
      %c0_339 = arith.constant 0 : index
      %636 = arith.index_cast %635 : i32 to index
      %c1_340 = arith.constant 1 : index
      %c0_341 = arith.constant 0 : index
      %637 = vector.load %arg8[%c0_339, %636, %c1_340, %c0_341] : memref<4x18x18x2xf32, #tpu.memory_space<vmem>>, vector<1x1x15x2xf32>
      %638 = vector.shape_cast %637 : vector<1x1x15x2xf32> to vector<15x2xf32>
      %639 = vector.broadcast %634 : f32 to vector<15x2xf32>
      %640 = arith.mulf %639, %638 : vector<15x2xf32>
      %641 = arith.addf %633, %640 : vector<15x2xf32>
      %c74 = arith.constant 74 : index
      %642 = memref.load %arg6[%c74] : memref<144xf32, #tpu.memory_space<smem>>
      %c0_i32_342 = arith.constant 0 : i32
      %643 = arith.addi %arg9, %c0_i32_342 : i32
      %c0_343 = arith.constant 0 : index
      %644 = arith.index_cast %643 : i32 to index
      %c2_344 = arith.constant 2 : index
      %c0_345 = arith.constant 0 : index
      %645 = vector.load %arg8[%c0_343, %644, %c2_344, %c0_345] : memref<4x18x18x2xf32, #tpu.memory_space<vmem>>, vector<1x1x15x2xf32>
      %646 = vector.shape_cast %645 : vector<1x1x15x2xf32> to vector<15x2xf32>
      %647 = vector.broadcast %642 : f32 to vector<15x2xf32>
      %648 = arith.mulf %647, %646 : vector<15x2xf32>
      %649 = arith.addf %641, %648 : vector<15x2xf32>
      %c75 = arith.constant 75 : index
      %650 = memref.load %arg6[%c75] : memref<144xf32, #tpu.memory_space<smem>>
      %c1_i32_346 = arith.constant 1 : i32
      %651 = arith.addi %arg9, %c1_i32_346 : i32
      %c0_347 = arith.constant 0 : index
      %652 = arith.index_cast %651 : i32 to index
      %c0_348 = arith.constant 0 : index
      %c0_349 = arith.constant 0 : index
      %653 = vector.load %arg8[%c0_347, %652, %c0_348, %c0_349] : memref<4x18x18x2xf32, #tpu.memory_space<vmem>>, vector<1x1x15x2xf32>
      %654 = vector.shape_cast %653 : vector<1x1x15x2xf32> to vector<15x2xf32>
      %655 = vector.broadcast %650 : f32 to vector<15x2xf32>
      %656 = arith.mulf %655, %654 : vector<15x2xf32>
      %657 = arith.addf %649, %656 : vector<15x2xf32>
      %c76 = arith.constant 76 : index
      %658 = memref.load %arg6[%c76] : memref<144xf32, #tpu.memory_space<smem>>
      %c1_i32_350 = arith.constant 1 : i32
      %659 = arith.addi %arg9, %c1_i32_350 : i32
      %c0_351 = arith.constant 0 : index
      %660 = arith.index_cast %659 : i32 to index
      %c1_352 = arith.constant 1 : index
      %c0_353 = arith.constant 0 : index
      %661 = vector.load %arg8[%c0_351, %660, %c1_352, %c0_353] : memref<4x18x18x2xf32, #tpu.memory_space<vmem>>, vector<1x1x15x2xf32>
      %662 = vector.shape_cast %661 : vector<1x1x15x2xf32> to vector<15x2xf32>
      %663 = vector.broadcast %658 : f32 to vector<15x2xf32>
      %664 = arith.mulf %663, %662 : vector<15x2xf32>
      %665 = arith.addf %657, %664 : vector<15x2xf32>
      %c77 = arith.constant 77 : index
      %666 = memref.load %arg6[%c77] : memref<144xf32, #tpu.memory_space<smem>>
      %c1_i32_354 = arith.constant 1 : i32
      %667 = arith.addi %arg9, %c1_i32_354 : i32
      %c0_355 = arith.constant 0 : index
      %668 = arith.index_cast %667 : i32 to index
      %c2_356 = arith.constant 2 : index
      %c0_357 = arith.constant 0 : index
      %669 = vector.load %arg8[%c0_355, %668, %c2_356, %c0_357] : memref<4x18x18x2xf32, #tpu.memory_space<vmem>>, vector<1x1x15x2xf32>
      %670 = vector.shape_cast %669 : vector<1x1x15x2xf32> to vector<15x2xf32>
      %671 = vector.broadcast %666 : f32 to vector<15x2xf32>
      %672 = arith.mulf %671, %670 : vector<15x2xf32>
      %673 = arith.addf %665, %672 : vector<15x2xf32>
      %c78 = arith.constant 78 : index
      %674 = memref.load %arg6[%c78] : memref<144xf32, #tpu.memory_space<smem>>
      %c2_i32_358 = arith.constant 2 : i32
      %675 = arith.addi %arg9, %c2_i32_358 : i32
      %c0_359 = arith.constant 0 : index
      %676 = arith.index_cast %675 : i32 to index
      %c0_360 = arith.constant 0 : index
      %c0_361 = arith.constant 0 : index
      %677 = vector.load %arg8[%c0_359, %676, %c0_360, %c0_361] : memref<4x18x18x2xf32, #tpu.memory_space<vmem>>, vector<1x1x15x2xf32>
      %678 = vector.shape_cast %677 : vector<1x1x15x2xf32> to vector<15x2xf32>
      %679 = vector.broadcast %674 : f32 to vector<15x2xf32>
      %680 = arith.mulf %679, %678 : vector<15x2xf32>
      %681 = arith.addf %673, %680 : vector<15x2xf32>
      %c79 = arith.constant 79 : index
      %682 = memref.load %arg6[%c79] : memref<144xf32, #tpu.memory_space<smem>>
      %c2_i32_362 = arith.constant 2 : i32
      %683 = arith.addi %arg9, %c2_i32_362 : i32
      %c0_363 = arith.constant 0 : index
      %684 = arith.index_cast %683 : i32 to index
      %c1_364 = arith.constant 1 : index
      %c0_365 = arith.constant 0 : index
      %685 = vector.load %arg8[%c0_363, %684, %c1_364, %c0_365] : memref<4x18x18x2xf32, #tpu.memory_space<vmem>>, vector<1x1x15x2xf32>
      %686 = vector.shape_cast %685 : vector<1x1x15x2xf32> to vector<15x2xf32>
      %687 = vector.broadcast %682 : f32 to vector<15x2xf32>
      %688 = arith.mulf %687, %686 : vector<15x2xf32>
      %689 = arith.addf %681, %688 : vector<15x2xf32>
      %c80 = arith.constant 80 : index
      %690 = memref.load %arg6[%c80] : memref<144xf32, #tpu.memory_space<smem>>
      %c2_i32_366 = arith.constant 2 : i32
      %691 = arith.addi %arg9, %c2_i32_366 : i32
      %c0_367 = arith.constant 0 : index
      %692 = arith.index_cast %691 : i32 to index
      %c2_368 = arith.constant 2 : index
      %c0_369 = arith.constant 0 : index
      %693 = vector.load %arg8[%c0_367, %692, %c2_368, %c0_369] : memref<4x18x18x2xf32, #tpu.memory_space<vmem>>, vector<1x1x15x2xf32>
      %694 = vector.shape_cast %693 : vector<1x1x15x2xf32> to vector<15x2xf32>
      %695 = vector.broadcast %690 : f32 to vector<15x2xf32>
      %696 = arith.mulf %695, %694 : vector<15x2xf32>
      %697 = arith.addf %689, %696 : vector<15x2xf32>
      %c81 = arith.constant 81 : index
      %698 = memref.load %arg6[%c81] : memref<144xf32, #tpu.memory_space<smem>>
      %c0_i32_370 = arith.constant 0 : i32
      %699 = arith.addi %arg9, %c0_i32_370 : i32
      %c1_371 = arith.constant 1 : index
      %700 = arith.index_cast %699 : i32 to index
      %c0_372 = arith.constant 0 : index
      %c0_373 = arith.constant 0 : index
      %701 = vector.load %arg8[%c1_371, %700, %c0_372, %c0_373] : memref<4x18x18x2xf32, #tpu.memory_space<vmem>>, vector<1x1x15x2xf32>
      %702 = vector.shape_cast %701 : vector<1x1x15x2xf32> to vector<15x2xf32>
      %703 = vector.broadcast %698 : f32 to vector<15x2xf32>
      %704 = arith.mulf %703, %702 : vector<15x2xf32>
      %705 = arith.addf %697, %704 : vector<15x2xf32>
      %c82 = arith.constant 82 : index
      %706 = memref.load %arg6[%c82] : memref<144xf32, #tpu.memory_space<smem>>
      %c0_i32_374 = arith.constant 0 : i32
      %707 = arith.addi %arg9, %c0_i32_374 : i32
      %c1_375 = arith.constant 1 : index
      %708 = arith.index_cast %707 : i32 to index
      %c1_376 = arith.constant 1 : index
      %c0_377 = arith.constant 0 : index
      %709 = vector.load %arg8[%c1_375, %708, %c1_376, %c0_377] : memref<4x18x18x2xf32, #tpu.memory_space<vmem>>, vector<1x1x15x2xf32>
      %710 = vector.shape_cast %709 : vector<1x1x15x2xf32> to vector<15x2xf32>
      %711 = vector.broadcast %706 : f32 to vector<15x2xf32>
      %712 = arith.mulf %711, %710 : vector<15x2xf32>
      %713 = arith.addf %705, %712 : vector<15x2xf32>
      %c83 = arith.constant 83 : index
      %714 = memref.load %arg6[%c83] : memref<144xf32, #tpu.memory_space<smem>>
      %c0_i32_378 = arith.constant 0 : i32
      %715 = arith.addi %arg9, %c0_i32_378 : i32
      %c1_379 = arith.constant 1 : index
      %716 = arith.index_cast %715 : i32 to index
      %c2_380 = arith.constant 2 : index
      %c0_381 = arith.constant 0 : index
      %717 = vector.load %arg8[%c1_379, %716, %c2_380, %c0_381] : memref<4x18x18x2xf32, #tpu.memory_space<vmem>>, vector<1x1x15x2xf32>
      %718 = vector.shape_cast %717 : vector<1x1x15x2xf32> to vector<15x2xf32>
      %719 = vector.broadcast %714 : f32 to vector<15x2xf32>
      %720 = arith.mulf %719, %718 : vector<15x2xf32>
      %721 = arith.addf %713, %720 : vector<15x2xf32>
      %c84 = arith.constant 84 : index
      %722 = memref.load %arg6[%c84] : memref<144xf32, #tpu.memory_space<smem>>
      %c1_i32_382 = arith.constant 1 : i32
      %723 = arith.addi %arg9, %c1_i32_382 : i32
      %c1_383 = arith.constant 1 : index
      %724 = arith.index_cast %723 : i32 to index
      %c0_384 = arith.constant 0 : index
      %c0_385 = arith.constant 0 : index
      %725 = vector.load %arg8[%c1_383, %724, %c0_384, %c0_385] : memref<4x18x18x2xf32, #tpu.memory_space<vmem>>, vector<1x1x15x2xf32>
      %726 = vector.shape_cast %725 : vector<1x1x15x2xf32> to vector<15x2xf32>
      %727 = vector.broadcast %722 : f32 to vector<15x2xf32>
      %728 = arith.mulf %727, %726 : vector<15x2xf32>
      %729 = arith.addf %721, %728 : vector<15x2xf32>
      %c85 = arith.constant 85 : index
      %730 = memref.load %arg6[%c85] : memref<144xf32, #tpu.memory_space<smem>>
      %c1_i32_386 = arith.constant 1 : i32
      %731 = arith.addi %arg9, %c1_i32_386 : i32
      %c1_387 = arith.constant 1 : index
      %732 = arith.index_cast %731 : i32 to index
      %c1_388 = arith.constant 1 : index
      %c0_389 = arith.constant 0 : index
      %733 = vector.load %arg8[%c1_387, %732, %c1_388, %c0_389] : memref<4x18x18x2xf32, #tpu.memory_space<vmem>>, vector<1x1x15x2xf32>
      %734 = vector.shape_cast %733 : vector<1x1x15x2xf32> to vector<15x2xf32>
      %735 = vector.broadcast %730 : f32 to vector<15x2xf32>
      %736 = arith.mulf %735, %734 : vector<15x2xf32>
      %737 = arith.addf %729, %736 : vector<15x2xf32>
      %c86 = arith.constant 86 : index
      %738 = memref.load %arg6[%c86] : memref<144xf32, #tpu.memory_space<smem>>
      %c1_i32_390 = arith.constant 1 : i32
      %739 = arith.addi %arg9, %c1_i32_390 : i32
      %c1_391 = arith.constant 1 : index
      %740 = arith.index_cast %739 : i32 to index
      %c2_392 = arith.constant 2 : index
      %c0_393 = arith.constant 0 : index
      %741 = vector.load %arg8[%c1_391, %740, %c2_392, %c0_393] : memref<4x18x18x2xf32, #tpu.memory_space<vmem>>, vector<1x1x15x2xf32>
      %742 = vector.shape_cast %741 : vector<1x1x15x2xf32> to vector<15x2xf32>
      %743 = vector.broadcast %738 : f32 to vector<15x2xf32>
      %744 = arith.mulf %743, %742 : vector<15x2xf32>
      %745 = arith.addf %737, %744 : vector<15x2xf32>
      %c87 = arith.constant 87 : index
      %746 = memref.load %arg6[%c87] : memref<144xf32, #tpu.memory_space<smem>>
      %c2_i32_394 = arith.constant 2 : i32
      %747 = arith.addi %arg9, %c2_i32_394 : i32
      %c1_395 = arith.constant 1 : index
      %748 = arith.index_cast %747 : i32 to index
      %c0_396 = arith.constant 0 : index
      %c0_397 = arith.constant 0 : index
      %749 = vector.load %arg8[%c1_395, %748, %c0_396, %c0_397] : memref<4x18x18x2xf32, #tpu.memory_space<vmem>>, vector<1x1x15x2xf32>
      %750 = vector.shape_cast %749 : vector<1x1x15x2xf32> to vector<15x2xf32>
      %751 = vector.broadcast %746 : f32 to vector<15x2xf32>
      %752 = arith.mulf %751, %750 : vector<15x2xf32>
      %753 = arith.addf %745, %752 : vector<15x2xf32>
      %c88 = arith.constant 88 : index
      %754 = memref.load %arg6[%c88] : memref<144xf32, #tpu.memory_space<smem>>
      %c2_i32_398 = arith.constant 2 : i32
      %755 = arith.addi %arg9, %c2_i32_398 : i32
      %c1_399 = arith.constant 1 : index
      %756 = arith.index_cast %755 : i32 to index
      %c1_400 = arith.constant 1 : index
      %c0_401 = arith.constant 0 : index
      %757 = vector.load %arg8[%c1_399, %756, %c1_400, %c0_401] : memref<4x18x18x2xf32, #tpu.memory_space<vmem>>, vector<1x1x15x2xf32>
      %758 = vector.shape_cast %757 : vector<1x1x15x2xf32> to vector<15x2xf32>
      %759 = vector.broadcast %754 : f32 to vector<15x2xf32>
      %760 = arith.mulf %759, %758 : vector<15x2xf32>
      %761 = arith.addf %753, %760 : vector<15x2xf32>
      %c89 = arith.constant 89 : index
      %762 = memref.load %arg6[%c89] : memref<144xf32, #tpu.memory_space<smem>>
      %c2_i32_402 = arith.constant 2 : i32
      %763 = arith.addi %arg9, %c2_i32_402 : i32
      %c1_403 = arith.constant 1 : index
      %764 = arith.index_cast %763 : i32 to index
      %c2_404 = arith.constant 2 : index
      %c0_405 = arith.constant 0 : index
      %765 = vector.load %arg8[%c1_403, %764, %c2_404, %c0_405] : memref<4x18x18x2xf32, #tpu.memory_space<vmem>>, vector<1x1x15x2xf32>
      %766 = vector.shape_cast %765 : vector<1x1x15x2xf32> to vector<15x2xf32>
      %767 = vector.broadcast %762 : f32 to vector<15x2xf32>
      %768 = arith.mulf %767, %766 : vector<15x2xf32>
      %769 = arith.addf %761, %768 : vector<15x2xf32>
      %c90 = arith.constant 90 : index
      %770 = memref.load %arg6[%c90] : memref<144xf32, #tpu.memory_space<smem>>
      %c0_i32_406 = arith.constant 0 : i32
      %771 = arith.addi %arg9, %c0_i32_406 : i32
      %c2_407 = arith.constant 2 : index
      %772 = arith.index_cast %771 : i32 to index
      %c0_408 = arith.constant 0 : index
      %c0_409 = arith.constant 0 : index
      %773 = vector.load %arg8[%c2_407, %772, %c0_408, %c0_409] : memref<4x18x18x2xf32, #tpu.memory_space<vmem>>, vector<1x1x15x2xf32>
      %774 = vector.shape_cast %773 : vector<1x1x15x2xf32> to vector<15x2xf32>
      %775 = vector.broadcast %770 : f32 to vector<15x2xf32>
      %776 = arith.mulf %775, %774 : vector<15x2xf32>
      %777 = arith.addf %769, %776 : vector<15x2xf32>
      %c91 = arith.constant 91 : index
      %778 = memref.load %arg6[%c91] : memref<144xf32, #tpu.memory_space<smem>>
      %c0_i32_410 = arith.constant 0 : i32
      %779 = arith.addi %arg9, %c0_i32_410 : i32
      %c2_411 = arith.constant 2 : index
      %780 = arith.index_cast %779 : i32 to index
      %c1_412 = arith.constant 1 : index
      %c0_413 = arith.constant 0 : index
      %781 = vector.load %arg8[%c2_411, %780, %c1_412, %c0_413] : memref<4x18x18x2xf32, #tpu.memory_space<vmem>>, vector<1x1x15x2xf32>
      %782 = vector.shape_cast %781 : vector<1x1x15x2xf32> to vector<15x2xf32>
      %783 = vector.broadcast %778 : f32 to vector<15x2xf32>
      %784 = arith.mulf %783, %782 : vector<15x2xf32>
      %785 = arith.addf %777, %784 : vector<15x2xf32>
      %c92 = arith.constant 92 : index
      %786 = memref.load %arg6[%c92] : memref<144xf32, #tpu.memory_space<smem>>
      %c0_i32_414 = arith.constant 0 : i32
      %787 = arith.addi %arg9, %c0_i32_414 : i32
      %c2_415 = arith.constant 2 : index
      %788 = arith.index_cast %787 : i32 to index
      %c2_416 = arith.constant 2 : index
      %c0_417 = arith.constant 0 : index
      %789 = vector.load %arg8[%c2_415, %788, %c2_416, %c0_417] : memref<4x18x18x2xf32, #tpu.memory_space<vmem>>, vector<1x1x15x2xf32>
      %790 = vector.shape_cast %789 : vector<1x1x15x2xf32> to vector<15x2xf32>
      %791 = vector.broadcast %786 : f32 to vector<15x2xf32>
      %792 = arith.mulf %791, %790 : vector<15x2xf32>
      %793 = arith.addf %785, %792 : vector<15x2xf32>
      %c93 = arith.constant 93 : index
      %794 = memref.load %arg6[%c93] : memref<144xf32, #tpu.memory_space<smem>>
      %c1_i32_418 = arith.constant 1 : i32
      %795 = arith.addi %arg9, %c1_i32_418 : i32
      %c2_419 = arith.constant 2 : index
      %796 = arith.index_cast %795 : i32 to index
      %c0_420 = arith.constant 0 : index
      %c0_421 = arith.constant 0 : index
      %797 = vector.load %arg8[%c2_419, %796, %c0_420, %c0_421] : memref<4x18x18x2xf32, #tpu.memory_space<vmem>>, vector<1x1x15x2xf32>
      %798 = vector.shape_cast %797 : vector<1x1x15x2xf32> to vector<15x2xf32>
      %799 = vector.broadcast %794 : f32 to vector<15x2xf32>
      %800 = arith.mulf %799, %798 : vector<15x2xf32>
      %801 = arith.addf %793, %800 : vector<15x2xf32>
      %c94 = arith.constant 94 : index
      %802 = memref.load %arg6[%c94] : memref<144xf32, #tpu.memory_space<smem>>
      %c1_i32_422 = arith.constant 1 : i32
      %803 = arith.addi %arg9, %c1_i32_422 : i32
      %c2_423 = arith.constant 2 : index
      %804 = arith.index_cast %803 : i32 to index
      %c1_424 = arith.constant 1 : index
      %c0_425 = arith.constant 0 : index
      %805 = vector.load %arg8[%c2_423, %804, %c1_424, %c0_425] : memref<4x18x18x2xf32, #tpu.memory_space<vmem>>, vector<1x1x15x2xf32>
      %806 = vector.shape_cast %805 : vector<1x1x15x2xf32> to vector<15x2xf32>
      %807 = vector.broadcast %802 : f32 to vector<15x2xf32>
      %808 = arith.mulf %807, %806 : vector<15x2xf32>
      %809 = arith.addf %801, %808 : vector<15x2xf32>
      %c95 = arith.constant 95 : index
      %810 = memref.load %arg6[%c95] : memref<144xf32, #tpu.memory_space<smem>>
      %c1_i32_426 = arith.constant 1 : i32
      %811 = arith.addi %arg9, %c1_i32_426 : i32
      %c2_427 = arith.constant 2 : index
      %812 = arith.index_cast %811 : i32 to index
      %c2_428 = arith.constant 2 : index
      %c0_429 = arith.constant 0 : index
      %813 = vector.load %arg8[%c2_427, %812, %c2_428, %c0_429] : memref<4x18x18x2xf32, #tpu.memory_space<vmem>>, vector<1x1x15x2xf32>
      %814 = vector.shape_cast %813 : vector<1x1x15x2xf32> to vector<15x2xf32>
      %815 = vector.broadcast %810 : f32 to vector<15x2xf32>
      %816 = arith.mulf %815, %814 : vector<15x2xf32>
      %817 = arith.addf %809, %816 : vector<15x2xf32>
      %c96 = arith.constant 96 : index
      %818 = memref.load %arg6[%c96] : memref<144xf32, #tpu.memory_space<smem>>
      %c2_i32_430 = arith.constant 2 : i32
      %819 = arith.addi %arg9, %c2_i32_430 : i32
      %c2_431 = arith.constant 2 : index
      %820 = arith.index_cast %819 : i32 to index
      %c0_432 = arith.constant 0 : index
      %c0_433 = arith.constant 0 : index
      %821 = vector.load %arg8[%c2_431, %820, %c0_432, %c0_433] : memref<4x18x18x2xf32, #tpu.memory_space<vmem>>, vector<1x1x15x2xf32>
      %822 = vector.shape_cast %821 : vector<1x1x15x2xf32> to vector<15x2xf32>
      %823 = vector.broadcast %818 : f32 to vector<15x2xf32>
      %824 = arith.mulf %823, %822 : vector<15x2xf32>
      %825 = arith.addf %817, %824 : vector<15x2xf32>
      %c97 = arith.constant 97 : index
      %826 = memref.load %arg6[%c97] : memref<144xf32, #tpu.memory_space<smem>>
      %c2_i32_434 = arith.constant 2 : i32
      %827 = arith.addi %arg9, %c2_i32_434 : i32
      %c2_435 = arith.constant 2 : index
      %828 = arith.index_cast %827 : i32 to index
      %c1_436 = arith.constant 1 : index
      %c0_437 = arith.constant 0 : index
      %829 = vector.load %arg8[%c2_435, %828, %c1_436, %c0_437] : memref<4x18x18x2xf32, #tpu.memory_space<vmem>>, vector<1x1x15x2xf32>
      %830 = vector.shape_cast %829 : vector<1x1x15x2xf32> to vector<15x2xf32>
      %831 = vector.broadcast %826 : f32 to vector<15x2xf32>
      %832 = arith.mulf %831, %830 : vector<15x2xf32>
      %833 = arith.addf %825, %832 : vector<15x2xf32>
      %c98 = arith.constant 98 : index
      %834 = memref.load %arg6[%c98] : memref<144xf32, #tpu.memory_space<smem>>
      %c2_i32_438 = arith.constant 2 : i32
      %835 = arith.addi %arg9, %c2_i32_438 : i32
      %c2_439 = arith.constant 2 : index
      %836 = arith.index_cast %835 : i32 to index
      %c2_440 = arith.constant 2 : index
      %c0_441 = arith.constant 0 : index
      %837 = vector.load %arg8[%c2_439, %836, %c2_440, %c0_441] : memref<4x18x18x2xf32, #tpu.memory_space<vmem>>, vector<1x1x15x2xf32>
      %838 = vector.shape_cast %837 : vector<1x1x15x2xf32> to vector<15x2xf32>
      %839 = vector.broadcast %834 : f32 to vector<15x2xf32>
      %840 = arith.mulf %839, %838 : vector<15x2xf32>
      %841 = arith.addf %833, %840 : vector<15x2xf32>
      %c99 = arith.constant 99 : index
      %842 = memref.load %arg6[%c99] : memref<144xf32, #tpu.memory_space<smem>>
      %c0_i32_442 = arith.constant 0 : i32
      %843 = arith.addi %arg9, %c0_i32_442 : i32
      %c3_443 = arith.constant 3 : index
      %844 = arith.index_cast %843 : i32 to index
      %c0_444 = arith.constant 0 : index
      %c0_445 = arith.constant 0 : index
      %845 = vector.load %arg8[%c3_443, %844, %c0_444, %c0_445] : memref<4x18x18x2xf32, #tpu.memory_space<vmem>>, vector<1x1x15x2xf32>
      %846 = vector.shape_cast %845 : vector<1x1x15x2xf32> to vector<15x2xf32>
      %847 = vector.broadcast %842 : f32 to vector<15x2xf32>
      %848 = arith.mulf %847, %846 : vector<15x2xf32>
      %849 = arith.addf %841, %848 : vector<15x2xf32>
      %c100 = arith.constant 100 : index
      %850 = memref.load %arg6[%c100] : memref<144xf32, #tpu.memory_space<smem>>
      %c0_i32_446 = arith.constant 0 : i32
      %851 = arith.addi %arg9, %c0_i32_446 : i32
      %c3_447 = arith.constant 3 : index
      %852 = arith.index_cast %851 : i32 to index
      %c1_448 = arith.constant 1 : index
      %c0_449 = arith.constant 0 : index
      %853 = vector.load %arg8[%c3_447, %852, %c1_448, %c0_449] : memref<4x18x18x2xf32, #tpu.memory_space<vmem>>, vector<1x1x15x2xf32>
      %854 = vector.shape_cast %853 : vector<1x1x15x2xf32> to vector<15x2xf32>
      %855 = vector.broadcast %850 : f32 to vector<15x2xf32>
      %856 = arith.mulf %855, %854 : vector<15x2xf32>
      %857 = arith.addf %849, %856 : vector<15x2xf32>
      %c101 = arith.constant 101 : index
      %858 = memref.load %arg6[%c101] : memref<144xf32, #tpu.memory_space<smem>>
      %c0_i32_450 = arith.constant 0 : i32
      %859 = arith.addi %arg9, %c0_i32_450 : i32
      %c3_451 = arith.constant 3 : index
      %860 = arith.index_cast %859 : i32 to index
      %c2_452 = arith.constant 2 : index
      %c0_453 = arith.constant 0 : index
      %861 = vector.load %arg8[%c3_451, %860, %c2_452, %c0_453] : memref<4x18x18x2xf32, #tpu.memory_space<vmem>>, vector<1x1x15x2xf32>
      %862 = vector.shape_cast %861 : vector<1x1x15x2xf32> to vector<15x2xf32>
      %863 = vector.broadcast %858 : f32 to vector<15x2xf32>
      %864 = arith.mulf %863, %862 : vector<15x2xf32>
      %865 = arith.addf %857, %864 : vector<15x2xf32>
      %c102 = arith.constant 102 : index
      %866 = memref.load %arg6[%c102] : memref<144xf32, #tpu.memory_space<smem>>
      %c1_i32_454 = arith.constant 1 : i32
      %867 = arith.addi %arg9, %c1_i32_454 : i32
      %c3_455 = arith.constant 3 : index
      %868 = arith.index_cast %867 : i32 to index
      %c0_456 = arith.constant 0 : index
      %c0_457 = arith.constant 0 : index
      %869 = vector.load %arg8[%c3_455, %868, %c0_456, %c0_457] : memref<4x18x18x2xf32, #tpu.memory_space<vmem>>, vector<1x1x15x2xf32>
      %870 = vector.shape_cast %869 : vector<1x1x15x2xf32> to vector<15x2xf32>
      %871 = vector.broadcast %866 : f32 to vector<15x2xf32>
      %872 = arith.mulf %871, %870 : vector<15x2xf32>
      %873 = arith.addf %865, %872 : vector<15x2xf32>
      %c103 = arith.constant 103 : index
      %874 = memref.load %arg6[%c103] : memref<144xf32, #tpu.memory_space<smem>>
      %c1_i32_458 = arith.constant 1 : i32
      %875 = arith.addi %arg9, %c1_i32_458 : i32
      %c3_459 = arith.constant 3 : index
      %876 = arith.index_cast %875 : i32 to index
      %c1_460 = arith.constant 1 : index
      %c0_461 = arith.constant 0 : index
      %877 = vector.load %arg8[%c3_459, %876, %c1_460, %c0_461] : memref<4x18x18x2xf32, #tpu.memory_space<vmem>>, vector<1x1x15x2xf32>
      %878 = vector.shape_cast %877 : vector<1x1x15x2xf32> to vector<15x2xf32>
      %879 = vector.broadcast %874 : f32 to vector<15x2xf32>
      %880 = arith.mulf %879, %878 : vector<15x2xf32>
      %881 = arith.addf %873, %880 : vector<15x2xf32>
      %c104 = arith.constant 104 : index
      %882 = memref.load %arg6[%c104] : memref<144xf32, #tpu.memory_space<smem>>
      %c1_i32_462 = arith.constant 1 : i32
      %883 = arith.addi %arg9, %c1_i32_462 : i32
      %c3_463 = arith.constant 3 : index
      %884 = arith.index_cast %883 : i32 to index
      %c2_464 = arith.constant 2 : index
      %c0_465 = arith.constant 0 : index
      %885 = vector.load %arg8[%c3_463, %884, %c2_464, %c0_465] : memref<4x18x18x2xf32, #tpu.memory_space<vmem>>, vector<1x1x15x2xf32>
      %886 = vector.shape_cast %885 : vector<1x1x15x2xf32> to vector<15x2xf32>
      %887 = vector.broadcast %882 : f32 to vector<15x2xf32>
      %888 = arith.mulf %887, %886 : vector<15x2xf32>
      %889 = arith.addf %881, %888 : vector<15x2xf32>
      %c105 = arith.constant 105 : index
      %890 = memref.load %arg6[%c105] : memref<144xf32, #tpu.memory_space<smem>>
      %c2_i32_466 = arith.constant 2 : i32
      %891 = arith.addi %arg9, %c2_i32_466 : i32
      %c3_467 = arith.constant 3 : index
      %892 = arith.index_cast %891 : i32 to index
      %c0_468 = arith.constant 0 : index
      %c0_469 = arith.constant 0 : index
      %893 = vector.load %arg8[%c3_467, %892, %c0_468, %c0_469] : memref<4x18x18x2xf32, #tpu.memory_space<vmem>>, vector<1x1x15x2xf32>
      %894 = vector.shape_cast %893 : vector<1x1x15x2xf32> to vector<15x2xf32>
      %895 = vector.broadcast %890 : f32 to vector<15x2xf32>
      %896 = arith.mulf %895, %894 : vector<15x2xf32>
      %897 = arith.addf %889, %896 : vector<15x2xf32>
      %c106 = arith.constant 106 : index
      %898 = memref.load %arg6[%c106] : memref<144xf32, #tpu.memory_space<smem>>
      %c2_i32_470 = arith.constant 2 : i32
      %899 = arith.addi %arg9, %c2_i32_470 : i32
      %c3_471 = arith.constant 3 : index
      %900 = arith.index_cast %899 : i32 to index
      %c1_472 = arith.constant 1 : index
      %c0_473 = arith.constant 0 : index
      %901 = vector.load %arg8[%c3_471, %900, %c1_472, %c0_473] : memref<4x18x18x2xf32, #tpu.memory_space<vmem>>, vector<1x1x15x2xf32>
      %902 = vector.shape_cast %901 : vector<1x1x15x2xf32> to vector<15x2xf32>
      %903 = vector.broadcast %898 : f32 to vector<15x2xf32>
      %904 = arith.mulf %903, %902 : vector<15x2xf32>
      %905 = arith.addf %897, %904 : vector<15x2xf32>
      %c107 = arith.constant 107 : index
      %906 = memref.load %arg6[%c107] : memref<144xf32, #tpu.memory_space<smem>>
      %c2_i32_474 = arith.constant 2 : i32
      %907 = arith.addi %arg9, %c2_i32_474 : i32
      %c3_475 = arith.constant 3 : index
      %908 = arith.index_cast %907 : i32 to index
      %c2_476 = arith.constant 2 : index
      %c0_477 = arith.constant 0 : index
      %909 = vector.load %arg8[%c3_475, %908, %c2_476, %c0_477] : memref<4x18x18x2xf32, #tpu.memory_space<vmem>>, vector<1x1x15x2xf32>
      %910 = vector.shape_cast %909 : vector<1x1x15x2xf32> to vector<15x2xf32>
      %911 = vector.broadcast %906 : f32 to vector<15x2xf32>
      %912 = arith.mulf %911, %910 : vector<15x2xf32>
      %913 = arith.addf %905, %912 : vector<15x2xf32>
      %c2_478 = arith.constant 2 : index
      %914 = arith.index_cast %arg9 : i32 to index
      %c0_479 = arith.constant 0 : index
      %c0_480 = arith.constant 0 : index
      %915 = vector.load %arg5[%c2_478, %914, %c0_479, %c0_480] : memref<4x16x16x1xf32, #tpu.memory_space<vmem>>, vector<1x1x15x1xf32>
      %916 = vector.shape_cast %915 : vector<1x1x15x1xf32> to vector<15x1xf32>
      %917 = vector.broadcast %916 : vector<15x1xf32> to vector<15x2xf32>
      %918 = arith.mulf %913, %917 : vector<15x2xf32>
      %c2_481 = arith.constant 2 : index
      %919 = arith.index_cast %arg9 : i32 to index
      %c0_482 = arith.constant 0 : index
      %c0_483 = arith.constant 0 : index
      %920 = vector.load %arg4[%c2_481, %919, %c0_482, %c0_483] : memref<4x16x16x1xf32, #tpu.memory_space<vmem>>, vector<1x1x15x1xf32>
      %921 = vector.shape_cast %920 : vector<1x1x15x1xf32> to vector<15x1xf32>
      %922 = vector.broadcast %921 : vector<15x1xf32> to vector<15x2xf32>
      %923 = arith.addf %918, %922 : vector<15x2xf32>
      %924 = vector.extract_strided_slice %12 {offsets = [2, 0, 0], sizes = [1, 15, 2], strides = [1, 1, 1]} : vector<4x15x2xf32> to vector<1x15x2xf32>
      %925 = vector.shape_cast %924 : vector<1x15x2xf32> to vector<15x2xf32>
      %926 = arith.subf %923, %925 : vector<15x2xf32>
      %c2_484 = arith.constant 2 : index
      %927 = arith.index_cast %arg9 : i32 to index
      %c0_485 = arith.constant 0 : index
      %c0_486 = arith.constant 0 : index
      %928 = vector.load %arg7[%c2_484, %927, %c0_485, %c0_486] : memref<4x16x15x2xf32, #tpu.memory_space<vmem>>, vector<1x1x15x2xf32>
      %929 = vector.shape_cast %928 : vector<1x1x15x2xf32> to vector<15x2xf32>
      %930 = vector.shape_cast %926 : vector<15x2xf32> to vector<1x1x15x2xf32>
      tpu.vector_store %arg7[%c2_484, %927, %c0_485, %c0_486], %930 {strides = array<i32>} : memref<4x16x15x2xf32, #tpu.memory_space<vmem>>, vector<1x1x15x2xf32>,
      %cst_487 = arith.constant 0.000000e+00 : f32
      %931 = vector.broadcast %cst_487 : f32 to vector<15x2xf32>
      %c108 = arith.constant 108 : index
      %932 = memref.load %arg6[%c108] : memref<144xf32, #tpu.memory_space<smem>>
      %c0_i32_488 = arith.constant 0 : i32
      %933 = arith.addi %arg9, %c0_i32_488 : i32
      %c0_489 = arith.constant 0 : index
      %934 = arith.index_cast %933 : i32 to index
      %c0_490 = arith.constant 0 : index
      %c0_491 = arith.constant 0 : index
      %935 = vector.load %arg8[%c0_489, %934, %c0_490, %c0_491] : memref<4x18x18x2xf32, #tpu.memory_space<vmem>>, vector<1x1x15x2xf32>
      %936 = vector.shape_cast %935 : vector<1x1x15x2xf32> to vector<15x2xf32>
      %937 = vector.broadcast %932 : f32 to vector<15x2xf32>
      %938 = arith.mulf %937, %936 : vector<15x2xf32>
      %939 = arith.addf %931, %938 : vector<15x2xf32>
      %c109 = arith.constant 109 : index
      %940 = memref.load %arg6[%c109] : memref<144xf32, #tpu.memory_space<smem>>
      %c0_i32_492 = arith.constant 0 : i32
      %941 = arith.addi %arg9, %c0_i32_492 : i32
      %c0_493 = arith.constant 0 : index
      %942 = arith.index_cast %941 : i32 to index
      %c1_494 = arith.constant 1 : index
      %c0_495 = arith.constant 0 : index
      %943 = vector.load %arg8[%c0_493, %942, %c1_494, %c0_495] : memref<4x18x18x2xf32, #tpu.memory_space<vmem>>, vector<1x1x15x2xf32>
      %944 = vector.shape_cast %943 : vector<1x1x15x2xf32> to vector<15x2xf32>
      %945 = vector.broadcast %940 : f32 to vector<15x2xf32>
      %946 = arith.mulf %945, %944 : vector<15x2xf32>
      %947 = arith.addf %939, %946 : vector<15x2xf32>
      %c110 = arith.constant 110 : index
      %948 = memref.load %arg6[%c110] : memref<144xf32, #tpu.memory_space<smem>>
      %c0_i32_496 = arith.constant 0 : i32
      %949 = arith.addi %arg9, %c0_i32_496 : i32
      %c0_497 = arith.constant 0 : index
      %950 = arith.index_cast %949 : i32 to index
      %c2_498 = arith.constant 2 : index
      %c0_499 = arith.constant 0 : index
      %951 = vector.load %arg8[%c0_497, %950, %c2_498, %c0_499] : memref<4x18x18x2xf32, #tpu.memory_space<vmem>>, vector<1x1x15x2xf32>
      %952 = vector.shape_cast %951 : vector<1x1x15x2xf32> to vector<15x2xf32>
      %953 = vector.broadcast %948 : f32 to vector<15x2xf32>
      %954 = arith.mulf %953, %952 : vector<15x2xf32>
      %955 = arith.addf %947, %954 : vector<15x2xf32>
      %c111 = arith.constant 111 : index
      %956 = memref.load %arg6[%c111] : memref<144xf32, #tpu.memory_space<smem>>
      %c1_i32_500 = arith.constant 1 : i32
      %957 = arith.addi %arg9, %c1_i32_500 : i32
      %c0_501 = arith.constant 0 : index
      %958 = arith.index_cast %957 : i32 to index
      %c0_502 = arith.constant 0 : index
      %c0_503 = arith.constant 0 : index
      %959 = vector.load %arg8[%c0_501, %958, %c0_502, %c0_503] : memref<4x18x18x2xf32, #tpu.memory_space<vmem>>, vector<1x1x15x2xf32>
      %960 = vector.shape_cast %959 : vector<1x1x15x2xf32> to vector<15x2xf32>
      %961 = vector.broadcast %956 : f32 to vector<15x2xf32>
      %962 = arith.mulf %961, %960 : vector<15x2xf32>
      %963 = arith.addf %955, %962 : vector<15x2xf32>
      %c112 = arith.constant 112 : index
      %964 = memref.load %arg6[%c112] : memref<144xf32, #tpu.memory_space<smem>>
      %c1_i32_504 = arith.constant 1 : i32
      %965 = arith.addi %arg9, %c1_i32_504 : i32
      %c0_505 = arith.constant 0 : index
      %966 = arith.index_cast %965 : i32 to index
      %c1_506 = arith.constant 1 : index
      %c0_507 = arith.constant 0 : index
      %967 = vector.load %arg8[%c0_505, %966, %c1_506, %c0_507] : memref<4x18x18x2xf32, #tpu.memory_space<vmem>>, vector<1x1x15x2xf32>
      %968 = vector.shape_cast %967 : vector<1x1x15x2xf32> to vector<15x2xf32>
      %969 = vector.broadcast %964 : f32 to vector<15x2xf32>
      %970 = arith.mulf %969, %968 : vector<15x2xf32>
      %971 = arith.addf %963, %970 : vector<15x2xf32>
      %c113 = arith.constant 113 : index
      %972 = memref.load %arg6[%c113] : memref<144xf32, #tpu.memory_space<smem>>
      %c1_i32_508 = arith.constant 1 : i32
      %973 = arith.addi %arg9, %c1_i32_508 : i32
      %c0_509 = arith.constant 0 : index
      %974 = arith.index_cast %973 : i32 to index
      %c2_510 = arith.constant 2 : index
      %c0_511 = arith.constant 0 : index
      %975 = vector.load %arg8[%c0_509, %974, %c2_510, %c0_511] : memref<4x18x18x2xf32, #tpu.memory_space<vmem>>, vector<1x1x15x2xf32>
      %976 = vector.shape_cast %975 : vector<1x1x15x2xf32> to vector<15x2xf32>
      %977 = vector.broadcast %972 : f32 to vector<15x2xf32>
      %978 = arith.mulf %977, %976 : vector<15x2xf32>
      %979 = arith.addf %971, %978 : vector<15x2xf32>
      %c114 = arith.constant 114 : index
      %980 = memref.load %arg6[%c114] : memref<144xf32, #tpu.memory_space<smem>>
      %c2_i32_512 = arith.constant 2 : i32
      %981 = arith.addi %arg9, %c2_i32_512 : i32
      %c0_513 = arith.constant 0 : index
      %982 = arith.index_cast %981 : i32 to index
      %c0_514 = arith.constant 0 : index
      %c0_515 = arith.constant 0 : index
      %983 = vector.load %arg8[%c0_513, %982, %c0_514, %c0_515] : memref<4x18x18x2xf32, #tpu.memory_space<vmem>>, vector<1x1x15x2xf32>
      %984 = vector.shape_cast %983 : vector<1x1x15x2xf32> to vector<15x2xf32>
      %985 = vector.broadcast %980 : f32 to vector<15x2xf32>
      %986 = arith.mulf %985, %984 : vector<15x2xf32>
      %987 = arith.addf %979, %986 : vector<15x2xf32>
      %c115 = arith.constant 115 : index
      %988 = memref.load %arg6[%c115] : memref<144xf32, #tpu.memory_space<smem>>
      %c2_i32_516 = arith.constant 2 : i32
      %989 = arith.addi %arg9, %c2_i32_516 : i32
      %c0_517 = arith.constant 0 : index
      %990 = arith.index_cast %989 : i32 to index
      %c1_518 = arith.constant 1 : index
      %c0_519 = arith.constant 0 : index
      %991 = vector.load %arg8[%c0_517, %990, %c1_518, %c0_519] : memref<4x18x18x2xf32, #tpu.memory_space<vmem>>, vector<1x1x15x2xf32>
      %992 = vector.shape_cast %991 : vector<1x1x15x2xf32> to vector<15x2xf32>
      %993 = vector.broadcast %988 : f32 to vector<15x2xf32>
      %994 = arith.mulf %993, %992 : vector<15x2xf32>
      %995 = arith.addf %987, %994 : vector<15x2xf32>
      %c116 = arith.constant 116 : index
      %996 = memref.load %arg6[%c116] : memref<144xf32, #tpu.memory_space<smem>>
      %c2_i32_520 = arith.constant 2 : i32
      %997 = arith.addi %arg9, %c2_i32_520 : i32
      %c0_521 = arith.constant 0 : index
      %998 = arith.index_cast %997 : i32 to index
      %c2_522 = arith.constant 2 : index
      %c0_523 = arith.constant 0 : index
      %999 = vector.load %arg8[%c0_521, %998, %c2_522, %c0_523] : memref<4x18x18x2xf32, #tpu.memory_space<vmem>>, vector<1x1x15x2xf32>
      %1000 = vector.shape_cast %999 : vector<1x1x15x2xf32> to vector<15x2xf32>
      %1001 = vector.broadcast %996 : f32 to vector<15x2xf32>
      %1002 = arith.mulf %1001, %1000 : vector<15x2xf32>
      %1003 = arith.addf %995, %1002 : vector<15x2xf32>
      %c117 = arith.constant 117 : index
      %1004 = memref.load %arg6[%c117] : memref<144xf32, #tpu.memory_space<smem>>
      %c0_i32_524 = arith.constant 0 : i32
      %1005 = arith.addi %arg9, %c0_i32_524 : i32
      %c1_525 = arith.constant 1 : index
      %1006 = arith.index_cast %1005 : i32 to index
      %c0_526 = arith.constant 0 : index
      %c0_527 = arith.constant 0 : index
      %1007 = vector.load %arg8[%c1_525, %1006, %c0_526, %c0_527] : memref<4x18x18x2xf32, #tpu.memory_space<vmem>>, vector<1x1x15x2xf32>
      %1008 = vector.shape_cast %1007 : vector<1x1x15x2xf32> to vector<15x2xf32>
      %1009 = vector.broadcast %1004 : f32 to vector<15x2xf32>
      %1010 = arith.mulf %1009, %1008 : vector<15x2xf32>
      %1011 = arith.addf %1003, %1010 : vector<15x2xf32>
      %c118 = arith.constant 118 : index
      %1012 = memref.load %arg6[%c118] : memref<144xf32, #tpu.memory_space<smem>>
      %c0_i32_528 = arith.constant 0 : i32
      %1013 = arith.addi %arg9, %c0_i32_528 : i32
      %c1_529 = arith.constant 1 : index
      %1014 = arith.index_cast %1013 : i32 to index
      %c1_530 = arith.constant 1 : index
      %c0_531 = arith.constant 0 : index
      %1015 = vector.load %arg8[%c1_529, %1014, %c1_530, %c0_531] : memref<4x18x18x2xf32, #tpu.memory_space<vmem>>, vector<1x1x15x2xf32>
      %1016 = vector.shape_cast %1015 : vector<1x1x15x2xf32> to vector<15x2xf32>
      %1017 = vector.broadcast %1012 : f32 to vector<15x2xf32>
      %1018 = arith.mulf %1017, %1016 : vector<15x2xf32>
      %1019 = arith.addf %1011, %1018 : vector<15x2xf32>
      %c119 = arith.constant 119 : index
      %1020 = memref.load %arg6[%c119] : memref<144xf32, #tpu.memory_space<smem>>
      %c0_i32_532 = arith.constant 0 : i32
      %1021 = arith.addi %arg9, %c0_i32_532 : i32
      %c1_533 = arith.constant 1 : index
      %1022 = arith.index_cast %1021 : i32 to index
      %c2_534 = arith.constant 2 : index
      %c0_535 = arith.constant 0 : index
      %1023 = vector.load %arg8[%c1_533, %1022, %c2_534, %c0_535] : memref<4x18x18x2xf32, #tpu.memory_space<vmem>>, vector<1x1x15x2xf32>
      %1024 = vector.shape_cast %1023 : vector<1x1x15x2xf32> to vector<15x2xf32>
      %1025 = vector.broadcast %1020 : f32 to vector<15x2xf32>
      %1026 = arith.mulf %1025, %1024 : vector<15x2xf32>
      %1027 = arith.addf %1019, %1026 : vector<15x2xf32>
      %c120 = arith.constant 120 : index
      %1028 = memref.load %arg6[%c120] : memref<144xf32, #tpu.memory_space<smem>>
      %c1_i32_536 = arith.constant 1 : i32
      %1029 = arith.addi %arg9, %c1_i32_536 : i32
      %c1_537 = arith.constant 1 : index
      %1030 = arith.index_cast %1029 : i32 to index
      %c0_538 = arith.constant 0 : index
      %c0_539 = arith.constant 0 : index
      %1031 = vector.load %arg8[%c1_537, %1030, %c0_538, %c0_539] : memref<4x18x18x2xf32, #tpu.memory_space<vmem>>, vector<1x1x15x2xf32>
      %1032 = vector.shape_cast %1031 : vector<1x1x15x2xf32> to vector<15x2xf32>
      %1033 = vector.broadcast %1028 : f32 to vector<15x2xf32>
      %1034 = arith.mulf %1033, %1032 : vector<15x2xf32>
      %1035 = arith.addf %1027, %1034 : vector<15x2xf32>
      %c121 = arith.constant 121 : index
      %1036 = memref.load %arg6[%c121] : memref<144xf32, #tpu.memory_space<smem>>
      %c1_i32_540 = arith.constant 1 : i32
      %1037 = arith.addi %arg9, %c1_i32_540 : i32
      %c1_541 = arith.constant 1 : index
      %1038 = arith.index_cast %1037 : i32 to index
      %c1_542 = arith.constant 1 : index
      %c0_543 = arith.constant 0 : index
      %1039 = vector.load %arg8[%c1_541, %1038, %c1_542, %c0_543] : memref<4x18x18x2xf32, #tpu.memory_space<vmem>>, vector<1x1x15x2xf32>
      %1040 = vector.shape_cast %1039 : vector<1x1x15x2xf32> to vector<15x2xf32>
      %1041 = vector.broadcast %1036 : f32 to vector<15x2xf32>
      %1042 = arith.mulf %1041, %1040 : vector<15x2xf32>
      %1043 = arith.addf %1035, %1042 : vector<15x2xf32>
      %c122 = arith.constant 122 : index
      %1044 = memref.load %arg6[%c122] : memref<144xf32, #tpu.memory_space<smem>>
      %c1_i32_544 = arith.constant 1 : i32
      %1045 = arith.addi %arg9, %c1_i32_544 : i32
      %c1_545 = arith.constant 1 : index
      %1046 = arith.index_cast %1045 : i32 to index
      %c2_546 = arith.constant 2 : index
      %c0_547 = arith.constant 0 : index
      %1047 = vector.load %arg8[%c1_545, %1046, %c2_546, %c0_547] : memref<4x18x18x2xf32, #tpu.memory_space<vmem>>, vector<1x1x15x2xf32>
      %1048 = vector.shape_cast %1047 : vector<1x1x15x2xf32> to vector<15x2xf32>
      %1049 = vector.broadcast %1044 : f32 to vector<15x2xf32>
      %1050 = arith.mulf %1049, %1048 : vector<15x2xf32>
      %1051 = arith.addf %1043, %1050 : vector<15x2xf32>
      %c123 = arith.constant 123 : index
      %1052 = memref.load %arg6[%c123] : memref<144xf32, #tpu.memory_space<smem>>
      %c2_i32_548 = arith.constant 2 : i32
      %1053 = arith.addi %arg9, %c2_i32_548 : i32
      %c1_549 = arith.constant 1 : index
      %1054 = arith.index_cast %1053 : i32 to index
      %c0_550 = arith.constant 0 : index
      %c0_551 = arith.constant 0 : index
      %1055 = vector.load %arg8[%c1_549, %1054, %c0_550, %c0_551] : memref<4x18x18x2xf32, #tpu.memory_space<vmem>>, vector<1x1x15x2xf32>
      %1056 = vector.shape_cast %1055 : vector<1x1x15x2xf32> to vector<15x2xf32>
      %1057 = vector.broadcast %1052 : f32 to vector<15x2xf32>
      %1058 = arith.mulf %1057, %1056 : vector<15x2xf32>
      %1059 = arith.addf %1051, %1058 : vector<15x2xf32>
      %c124 = arith.constant 124 : index
      %1060 = memref.load %arg6[%c124] : memref<144xf32, #tpu.memory_space<smem>>
      %c2_i32_552 = arith.constant 2 : i32
      %1061 = arith.addi %arg9, %c2_i32_552 : i32
      %c1_553 = arith.constant 1 : index
      %1062 = arith.index_cast %1061 : i32 to index
      %c1_554 = arith.constant 1 : index
      %c0_555 = arith.constant 0 : index
      %1063 = vector.load %arg8[%c1_553, %1062, %c1_554, %c0_555] : memref<4x18x18x2xf32, #tpu.memory_space<vmem>>, vector<1x1x15x2xf32>
      %1064 = vector.shape_cast %1063 : vector<1x1x15x2xf32> to vector<15x2xf32>
      %1065 = vector.broadcast %1060 : f32 to vector<15x2xf32>
      %1066 = arith.mulf %1065, %1064 : vector<15x2xf32>
      %1067 = arith.addf %1059, %1066 : vector<15x2xf32>
      %c125 = arith.constant 125 : index
      %1068 = memref.load %arg6[%c125] : memref<144xf32, #tpu.memory_space<smem>>
      %c2_i32_556 = arith.constant 2 : i32
      %1069 = arith.addi %arg9, %c2_i32_556 : i32
      %c1_557 = arith.constant 1 : index
      %1070 = arith.index_cast %1069 : i32 to index
      %c2_558 = arith.constant 2 : index
      %c0_559 = arith.constant 0 : index
      %1071 = vector.load %arg8[%c1_557, %1070, %c2_558, %c0_559] : memref<4x18x18x2xf32, #tpu.memory_space<vmem>>, vector<1x1x15x2xf32>
      %1072 = vector.shape_cast %1071 : vector<1x1x15x2xf32> to vector<15x2xf32>
      %1073 = vector.broadcast %1068 : f32 to vector<15x2xf32>
      %1074 = arith.mulf %1073, %1072 : vector<15x2xf32>
      %1075 = arith.addf %1067, %1074 : vector<15x2xf32>
      %c126 = arith.constant 126 : index
      %1076 = memref.load %arg6[%c126] : memref<144xf32, #tpu.memory_space<smem>>
      %c0_i32_560 = arith.constant 0 : i32
      %1077 = arith.addi %arg9, %c0_i32_560 : i32
      %c2_561 = arith.constant 2 : index
      %1078 = arith.index_cast %1077 : i32 to index
      %c0_562 = arith.constant 0 : index
      %c0_563 = arith.constant 0 : index
      %1079 = vector.load %arg8[%c2_561, %1078, %c0_562, %c0_563] : memref<4x18x18x2xf32, #tpu.memory_space<vmem>>, vector<1x1x15x2xf32>
      %1080 = vector.shape_cast %1079 : vector<1x1x15x2xf32> to vector<15x2xf32>
      %1081 = vector.broadcast %1076 : f32 to vector<15x2xf32>
      %1082 = arith.mulf %1081, %1080 : vector<15x2xf32>
      %1083 = arith.addf %1075, %1082 : vector<15x2xf32>
      %c127 = arith.constant 127 : index
      %1084 = memref.load %arg6[%c127] : memref<144xf32, #tpu.memory_space<smem>>
      %c0_i32_564 = arith.constant 0 : i32
      %1085 = arith.addi %arg9, %c0_i32_564 : i32
      %c2_565 = arith.constant 2 : index
      %1086 = arith.index_cast %1085 : i32 to index
      %c1_566 = arith.constant 1 : index
      %c0_567 = arith.constant 0 : index
      %1087 = vector.load %arg8[%c2_565, %1086, %c1_566, %c0_567] : memref<4x18x18x2xf32, #tpu.memory_space<vmem>>, vector<1x1x15x2xf32>
      %1088 = vector.shape_cast %1087 : vector<1x1x15x2xf32> to vector<15x2xf32>
      %1089 = vector.broadcast %1084 : f32 to vector<15x2xf32>
      %1090 = arith.mulf %1089, %1088 : vector<15x2xf32>
      %1091 = arith.addf %1083, %1090 : vector<15x2xf32>
      %c128 = arith.constant 128 : index
      %1092 = memref.load %arg6[%c128] : memref<144xf32, #tpu.memory_space<smem>>
      %c0_i32_568 = arith.constant 0 : i32
      %1093 = arith.addi %arg9, %c0_i32_568 : i32
      %c2_569 = arith.constant 2 : index
      %1094 = arith.index_cast %1093 : i32 to index
      %c2_570 = arith.constant 2 : index
      %c0_571 = arith.constant 0 : index
      %1095 = vector.load %arg8[%c2_569, %1094, %c2_570, %c0_571] : memref<4x18x18x2xf32, #tpu.memory_space<vmem>>, vector<1x1x15x2xf32>
      %1096 = vector.shape_cast %1095 : vector<1x1x15x2xf32> to vector<15x2xf32>
      %1097 = vector.broadcast %1092 : f32 to vector<15x2xf32>
      %1098 = arith.mulf %1097, %1096 : vector<15x2xf32>
      %1099 = arith.addf %1091, %1098 : vector<15x2xf32>
      %c129 = arith.constant 129 : index
      %1100 = memref.load %arg6[%c129] : memref<144xf32, #tpu.memory_space<smem>>
      %c1_i32_572 = arith.constant 1 : i32
      %1101 = arith.addi %arg9, %c1_i32_572 : i32
      %c2_573 = arith.constant 2 : index
      %1102 = arith.index_cast %1101 : i32 to index
      %c0_574 = arith.constant 0 : index
      %c0_575 = arith.constant 0 : index
      %1103 = vector.load %arg8[%c2_573, %1102, %c0_574, %c0_575] : memref<4x18x18x2xf32, #tpu.memory_space<vmem>>, vector<1x1x15x2xf32>
      %1104 = vector.shape_cast %1103 : vector<1x1x15x2xf32> to vector<15x2xf32>
      %1105 = vector.broadcast %1100 : f32 to vector<15x2xf32>
      %1106 = arith.mulf %1105, %1104 : vector<15x2xf32>
      %1107 = arith.addf %1099, %1106 : vector<15x2xf32>
      %c130 = arith.constant 130 : index
      %1108 = memref.load %arg6[%c130] : memref<144xf32, #tpu.memory_space<smem>>
      %c1_i32_576 = arith.constant 1 : i32
      %1109 = arith.addi %arg9, %c1_i32_576 : i32
      %c2_577 = arith.constant 2 : index
      %1110 = arith.index_cast %1109 : i32 to index
      %c1_578 = arith.constant 1 : index
      %c0_579 = arith.constant 0 : index
      %1111 = vector.load %arg8[%c2_577, %1110, %c1_578, %c0_579] : memref<4x18x18x2xf32, #tpu.memory_space<vmem>>, vector<1x1x15x2xf32>
      %1112 = vector.shape_cast %1111 : vector<1x1x15x2xf32> to vector<15x2xf32>
      %1113 = vector.broadcast %1108 : f32 to vector<15x2xf32>
      %1114 = arith.mulf %1113, %1112 : vector<15x2xf32>
      %1115 = arith.addf %1107, %1114 : vector<15x2xf32>
      %c131 = arith.constant 131 : index
      %1116 = memref.load %arg6[%c131] : memref<144xf32, #tpu.memory_space<smem>>
      %c1_i32_580 = arith.constant 1 : i32
      %1117 = arith.addi %arg9, %c1_i32_580 : i32
      %c2_581 = arith.constant 2 : index
      %1118 = arith.index_cast %1117 : i32 to index
      %c2_582 = arith.constant 2 : index
      %c0_583 = arith.constant 0 : index
      %1119 = vector.load %arg8[%c2_581, %1118, %c2_582, %c0_583] : memref<4x18x18x2xf32, #tpu.memory_space<vmem>>, vector<1x1x15x2xf32>
      %1120 = vector.shape_cast %1119 : vector<1x1x15x2xf32> to vector<15x2xf32>
      %1121 = vector.broadcast %1116 : f32 to vector<15x2xf32>
      %1122 = arith.mulf %1121, %1120 : vector<15x2xf32>
      %1123 = arith.addf %1115, %1122 : vector<15x2xf32>
      %c132 = arith.constant 132 : index
      %1124 = memref.load %arg6[%c132] : memref<144xf32, #tpu.memory_space<smem>>
      %c2_i32_584 = arith.constant 2 : i32
      %1125 = arith.addi %arg9, %c2_i32_584 : i32
      %c2_585 = arith.constant 2 : index
      %1126 = arith.index_cast %1125 : i32 to index
      %c0_586 = arith.constant 0 : index
      %c0_587 = arith.constant 0 : index
      %1127 = vector.load %arg8[%c2_585, %1126, %c0_586, %c0_587] : memref<4x18x18x2xf32, #tpu.memory_space<vmem>>, vector<1x1x15x2xf32>
      %1128 = vector.shape_cast %1127 : vector<1x1x15x2xf32> to vector<15x2xf32>
      %1129 = vector.broadcast %1124 : f32 to vector<15x2xf32>
      %1130 = arith.mulf %1129, %1128 : vector<15x2xf32>
      %1131 = arith.addf %1123, %1130 : vector<15x2xf32>
      %c133 = arith.constant 133 : index
      %1132 = memref.load %arg6[%c133] : memref<144xf32, #tpu.memory_space<smem>>
      %c2_i32_588 = arith.constant 2 : i32
      %1133 = arith.addi %arg9, %c2_i32_588 : i32
      %c2_589 = arith.constant 2 : index
      %1134 = arith.index_cast %1133 : i32 to index
      %c1_590 = arith.constant 1 : index
      %c0_591 = arith.constant 0 : index
      %1135 = vector.load %arg8[%c2_589, %1134, %c1_590, %c0_591] : memref<4x18x18x2xf32, #tpu.memory_space<vmem>>, vector<1x1x15x2xf32>
      %1136 = vector.shape_cast %1135 : vector<1x1x15x2xf32> to vector<15x2xf32>
      %1137 = vector.broadcast %1132 : f32 to vector<15x2xf32>
      %1138 = arith.mulf %1137, %1136 : vector<15x2xf32>
      %1139 = arith.addf %1131, %1138 : vector<15x2xf32>
      %c134 = arith.constant 134 : index
      %1140 = memref.load %arg6[%c134] : memref<144xf32, #tpu.memory_space<smem>>
      %c2_i32_592 = arith.constant 2 : i32
      %1141 = arith.addi %arg9, %c2_i32_592 : i32
      %c2_593 = arith.constant 2 : index
      %1142 = arith.index_cast %1141 : i32 to index
      %c2_594 = arith.constant 2 : index
      %c0_595 = arith.constant 0 : index
      %1143 = vector.load %arg8[%c2_593, %1142, %c2_594, %c0_595] : memref<4x18x18x2xf32, #tpu.memory_space<vmem>>, vector<1x1x15x2xf32>
      %1144 = vector.shape_cast %1143 : vector<1x1x15x2xf32> to vector<15x2xf32>
      %1145 = vector.broadcast %1140 : f32 to vector<15x2xf32>
      %1146 = arith.mulf %1145, %1144 : vector<15x2xf32>
      %1147 = arith.addf %1139, %1146 : vector<15x2xf32>
      %c135 = arith.constant 135 : index
      %1148 = memref.load %arg6[%c135] : memref<144xf32, #tpu.memory_space<smem>>
      %c0_i32_596 = arith.constant 0 : i32
      %1149 = arith.addi %arg9, %c0_i32_596 : i32
      %c3_597 = arith.constant 3 : index
      %1150 = arith.index_cast %1149 : i32 to index
      %c0_598 = arith.constant 0 : index
      %c0_599 = arith.constant 0 : index
      %1151 = vector.load %arg8[%c3_597, %1150, %c0_598, %c0_599] : memref<4x18x18x2xf32, #tpu.memory_space<vmem>>, vector<1x1x15x2xf32>
      %1152 = vector.shape_cast %1151 : vector<1x1x15x2xf32> to vector<15x2xf32>
      %1153 = vector.broadcast %1148 : f32 to vector<15x2xf32>
      %1154 = arith.mulf %1153, %1152 : vector<15x2xf32>
      %1155 = arith.addf %1147, %1154 : vector<15x2xf32>
      %c136 = arith.constant 136 : index
      %1156 = memref.load %arg6[%c136] : memref<144xf32, #tpu.memory_space<smem>>
      %c0_i32_600 = arith.constant 0 : i32
      %1157 = arith.addi %arg9, %c0_i32_600 : i32
      %c3_601 = arith.constant 3 : index
      %1158 = arith.index_cast %1157 : i32 to index
      %c1_602 = arith.constant 1 : index
      %c0_603 = arith.constant 0 : index
      %1159 = vector.load %arg8[%c3_601, %1158, %c1_602, %c0_603] : memref<4x18x18x2xf32, #tpu.memory_space<vmem>>, vector<1x1x15x2xf32>
      %1160 = vector.shape_cast %1159 : vector<1x1x15x2xf32> to vector<15x2xf32>
      %1161 = vector.broadcast %1156 : f32 to vector<15x2xf32>
      %1162 = arith.mulf %1161, %1160 : vector<15x2xf32>
      %1163 = arith.addf %1155, %1162 : vector<15x2xf32>
      %c137 = arith.constant 137 : index
      %1164 = memref.load %arg6[%c137] : memref<144xf32, #tpu.memory_space<smem>>
      %c0_i32_604 = arith.constant 0 : i32
      %1165 = arith.addi %arg9, %c0_i32_604 : i32
      %c3_605 = arith.constant 3 : index
      %1166 = arith.index_cast %1165 : i32 to index
      %c2_606 = arith.constant 2 : index
      %c0_607 = arith.constant 0 : index
      %1167 = vector.load %arg8[%c3_605, %1166, %c2_606, %c0_607] : memref<4x18x18x2xf32, #tpu.memory_space<vmem>>, vector<1x1x15x2xf32>
      %1168 = vector.shape_cast %1167 : vector<1x1x15x2xf32> to vector<15x2xf32>
      %1169 = vector.broadcast %1164 : f32 to vector<15x2xf32>
      %1170 = arith.mulf %1169, %1168 : vector<15x2xf32>
      %1171 = arith.addf %1163, %1170 : vector<15x2xf32>
      %c138 = arith.constant 138 : index
      %1172 = memref.load %arg6[%c138] : memref<144xf32, #tpu.memory_space<smem>>
      %c1_i32_608 = arith.constant 1 : i32
      %1173 = arith.addi %arg9, %c1_i32_608 : i32
      %c3_609 = arith.constant 3 : index
      %1174 = arith.index_cast %1173 : i32 to index
      %c0_610 = arith.constant 0 : index
      %c0_611 = arith.constant 0 : index
      %1175 = vector.load %arg8[%c3_609, %1174, %c0_610, %c0_611] : memref<4x18x18x2xf32, #tpu.memory_space<vmem>>, vector<1x1x15x2xf32>
      %1176 = vector.shape_cast %1175 : vector<1x1x15x2xf32> to vector<15x2xf32>
      %1177 = vector.broadcast %1172 : f32 to vector<15x2xf32>
      %1178 = arith.mulf %1177, %1176 : vector<15x2xf32>
      %1179 = arith.addf %1171, %1178 : vector<15x2xf32>
      %c139 = arith.constant 139 : index
      %1180 = memref.load %arg6[%c139] : memref<144xf32, #tpu.memory_space<smem>>
      %c1_i32_612 = arith.constant 1 : i32
      %1181 = arith.addi %arg9, %c1_i32_612 : i32
      %c3_613 = arith.constant 3 : index
      %1182 = arith.index_cast %1181 : i32 to index
      %c1_614 = arith.constant 1 : index
      %c0_615 = arith.constant 0 : index
      %1183 = vector.load %arg8[%c3_613, %1182, %c1_614, %c0_615] : memref<4x18x18x2xf32, #tpu.memory_space<vmem>>, vector<1x1x15x2xf32>
      %1184 = vector.shape_cast %1183 : vector<1x1x15x2xf32> to vector<15x2xf32>
      %1185 = vector.broadcast %1180 : f32 to vector<15x2xf32>
      %1186 = arith.mulf %1185, %1184 : vector<15x2xf32>
      %1187 = arith.addf %1179, %1186 : vector<15x2xf32>
      %c140 = arith.constant 140 : index
      %1188 = memref.load %arg6[%c140] : memref<144xf32, #tpu.memory_space<smem>>
      %c1_i32_616 = arith.constant 1 : i32
      %1189 = arith.addi %arg9, %c1_i32_616 : i32
      %c3_617 = arith.constant 3 : index
      %1190 = arith.index_cast %1189 : i32 to index
      %c2_618 = arith.constant 2 : index
      %c0_619 = arith.constant 0 : index
      %1191 = vector.load %arg8[%c3_617, %1190, %c2_618, %c0_619] : memref<4x18x18x2xf32, #tpu.memory_space<vmem>>, vector<1x1x15x2xf32>
      %1192 = vector.shape_cast %1191 : vector<1x1x15x2xf32> to vector<15x2xf32>
      %1193 = vector.broadcast %1188 : f32 to vector<15x2xf32>
      %1194 = arith.mulf %1193, %1192 : vector<15x2xf32>
      %1195 = arith.addf %1187, %1194 : vector<15x2xf32>
      %c141 = arith.constant 141 : index
      %1196 = memref.load %arg6[%c141] : memref<144xf32, #tpu.memory_space<smem>>
      %c2_i32_620 = arith.constant 2 : i32
      %1197 = arith.addi %arg9, %c2_i32_620 : i32
      %c3_621 = arith.constant 3 : index
      %1198 = arith.index_cast %1197 : i32 to index
      %c0_622 = arith.constant 0 : index
      %c0_623 = arith.constant 0 : index
      %1199 = vector.load %arg8[%c3_621, %1198, %c0_622, %c0_623] : memref<4x18x18x2xf32, #tpu.memory_space<vmem>>, vector<1x1x15x2xf32>
      %1200 = vector.shape_cast %1199 : vector<1x1x15x2xf32> to vector<15x2xf32>
      %1201 = vector.broadcast %1196 : f32 to vector<15x2xf32>
      %1202 = arith.mulf %1201, %1200 : vector<15x2xf32>
      %1203 = arith.addf %1195, %1202 : vector<15x2xf32>
      %c142 = arith.constant 142 : index
      %1204 = memref.load %arg6[%c142] : memref<144xf32, #tpu.memory_space<smem>>
      %c2_i32_624 = arith.constant 2 : i32
      %1205 = arith.addi %arg9, %c2_i32_624 : i32
      %c3_625 = arith.constant 3 : index
      %1206 = arith.index_cast %1205 : i32 to index
      %c1_626 = arith.constant 1 : index
      %c0_627 = arith.constant 0 : index
      %1207 = vector.load %arg8[%c3_625, %1206, %c1_626, %c0_627] : memref<4x18x18x2xf32, #tpu.memory_space<vmem>>, vector<1x1x15x2xf32>
      %1208 = vector.shape_cast %1207 : vector<1x1x15x2xf32> to vector<15x2xf32>
      %1209 = vector.broadcast %1204 : f32 to vector<15x2xf32>
      %1210 = arith.mulf %1209, %1208 : vector<15x2xf32>
      %1211 = arith.addf %1203, %1210 : vector<15x2xf32>
      %c143 = arith.constant 143 : index
      %1212 = memref.load %arg6[%c143] : memref<144xf32, #tpu.memory_space<smem>>
      %c2_i32_628 = arith.constant 2 : i32
      %1213 = arith.addi %arg9, %c2_i32_628 : i32
      %c3_629 = arith.constant 3 : index
      %1214 = arith.index_cast %1213 : i32 to index
      %c2_630 = arith.constant 2 : index
      %c0_631 = arith.constant 0 : index
      %1215 = vector.load %arg8[%c3_629, %1214, %c2_630, %c0_631] : memref<4x18x18x2xf32, #tpu.memory_space<vmem>>, vector<1x1x15x2xf32>
      %1216 = vector.shape_cast %1215 : vector<1x1x15x2xf32> to vector<15x2xf32>
      %1217 = vector.broadcast %1212 : f32 to vector<15x2xf32>
      %1218 = arith.mulf %1217, %1216 : vector<15x2xf32>
      %1219 = arith.addf %1211, %1218 : vector<15x2xf32>
      %c3_632 = arith.constant 3 : index
      %1220 = arith.index_cast %arg9 : i32 to index
      %c0_633 = arith.constant 0 : index
      %c0_634 = arith.constant 0 : index
      %1221 = vector.load %arg5[%c3_632, %1220, %c0_633, %c0_634] : memref<4x16x16x1xf32, #tpu.memory_space<vmem>>, vector<1x1x15x1xf32>
      %1222 = vector.shape_cast %1221 : vector<1x1x15x1xf32> to vector<15x1xf32>
      %1223 = vector.broadcast %1222 : vector<15x1xf32> to vector<15x2xf32>
      %1224 = arith.mulf %1219, %1223 : vector<15x2xf32>
      %c3_635 = arith.constant 3 : index
      %1225 = arith.index_cast %arg9 : i32 to index
      %c0_636 = arith.constant 0 : index
      %c0_637 = arith.constant 0 : index
      %1226 = vector.load %arg4[%c3_635, %1225, %c0_636, %c0_637] : memref<4x16x16x1xf32, #tpu.memory_space<vmem>>, vector<1x1x15x1xf32>
      %1227 = vector.shape_cast %1226 : vector<1x1x15x1xf32> to vector<15x1xf32>
      %1228 = vector.broadcast %1227 : vector<15x1xf32> to vector<15x2xf32>
      %1229 = arith.addf %1224, %1228 : vector<15x2xf32>
      %1230 = vector.extract_strided_slice %12 {offsets = [3, 0, 0], sizes = [1, 15, 2], strides = [1, 1, 1]} : vector<4x15x2xf32> to vector<1x15x2xf32>
      %1231 = vector.shape_cast %1230 : vector<1x15x2xf32> to vector<15x2xf32>
      %1232 = arith.subf %1229, %1231 : vector<15x2xf32>
      %c3_638 = arith.constant 3 : index
      %1233 = arith.index_cast %arg9 : i32 to index
      %c0_639 = arith.constant 0 : index
      %c0_640 = arith.constant 0 : index
      %1234 = vector.load %arg7[%c3_638, %1233, %c0_639, %c0_640] : memref<4x16x15x2xf32, #tpu.memory_space<vmem>>, vector<1x1x15x2xf32>
      %1235 = vector.shape_cast %1234 : vector<1x1x15x2xf32> to vector<15x2xf32>
      %1236 = vector.shape_cast %1232 : vector<15x2xf32> to vector<1x1x15x2xf32>
      tpu.vector_store %arg7[%c3_638, %1233, %c0_639, %c0_640], %1236 {strides = array<i32>} : memref<4x16x15x2xf32, #tpu.memory_space<vmem>>, vector<1x1x15x2xf32>,
    }
    %c16_i32_18 = arith.constant 16 : i32
    return
  }
  func.func @transform_0(%arg0: i32) -> (i32, i32, i32, i32) {
    %c0_i32 = arith.constant 0 : i32
    %c0_i32_0 = arith.constant 0 : i32
    %c0_i32_1 = arith.constant 0 : i32
    %c0_i32_2 = arith.constant 0 : i32
    return %c0_i32, %c0_i32_0, %c0_i32_1, %arg0 : i32, i32, i32, i32
  }
  func.func @transform_1(%arg0: i32) -> (i32, i32, i32, i32) {
    %c0_i32 = arith.constant 0 : i32
    %c0_i32_0 = arith.constant 0 : i32
    %c0_i32_1 = arith.constant 0 : i32
    %c0_i32_2 = arith.constant 0 : i32
    %c0_i32_3 = arith.constant 0 : i32
    return %c0_i32, %c0_i32_0, %c0_i32_1, %c0_i32_2 : i32, i32, i32, i32
  }
  func.func @transform_2(%arg0: i32) -> (i32, i32, i32, i32) {
    %c0_i32 = arith.constant 0 : i32
    %c0_i32_0 = arith.constant 0 : i32
    %c0_i32_1 = arith.constant 0 : i32
    %c0_i32_2 = arith.constant 0 : i32
    %c0_i32_3 = arith.constant 0 : i32
    return %c0_i32, %c0_i32_0, %c0_i32_1, %c0_i32_2 : i32, i32, i32, i32
  }
  func.func @transform_3(%arg0: i32) -> (i32, i32, i32, i32) {
    %c0_i32 = arith.constant 0 : i32
    %c0_i32_0 = arith.constant 0 : i32
    %c0_i32_1 = arith.constant 0 : i32
    %c0_i32_2 = arith.constant 0 : i32
    %c0_i32_3 = arith.constant 0 : i32
    return %c0_i32, %c0_i32_0, %c0_i32_1, %c0_i32_2 : i32, i32, i32, i32
  }
  func.func @transform_4(%arg0: i32) -> (i32, i32, i32, i32) {
    %c0_i32 = arith.constant 0 : i32
    %c0_i32_0 = arith.constant 0 : i32
    %c0_i32_1 = arith.constant 0 : i32
    %c0_i32_2 = arith.constant 0 : i32
    %c0_i32_3 = arith.constant 0 : i32
    return %c0_i32, %c0_i32_0, %c0_i32_1, %c0_i32_2 : i32, i32, i32, i32
  }
  func.func @transform_5(%arg0: i32) -> i32 {
    %c0_i32 = arith.constant 0 : i32
    %c0_i32_0 = arith.constant 0 : i32
    return %c0_i32 : i32
  }
  func.func @transform_6(%arg0: i32) -> (i32, i32, i32, i32) {
    %c0_i32 = arith.constant 0 : i32
    %c0_i32_0 = arith.constant 0 : i32
    %c0_i32_1 = arith.constant 0 : i32
    %c0_i32_2 = arith.constant 0 : i32
    return %c0_i32, %c0_i32_0, %c0_i32_1, %arg0 : i32, i32, i32, i32
  }
}

</mosaic_0001>

<bundles_post_ra>
// kernel: tpu_custom_call.1
= control target key start
LH: loop header
LB: loop body
LE: loop exit
PB: predicated region body
PF: predicated region fallthrough
CT: control target
= control target key end

     0   :  { %s4536_s0 = inlined_call_operand.vmem [shape: f32[4,16,15,2], index: 0, kind: input, shape index: {}]   ;;  %s4537_s1 = inlined_call_operand.vmem [shape: f32[4,16,16,1], index: 1, kind: input, shape index: {}]   ;;  %s4538_s2 = inlined_call_operand.vmem [shape: f32[4,16,16,1], index: 2, kind: input, shape index: {}]   ;;  %s4539_s3 = inlined_call_operand.vmem [shape: f32[4,16,16,1], index: 3, kind: input, shape index: {}]   ;;  %s4540_s4 = inlined_call_operand.vmem [shape: f32[4,16,16,1], index: 4, kind: input, shape index: {}]   ;;  %s4541_s5 = inlined_call_operand.vmem [shape: f32[144], index: 5, kind: input, shape index: {}]   ;;  %s4542_s6 = inlined_call_operand.vmem [shape: f32[4,16,15,2], index: 6, kind: output, shape index: {}]  }
   0x1   :  { %4604 = sst [smem:[#allocation28_spill]] %s4536_s0 }
   0x2   :  { %4605 = sst [smem:[#allocation29_spill]] %s4539_s3 }
   0x3   :  { %4606 = sst [smem:[#allocation30_spill]] %s4540_s4 }
   0x4   :  { %4607 = sst [smem:[#allocation31_spill]] %s4542_s6 }
   0x5   :  { %11 = vsyncpa [#allocation4], 0  ;;  %s28_s23 = sshll.u32 %s4541_s5, 4  ;;  %s29_s23 = int_to_ptr.vmem [resolvable:$true] %s28_s23 }
   0x6   :  { %s2324_s24 = scalar_lea.vmem %s29_s23, 32  ;;  %p2329_p1 = scmp.lt.s32.totalorder %s29_s23, %s29_s23 }
   0x7   :  { %p2325_p0 = scmp.ne.s32.totalorder %s29_s23, %s2324_s24  ;;  %p2330_p2 = scmp.lt.s32.totalorder %s2324_s24, %s2324_s24 }
   0x9   :  { %p2331_p3 = por %p2330_p2, %p2329_p1 }
   0xb   :  { %p2332_p4 = pnand %p2331_p3, %p2325_p0 }
   0xd   :  { %2335 = shalt.err (!%p2332_p4)
}
   0xe   :  { %s2354_s25 = smov [#allocation3]  }
   0xf   :  { %31 = dma.vmem_to_smem %s29_s23, 32, %s2354_s25, [#allocation4]  }
  0x10   :  { %2344 = dma.done.wait [#allocation4], 32  }
  0x11   :  { %2345 = vsyncadd [#allocation4], 4294967264 }
  0x12   :  { %35 = sfence }
  0x13   :  { %vm36_vm0 = vcmask 15360   ;;  %vm39_vm1 = vcmask 9216   ;;  %vm64_vm2 = vcmask 8192   ;;  %v2355_v0 = vmov 0.0   ;;  %s2700_s5 = smov 0  }
  0x14   :  { %37 = vst.msk [vmem:[#allocation2] sm:$0xff] %vm36_vm0, %v2355_v0  ;;  %38 = vst.msk [vmem:[#allocation2 + $0x8] sm:$0xff] %vm36_vm0, %v2355_v0 }
  0x15   :  { %41 = vst.msk [vmem:[#allocation2 + $0x1b0] sm:$0xff] %vm36_vm0, %v2355_v0  ;;  %42 = vst.msk [vmem:[#allocation2 + $0x1b8] sm:$0xff] %vm36_vm0, %v2355_v0 }
  0x16   :  { %44 = vst.msk [vmem:[#allocation2 + $0x360] sm:$0xff] %vm36_vm0, %v2355_v0  ;;  %45 = vst.msk [vmem:[#allocation2 + $0x368] sm:$0xff] %vm36_vm0, %v2355_v0 }
  0x17   :  { %47 = vst.msk [vmem:[#allocation2 + $0x510] sm:$0xff] %vm36_vm0, %v2355_v0  ;;  %48 = vst.msk [vmem:[#allocation2 + $0x518] sm:$0xff] %vm36_vm0, %v2355_v0 }
  0x18   :  { %51 = vst.msk [vmem:[#allocation2 + $0x198] sm:$0xff] %vm36_vm0, %v2355_v0  ;;  %52 = vst.msk [vmem:[#allocation2 + $0x1a0] sm:$0xff] %vm36_vm0, %v2355_v0 }
  0x19   :  { %54 = vst.msk [vmem:[#allocation2 + $0x348] sm:$0xff] %vm36_vm0, %v2355_v0  ;;  %55 = vst.msk [vmem:[#allocation2 + $0x350] sm:$0xff] %vm36_vm0, %v2355_v0 }
  0x1a   :  { %57 = vst.msk [vmem:[#allocation2 + $0x4f8] sm:$0xff] %vm36_vm0, %v2355_v0  ;;  %58 = vst.msk [vmem:[#allocation2 + $0x500] sm:$0xff] %vm36_vm0, %v2355_v0 }
  0x1b   :  { %60 = vst.msk [vmem:[#allocation2 + $0x6a8] sm:$0xff] %vm36_vm0, %v2355_v0  ;;  %61 = vst.msk [vmem:[#allocation2 + $0x6b0] sm:$0xff] %vm36_vm0, %v2355_v0 }
  0x1c   :  { %40 = vst.msk [vmem:[#allocation2 + $0x10] sm:$0x3] %vm39_vm1, %v2355_v0  ;;  %43 = vst.msk [vmem:[#allocation2 + $0x1c0] sm:$0x3] %vm39_vm1, %v2355_v0 }
  0x1d   :  { %46 = vst.msk [vmem:[#allocation2 + $0x370] sm:$0x3] %vm39_vm1, %v2355_v0  ;;  %49 = vst.msk [vmem:[#allocation2 + $0x520] sm:$0x3] %vm39_vm1, %v2355_v0 }
  0x1e   :  { %53 = vst.msk [vmem:[#allocation2 + $0x1a8] sm:$0x3] %vm39_vm1, %v2355_v0  ;;  %56 = vst.msk [vmem:[#allocation2 + $0x358] sm:$0x3] %vm39_vm1, %v2355_v0 }
  0x1f   :  { %59 = vst.msk [vmem:[#allocation2 + $0x508] sm:$0x3] %vm39_vm1, %v2355_v0  ;;  %62 = vst.msk [vmem:[#allocation2 + $0x6b8] sm:$0x3] %vm39_vm1, %v2355_v0 }
  0x20   :  { %65 = vst.msk [vmem:[#allocation2 + $0x18] sm:$0x1] %vm64_vm2, %v2355_v0  ;;  %66 = vst.msk [vmem:[#allocation2 + $0x30] sm:$0x1] %vm64_vm2, %v2355_v0 }
  0x21   :  { %67 = vst.msk [vmem:[#allocation2 + $0x48] sm:$0x1] %vm64_vm2, %v2355_v0  ;;  %68 = vst.msk [vmem:[#allocation2 + $0x60] sm:$0x1] %vm64_vm2, %v2355_v0 }
  0x22   :  { %69 = vst.msk [vmem:[#allocation2 + $0x78] sm:$0x1] %vm64_vm2, %v2355_v0  ;;  %70 = vst.msk [vmem:[#allocation2 + $0x90] sm:$0x1] %vm64_vm2, %v2355_v0 }
  0x23   :  { %71 = vst.msk [vmem:[#allocation2 + $0xa8] sm:$0x1] %vm64_vm2, %v2355_v0  ;;  %72 = vst.msk [vmem:[#allocation2 + $0xc0] sm:$0x1] %vm64_vm2, %v2355_v0 }
  0x24   :  { %73 = vst.msk [vmem:[#allocation2 + $0xd8] sm:$0x1] %vm64_vm2, %v2355_v0  ;;  %74 = vst.msk [vmem:[#allocation2 + $0xf0] sm:$0x1] %vm64_vm2, %v2355_v0 }
  0x25   :  { %75 = vst.msk [vmem:[#allocation2 + $0x108] sm:$0x1] %vm64_vm2, %v2355_v0  ;;  %76 = vst.msk [vmem:[#allocation2 + $0x120] sm:$0x1] %vm64_vm2, %v2355_v0 }
  0x26   :  { %77 = vst.msk [vmem:[#allocation2 + $0x138] sm:$0x1] %vm64_vm2, %v2355_v0  ;;  %78 = vst.msk [vmem:[#allocation2 + $0x150] sm:$0x1] %vm64_vm2, %v2355_v0 }
  0x27   :  { %79 = vst.msk [vmem:[#allocation2 + $0x168] sm:$0x1] %vm64_vm2, %v2355_v0  ;;  %80 = vst.msk [vmem:[#allocation2 + $0x180] sm:$0x1] %vm64_vm2, %v2355_v0 }
  0x28   :  { %81 = vst.msk [vmem:[#allocation2 + $0x1c8] sm:$0x1] %vm64_vm2, %v2355_v0  ;;  %82 = vst.msk [vmem:[#allocation2 + $0x1e0] sm:$0x1] %vm64_vm2, %v2355_v0 }
  0x29   :  { %83 = vst.msk [vmem:[#allocation2 + $0x1f8] sm:$0x1] %vm64_vm2, %v2355_v0  ;;  %84 = vst.msk [vmem:[#allocation2 + $0x210] sm:$0x1] %vm64_vm2, %v2355_v0 }
  0x2a   :  { %85 = vst.msk [vmem:[#allocation2 + $0x228] sm:$0x1] %vm64_vm2, %v2355_v0  ;;  %86 = vst.msk [vmem:[#allocation2 + $0x240] sm:$0x1] %vm64_vm2, %v2355_v0 }
  0x2b   :  { %87 = vst.msk [vmem:[#allocation2 + $0x258] sm:$0x1] %vm64_vm2, %v2355_v0  ;;  %88 = vst.msk [vmem:[#allocation2 + $0x270] sm:$0x1] %vm64_vm2, %v2355_v0 }
  0x2c   :  { %89 = vst.msk [vmem:[#allocation2 + $0x288] sm:$0x1] %vm64_vm2, %v2355_v0  ;;  %90 = vst.msk [vmem:[#allocation2 + $0x2a0] sm:$0x1] %vm64_vm2, %v2355_v0 }
  0x2d   :  { %91 = vst.msk [vmem:[#allocation2 + $0x2b8] sm:$0x1] %vm64_vm2, %v2355_v0  ;;  %92 = vst.msk [vmem:[#allocation2 + $0x2d0] sm:$0x1] %vm64_vm2, %v2355_v0 }
  0x2e   :  { %93 = vst.msk [vmem:[#allocation2 + $0x2e8] sm:$0x1] %vm64_vm2, %v2355_v0  ;;  %94 = vst.msk [vmem:[#allocation2 + $0x300] sm:$0x1] %vm64_vm2, %v2355_v0 }
  0x2f   :  { %95 = vst.msk [vmem:[#allocation2 + $0x318] sm:$0x1] %vm64_vm2, %v2355_v0  ;;  %96 = vst.msk [vmem:[#allocation2 + $0x330] sm:$0x1] %vm64_vm2, %v2355_v0 }
  0x30   :  { %97 = vst.msk [vmem:[#allocation2 + $0x378] sm:$0x1] %vm64_vm2, %v2355_v0  ;;  %98 = vst.msk [vmem:[#allocation2 + $0x390] sm:$0x1] %vm64_vm2, %v2355_v0 }
  0x31   :  { %99 = vst.msk [vmem:[#allocation2 + $0x3a8] sm:$0x1] %vm64_vm2, %v2355_v0  ;;  %100 = vst.msk [vmem:[#allocation2 + $0x3c0] sm:$0x1] %vm64_vm2, %v2355_v0 }
  0x32   :  { %101 = vst.msk [vmem:[#allocation2 + $0x3d8] sm:$0x1] %vm64_vm2, %v2355_v0  ;;  %102 = vst.msk [vmem:[#allocation2 + $0x3f0] sm:$0x1] %vm64_vm2, %v2355_v0 }
  0x33   :  { %103 = vst.msk [vmem:[#allocation2 + $0x408] sm:$0x1] %vm64_vm2, %v2355_v0  ;;  %104 = vst.msk [vmem:[#allocation2 + $0x420] sm:$0x1] %vm64_vm2, %v2355_v0 }
  0x34   :  { %105 = vst.msk [vmem:[#allocation2 + $0x438] sm:$0x1] %vm64_vm2, %v2355_v0  ;;  %106 = vst.msk [vmem:[#allocation2 + $0x450] sm:$0x1] %vm64_vm2, %v2355_v0 }
  0x35   :  { %107 = vst.msk [vmem:[#allocation2 + $0x468] sm:$0x1] %vm64_vm2, %v2355_v0  ;;  %108 = vst.msk [vmem:[#allocation2 + $0x480] sm:$0x1] %vm64_vm2, %v2355_v0 }
  0x36   :  { %109 = vst.msk [vmem:[#allocation2 + $0x498] sm:$0x1] %vm64_vm2, %v2355_v0  ;;  %110 = vst.msk [vmem:[#allocation2 + $0x4b0] sm:$0x1] %vm64_vm2, %v2355_v0 }
  0x37   :  { %111 = vst.msk [vmem:[#allocation2 + $0x4c8] sm:$0x1] %vm64_vm2, %v2355_v0  ;;  %112 = vst.msk [vmem:[#allocation2 + $0x4e0] sm:$0x1] %vm64_vm2, %v2355_v0 }
  0x38   :  { %113 = vst.msk [vmem:[#allocation2 + $0x528] sm:$0x1] %vm64_vm2, %v2355_v0  ;;  %114 = vst.msk [vmem:[#allocation2 + $0x540] sm:$0x1] %vm64_vm2, %v2355_v0 }
  0x39   :  { %115 = vst.msk [vmem:[#allocation2 + $0x558] sm:$0x1] %vm64_vm2, %v2355_v0  ;;  %116 = vst.msk [vmem:[#allocation2 + $0x570] sm:$0x1] %vm64_vm2, %v2355_v0 }
  0x3a   :  { %117 = vst.msk [vmem:[#allocation2 + $0x588] sm:$0x1] %vm64_vm2, %v2355_v0  ;;  %118 = vst.msk [vmem:[#allocation2 + $0x5a0] sm:$0x1] %vm64_vm2, %v2355_v0 }
  0x3b   :  { %119 = vst.msk [vmem:[#allocation2 + $0x5b8] sm:$0x1] %vm64_vm2, %v2355_v0  ;;  %120 = vst.msk [vmem:[#allocation2 + $0x5d0] sm:$0x1] %vm64_vm2, %v2355_v0 }
  0x3c   :  { %121 = vst.msk [vmem:[#allocation2 + $0x5e8] sm:$0x1] %vm64_vm2, %v2355_v0  ;;  %122 = vst.msk [vmem:[#allocation2 + $0x600] sm:$0x1] %vm64_vm2, %v2355_v0 }
  0x3d   :  { %123 = vst.msk [vmem:[#allocation2 + $0x618] sm:$0x1] %vm64_vm2, %v2355_v0  ;;  %124 = vst.msk [vmem:[#allocation2 + $0x630] sm:$0x1] %vm64_vm2, %v2355_v0 }
  0x3e   :  { %125 = vst.msk [vmem:[#allocation2 + $0x648] sm:$0x1] %vm64_vm2, %v2355_v0  ;;  %126 = vst.msk [vmem:[#allocation2 + $0x660] sm:$0x1] %vm64_vm2, %v2355_v0 }
  0x3f   :  { %127 = vst.msk [vmem:[#allocation2 + $0x678] sm:$0x1] %vm64_vm2, %v2355_v0  ;;  %128 = vst.msk [vmem:[#allocation2 + $0x690] sm:$0x1] %vm64_vm2, %v2355_v0 }
  0x40   :  { %129 = vst.msk [vmem:[#allocation2 + $0x29] sm:$0x1] %vm64_vm2, %v2355_v0  ;;  %130 = vst.msk [vmem:[#allocation2 + $0x41] sm:$0x1] %vm64_vm2, %v2355_v0 }
  0x41   :  { %131 = vst.msk [vmem:[#allocation2 + $0x59] sm:$0x1] %vm64_vm2, %v2355_v0  ;;  %132 = vst.msk [vmem:[#allocation2 + $0x71] sm:$0x1] %vm64_vm2, %v2355_v0 }
  0x42   :  { %133 = vst.msk [vmem:[#allocation2 + $0x89] sm:$0x1] %vm64_vm2, %v2355_v0  ;;  %134 = vst.msk [vmem:[#allocation2 + $0xa1] sm:$0x1] %vm64_vm2, %v2355_v0 }
  0x43   :  { %135 = vst.msk [vmem:[#allocation2 + $0xb9] sm:$0x1] %vm64_vm2, %v2355_v0  ;;  %136 = vst.msk [vmem:[#allocation2 + $0xd1] sm:$0x1] %vm64_vm2, %v2355_v0 }
  0x44   :  { %137 = vst.msk [vmem:[#allocation2 + $0xe9] sm:$0x1] %vm64_vm2, %v2355_v0  ;;  %138 = vst.msk [vmem:[#allocation2 + $0x101] sm:$0x1] %vm64_vm2, %v2355_v0 }
  0x45   :  { %139 = vst.msk [vmem:[#allocation2 + $0x119] sm:$0x1] %vm64_vm2, %v2355_v0  ;;  %140 = vst.msk [vmem:[#allocation2 + $0x131] sm:$0x1] %vm64_vm2, %v2355_v0 }
  0x46   :  { %141 = vst.msk [vmem:[#allocation2 + $0x149] sm:$0x1] %vm64_vm2, %v2355_v0  ;;  %142 = vst.msk [vmem:[#allocation2 + $0x161] sm:$0x1] %vm64_vm2, %v2355_v0 }
  0x47   :  { %143 = vst.msk [vmem:[#allocation2 + $0x179] sm:$0x1] %vm64_vm2, %v2355_v0  ;;  %144 = vst.msk [vmem:[#allocation2 + $0x191] sm:$0x1] %vm64_vm2, %v2355_v0 }
  0x48   :  { %145 = vst.msk [vmem:[#allocation2 + $0x1d9] sm:$0x1] %vm64_vm2, %v2355_v0  ;;  %146 = vst.msk [vmem:[#allocation2 + $0x1f1] sm:$0x1] %vm64_vm2, %v2355_v0 }
  0x49   :  { %147 = vst.msk [vmem:[#allocation2 + $0x209] sm:$0x1] %vm64_vm2, %v2355_v0  ;;  %148 = vst.msk [vmem:[#allocation2 + $0x221] sm:$0x1] %vm64_vm2, %v2355_v0 }
  0x4a   :  { %149 = vst.msk [vmem:[#allocation2 + $0x239] sm:$0x1] %vm64_vm2, %v2355_v0  ;;  %150 = vst.msk [vmem:[#allocation2 + $0x251] sm:$0x1] %vm64_vm2, %v2355_v0 }
  0x4b   :  { %151 = vst.msk [vmem:[#allocation2 + $0x269] sm:$0x1] %vm64_vm2, %v2355_v0  ;;  %152 = vst.msk [vmem:[#allocation2 + $0x281] sm:$0x1] %vm64_vm2, %v2355_v0 }
  0x4c   :  { %153 = vst.msk [vmem:[#allocation2 + $0x299] sm:$0x1] %vm64_vm2, %v2355_v0  ;;  %154 = vst.msk [vmem:[#allocation2 + $0x2b1] sm:$0x1] %vm64_vm2, %v2355_v0 }
  0x4d   :  { %155 = vst.msk [vmem:[#allocation2 + $0x2c9] sm:$0x1] %vm64_vm2, %v2355_v0  ;;  %156 = vst.msk [vmem:[#allocation2 + $0x2e1] sm:$0x1] %vm64_vm2, %v2355_v0 }
  0x4e   :  { %157 = vst.msk [vmem:[#allocation2 + $0x2f9] sm:$0x1] %vm64_vm2, %v2355_v0  ;;  %158 = vst.msk [vmem:[#allocation2 + $0x311] sm:$0x1] %vm64_vm2, %v2355_v0 }
  0x4f   :  { %159 = vst.msk [vmem:[#allocation2 + $0x329] sm:$0x1] %vm64_vm2, %v2355_v0  ;;  %160 = vst.msk [vmem:[#allocation2 + $0x341] sm:$0x1] %vm64_vm2, %v2355_v0 }
  0x50   :  { %161 = vst.msk [vmem:[#allocation2 + $0x389] sm:$0x1] %vm64_vm2, %v2355_v0  ;;  %162 = vst.msk [vmem:[#allocation2 + $0x3a1] sm:$0x1] %vm64_vm2, %v2355_v0 }
  0x51   :  { %163 = vst.msk [vmem:[#allocation2 + $0x3b9] sm:$0x1] %vm64_vm2, %v2355_v0  ;;  %164 = vst.msk [vmem:[#allocation2 + $0x3d1] sm:$0x1] %vm64_vm2, %v2355_v0 }
  0x52   :  { %165 = vst.msk [vmem:[#allocation2 + $0x3e9] sm:$0x1] %vm64_vm2, %v2355_v0  ;;  %166 = vst.msk [vmem:[#allocation2 + $0x401] sm:$0x1] %vm64_vm2, %v2355_v0 }
  0x53   :  { %167 = vst.msk [vmem:[#allocation2 + $0x419] sm:$0x1] %vm64_vm2, %v2355_v0  ;;  %168 = vst.msk [vmem:[#allocation2 + $0x431] sm:$0x1] %vm64_vm2, %v2355_v0 }
  0x54   :  { %169 = vst.msk [vmem:[#allocation2 + $0x449] sm:$0x1] %vm64_vm2, %v2355_v0  ;;  %170 = vst.msk [vmem:[#allocation2 + $0x461] sm:$0x1] %vm64_vm2, %v2355_v0 }
  0x55   :  { %171 = vst.msk [vmem:[#allocation2 + $0x479] sm:$0x1] %vm64_vm2, %v2355_v0  ;;  %172 = vst.msk [vmem:[#allocation2 + $0x491] sm:$0x1] %vm64_vm2, %v2355_v0 }
  0x56   :  { %173 = vst.msk [vmem:[#allocation2 + $0x4a9] sm:$0x1] %vm64_vm2, %v2355_v0  ;;  %174 = vst.msk [vmem:[#allocation2 + $0x4c1] sm:$0x1] %vm64_vm2, %v2355_v0 }
  0x57   :  { %175 = vst.msk [vmem:[#allocation2 + $0x4d9] sm:$0x1] %vm64_vm2, %v2355_v0  ;;  %176 = vst.msk [vmem:[#allocation2 + $0x4f1] sm:$0x1] %vm64_vm2, %v2355_v0 }
  0x58   :  { %177 = vst.msk [vmem:[#allocation2 + $0x539] sm:$0x1] %vm64_vm2, %v2355_v0  ;;  %178 = vst.msk [vmem:[#allocation2 + $0x551] sm:$0x1] %vm64_vm2, %v2355_v0 }
  0x59   :  { %179 = vst.msk [vmem:[#allocation2 + $0x569] sm:$0x1] %vm64_vm2, %v2355_v0  ;;  %180 = vst.msk [vmem:[#allocation2 + $0x581] sm:$0x1] %vm64_vm2, %v2355_v0 }
  0x5a   :  { %181 = vst.msk [vmem:[#allocation2 + $0x599] sm:$0x1] %vm64_vm2, %v2355_v0  ;;  %182 = vst.msk [vmem:[#allocation2 + $0x5b1] sm:$0x1] %vm64_vm2, %v2355_v0 }
  0x5b   :  { %183 = vst.msk [vmem:[#allocation2 + $0x5c9] sm:$0x1] %vm64_vm2, %v2355_v0  ;;  %184 = vst.msk [vmem:[#allocation2 + $0x5e1] sm:$0x1] %vm64_vm2, %v2355_v0 }
  0x5c   :  { %185 = vst.msk [vmem:[#allocation2 + $0x5f9] sm:$0x1] %vm64_vm2, %v2355_v0  ;;  %186 = vst.msk [vmem:[#allocation2 + $0x611] sm:$0x1] %vm64_vm2, %v2355_v0 }
  0x5d   :  { %187 = vst.msk [vmem:[#allocation2 + $0x629] sm:$0x1] %vm64_vm2, %v2355_v0  ;;  %188 = vst.msk [vmem:[#allocation2 + $0x641] sm:$0x1] %vm64_vm2, %v2355_v0 }
  0x5e   :  { %189 = vst.msk [vmem:[#allocation2 + $0x659] sm:$0x1] %vm64_vm2, %v2355_v0  ;;  %190 = vst.msk [vmem:[#allocation2 + $0x671] sm:$0x1] %vm64_vm2, %v2355_v0 }
  0x5f   :  { %191 = vst.msk [vmem:[#allocation2 + $0x689] sm:$0x1] %vm64_vm2, %v2355_v0  ;;  %192 = vst.msk [vmem:[#allocation2 + $0x6a1] sm:$0x1] %vm64_vm2, %v2355_v0 }
  0x60 LB: > { %v2356_v1 = vmov 0   ;;  %s2706_s26 = sshll.u32 %s2348_s5, 4  ;;  %s1769_s12 = smul.u32 24, %s2348_s5  ;;  %vm407_vm3 = vcmask 14342   ;;  %vm335_vm4 = vcmask 14336   ;;  %s2348_s5 = sphi %s2700_s5, %s198_s5  }
  0x61   : > { %2321 = vset.pattern.permute.xlu1 %v2356_v1  ;;  %2320 = vset.pattern.permute.xlu0 %v2356_v1  ;;  %s217_s29 = scalar_lea.vmem %s4537_s1, %s2706_s26  ;;  %s226_s8 = scalar_lea.vmem %s4538_s2, %s2706_s26 }
  0x62   : > { %v220_v2 = vld [vmem:[%s217_s29 + $0x100] sm:$0xff]  ;;  %v221_v4 = vld [vmem:[%s217_s29 + $0x108] sm:$0x7f]  ;;  %v343_v8 = vld [vmem:[%s217_s29 + $0xf] sm:$0x1]  ;;  %s2726_s11 = scalar_lea.vmem %s4536_s0, %s2706_s26  ;;  %s2737_s13 = scalar_lea.vmem [#allocation2], %s1769_s12 }
  0x63   : > { %v218_v3 = vld [vmem:[%s217_s29] sm:$0xff]  ;;  %247 = vperm.xlu1 %2321, %v220_v2   ;;  %v219_v5 = vld [vmem:[%s217_s29 + $0x8] sm:$0x7f]  ;;  %v345_v10 = vld [vmem:[%s217_s29 + $0x20f] sm:$0x1]  ;;  %s198_s5 = sadd.s32 1, %s2348_s5  }
  0x64   : > { %237 = vperm.xlu0 %2320, %v218_v3   ;;  %v223_v6 = vld [vmem:[%s217_s29 + $0x208] sm:$0x7f]  ;;  %v222_v7 = vld [vmem:[%s217_s29 + $0x200] sm:$0xff]  ;;  %v344_v11 = vld [vmem:[%s217_s29 + $0x10f] sm:$0x1]  ;;  %p195_p5 = scmp.ge.s32.totalorder %s198_s5, 16  }
  0x65   : > { %v224_v9 = vld [vmem:[%s217_s29 + $0x300] sm:$0xff]  ;;  %v225_v12 = vld [vmem:[%s217_s29 + $0x308] sm:$0x7f]  ;;  %v346_v13 = vld [vmem:[%s217_s29 + $0x30f] sm:$0x1]  ;;  %s2772_s14 = smov (%p195_p5), 0  }
  0x66   : > { %v376_v14 = vld [vmem:[%s226_s8 + $0x10f] sm:$0x1]  ;;  %v228_v18 = vld [vmem:[%s226_s8 + $0x8] sm:$0x7f]  ;;  %v227_v19 = vld [vmem:[%s226_s8] sm:$0xff] }
  0x67   : > { %252 = vperm.xlu1 %2321, %v221_v4   ;;  %v375_v15 = vld [vmem:[%s226_s8 + $0xf] sm:$0x1]  ;;  %v230_v20 = vld [vmem:[%s226_s8 + $0x108] sm:$0x7f]  ;;  %v229_v21 = vld [vmem:[%s226_s8 + $0x100] sm:$0xff] }
  0x68   : > { %242 = vperm.xlu0 %2320, %v219_v5   ;;  %v378_v16 = vld [vmem:[%s226_s8 + $0x30f] sm:$0x1]  ;;  %v232_v22 = vld [vmem:[%s226_s8 + $0x208] sm:$0x7f]  ;;  %v231_v23 = vld [vmem:[%s226_s8 + $0x200] sm:$0xff] }
  0x69   : > { %v377_v17 = vld [vmem:[%s226_s8 + $0x20f] sm:$0x1]  ;;  %v234_v24 = vld [vmem:[%s226_s8 + $0x308] sm:$0x7f]  ;;  %v233_v25 = vld [vmem:[%s226_s8 + $0x300] sm:$0xff] }
  0x6a   : > { %v202_v36 = vld [vmem:[%s2726_s11 + $0x8] sm:$0x7f]  ;;  %v201_v43 = vld [vmem:[%s2726_s11] sm:$0xff] }
  0x6b   : > { %262 = vperm.xlu1 %2321, %v223_v6   ;;  %v204_v37 = vld [vmem:[%s2726_s11 + $0x108] sm:$0x7f]  ;;  %v210_v42 = vmax.f32 %v202_v36, 0.0  ;;  %v209_v55 = vmax.f32 %v201_v43, 0.0  ;;  %v203_v56 = vld [vmem:[%s2726_s11 + $0x100] sm:$0xff] }
  0x6c   : > { %257 = vperm.xlu0 %2320, %v222_v7   ;;  %v212_v44 = vmax.f32 %v204_v37, 0.0  ;;  %v206_v45 = vld [vmem:[%s2726_s11 + $0x208] sm:$0x7f]  ;;  %v211_v3 = vmax.f32 %v203_v56, 0.0 }
  0x6d   : > { %v208_v48 = vld [vmem:[%s2726_s11 + $0x308] sm:$0x7f]  ;;  %v214_v57 = vmax.f32 %v206_v45, 0.0 }
  0x6e   : > { %v216_v58 = vmax.f32 %v208_v48, 0.0 }
  0x6f   : > { %349 = vperm.xlu1 %2321, %v343_v8   ;;  %v205_v8 = vld [vmem:[%s2726_s11 + $0x200] sm:$0xff] }
  0x70   : > { %267 = vperm.xlu0 %2320, %v224_v9  }
  0x73   : > { %357 = vperm.xlu1 %2321, %v345_v10  }
  0x74   : > { %353 = vperm.xlu0 %2320, %v344_v11  }
  0x77   : > { %272 = vperm.xlu1 %2321, %v225_v12  }
  0x78   : > { %361 = vperm.xlu0 %2320, %v346_v13  }
  0x7b   : > { %385 = vperm.xlu1 %2321, %v376_v14  }
  0x7c   : > { %381 = vperm.xlu0 %2320, %v375_v15   ;;  %v213_v15 = vmax.f32 %v205_v8, 0.0 }
  0x7f   : > { %393 = vperm.xlu1 %2321, %v378_v16   ;;  %v207_v16 = vld [vmem:[%s2726_s11 + $0x300] sm:$0xff] }
  0x80   : > { %389 = vperm.xlu0 %2320, %v377_v17  }
  0x83   : > { %290 = vperm.xlu1 %2321, %v228_v18  }
  0x84   : > { %285 = vperm.xlu0 %2320, %v227_v19  }
  0x87   : > { %300 = vperm.xlu1 %2321, %v230_v20  }
  0x88   : > { %295 = vperm.xlu0 %2320, %v229_v21  }
  0x8b   : > { %310 = vperm.xlu1 %2321, %v232_v22  }
  0x8c   : > { %305 = vperm.xlu0 %2320, %v231_v23   ;;  %v215_v23 = vmax.f32 %v207_v16, 0.0 }
  0x8f   : > { %320 = vperm.xlu1 %2321, %v234_v24  }
  0x90   : > { %315 = vperm.xlu0 %2320, %v233_v25  }
  0xde   : > { %v248_v26 = vpop.permute.xlu1 %247 }
  0xdf   : > { %v238_v27 = vpop.permute.xlu0 %237  ;;  %v277_v13 = vsub.f32 %v211_v3, %v248_v26 }
  0xe0   : > { %v275_v4 = vsub.f32 %v209_v55, %v238_v27 }
  0xe2   : > { %v253_v28 = vpop.permute.xlu1 %252 }
  0xe3   : > { %v243_v29 = vpop.permute.xlu0 %242  ;;  %v278_v14 = vsub.f32 %v212_v44, %v253_v28 }
  0xe4   : > { %v276_v5 = vsub.f32 %v210_v42, %v243_v29 }
  0xe6   : > { %v2716_v30 = vpop.permute.xlu1 %262 }
  0xe7   : > { %v2718_v31 = vpop.permute.xlu0 %257  ;;  %v280_v21 = vsub.f32 %v214_v57, %v2716_v30 }
  0xe8   : > { %v279_v22 = vsub.f32 %v213_v15, %v2718_v31 }
  0xea   : > { %v350_v32 = vpop.permute.xlu1 %349 }
  0xeb   : > { %v2720_v33 = vpop.permute.xlu0 %267  ;;  %v363_v38 = vrot.slane %v350_v32, 2 }
  0xec   : > { %v281_v28 = vsub.f32 %v215_v23, %v2720_v33 }
  0xed   : > { %v371_v46 = vsub.f32 %v210_v42, %v363_v38 }
  0xee   : > { %v358_v34 = vpop.permute.xlu1 %357 }
  0xef   : > { %v354_v35 = vpop.permute.xlu0 %353  ;;  %v365_v47 = vrot.slane %v358_v34, 2 }
  0xf0   : > { %v364_v41 = vrot.slane %v354_v35, 2 }
  0xf1   : > { %v373_v63 = vsub.f32 %v214_v57, %v365_v47 }
  0xf2   : > { %v2730_v39 = vpop.permute.xlu1 %272  ;;  %v372_v51 = vsub.f32 %v212_v44, %v364_v41 }
  0xf3   : > { %v362_v40 = vpop.permute.xlu0 %361  ;;  %v282_v29 = vsub.f32 %v216_v58, %v2730_v39 }
  0xf4   : > { %v366_v52 = vrot.slane %v362_v40, 2 }
  0xf6   : > { %v386_v49 = vpop.permute.xlu1 %385  ;;  %v374_v0 = vsub.f32 %v216_v58, %v366_v52 }
  0xf7   : > { %v382_v50 = vpop.permute.xlu0 %381  ;;  %v396_v53 = vrot.slane %v386_v49, 2 }
  0xf8   : > { %v395_v54 = vrot.slane %v382_v50, 2 }
  0xf9   : > { %v404_v59 = vmul.f32 %v396_v53, %v372_v51 }
  0xfa   : > { %v403_v60 = vmul.f32 %v395_v54, %v371_v46  ;;  %v394_v61 = vpop.permute.xlu1 %393 }
  0xfb   : > { %v390_v62 = vpop.permute.xlu0 %389  ;;  %1862 = vst.msk [vmem:[%s2737_s13 + $0x1d2] sm:$0x40] %vm407_vm3, %v404_v59  ;;  %v398_v1 = vrot.slane %v394_v61, 2 }
  0xfc   : > { %1861 = vst.msk [vmem:[%s2737_s13 + $0x22] sm:$0x40] %vm407_vm3, %v403_v60  ;;  %v397_v2 = vrot.slane %v390_v62, 2 }
  0xfd   : > { %v406_v6 = vmul.f32 %v398_v1, %v374_v0 }
  0xfe   : > { %v405_v7 = vmul.f32 %v397_v2, %v373_v63  ;;  %v291_v9 = vpop.permute.xlu1 %290 }
  0xff   : > { %v286_v10 = vpop.permute.xlu0 %285  ;;  %1864 = vst.msk [vmem:[%s2737_s13 + $0x532] sm:$0x40] %vm407_vm3, %v406_v6  ;;  %v324_v11 = vmul.f32 %v291_v9, %v276_v5 }
 0x100   : > { %1863 = vst.msk [vmem:[%s2737_s13 + $0x382] sm:$0x40] %vm407_vm3, %v405_v7  ;;  %v323_v12 = vmul.f32 %v286_v10, %v275_v4 }
 0x101   : > { %1854 = vst.msk [vmem:[%s2737_s13 + $0x21] sm:$0x7f] %vm335_vm4, %v324_v11 }
 0x102   : > { %1853 = vst.msk [vmem:[%s2737_s13 + $0x19] sm:$0xff] %vm36_vm0, %v323_v12  ;;  %v301_v17 = vpop.permute.xlu1 %300 }
 0x103   : > { %v296_v18 = vpop.permute.xlu0 %295  ;;  %v326_v19 = vmul.f32 %v301_v17, %v278_v14 }
 0x104   : > { %v325_v20 = vmul.f32 %v296_v18, %v277_v13 }
 0x105   : > { %1856 = vst.msk [vmem:[%s2737_s13 + $0x1d1] sm:$0x7f] %vm335_vm4, %v326_v19 }
 0x106   : > { %1855 = vst.msk [vmem:[%s2737_s13 + $0x1c9] sm:$0xff] %vm36_vm0, %v325_v20  ;;  %v311_v24 = vpop.permute.xlu1 %310 }
 0x107   : > { %v306_v25 = vpop.permute.xlu0 %305  ;;  %v328_v26 = vmul.f32 %v311_v24, %v280_v21 }
 0x108   : > { %v327_v27 = vmul.f32 %v306_v25, %v279_v22 }
 0x109   : > { %1858 = vst.msk [vmem:[%s2737_s13 + $0x381] sm:$0x7f] %vm335_vm4, %v328_v26 }
 0x10a   : > { %1857 = vst.msk [vmem:[%s2737_s13 + $0x379] sm:$0xff] %vm36_vm0, %v327_v27  ;;  %v321_v30 = vpop.permute.xlu1 %320  ;;  %197 = sbr.rel (!%p195_p5) target bundleno = 96 (0x60), region = 93 }
 0x10b   : > { %v316_v31 = vpop.permute.xlu0 %315  ;;  %v330_v32 = vmul.f32 %v321_v30, %v282_v29 }
 0x10c   : > { %v329_v34 = vmul.f32 %v316_v31, %v281_v28 }
 0x10d   : > { %1860 = vst.msk [vmem:[%s2737_s13 + $0x531] sm:$0x7f] %vm335_vm4, %v330_v32 }
 0x10e   : > { %1859 = vst.msk [vmem:[%s2737_s13 + $0x529] sm:$0xff] %vm36_vm0, %v329_v34 }
 0x10f LB: > { %4608 = sst [smem:[#allocation6_spill]] %s2352_s14  ;;  %v2357_v33 = vmov 0   ;;  %s2782_s17 = sshll.u32 %s2352_s14, 4  ;;  %s2352_s14 = sphi %s2772_s14, %s417_s14  }
 0x110   : > { %s2777_s15 = sld [smem:[#allocation3 + $0x24]]  ;;  %2323 = vset.pattern.permute.xlu1 %v2357_v33  ;;  %2322 = vset.pattern.permute.xlu0 %v2357_v33  ;;  %s437_s1 = smul.u32 24, %s2352_s14 }
 0x111   : > { %s2779_s16 = sld [smem:[#allocation3 + $0x25]] }
 0x112   : > { %4609 = sst [smem:[#allocation7_spill]] %s2782_s17  ;;  %s2799_s21 = scalar_lea.vmem [#allocation2], %s437_s1 }
 0x113   : > { %s4610_s4 = sld [smem:[#allocation30_spill]] }
 0x114   : > { %s2797_s20 = sld [smem:[#allocation3 + $0x26]] }
 0x115   : > { %v2802_v41 = vld [vmem:[%s2799_s21] sm:$0xff]  ;;  %s2807_s22 = sld [smem:[#allocation3 + $0x27]]  ;;  %v2826_v50 = vld [vmem:[%s2799_s21 + $0x18] sm:$0xff]  ;;  %v2855_v62 = vld [vmem:[%s2799_s21 + $0x30] sm:$0xff] }
 0x116   : > { %v789_v39 = vstv %s2777_s15  ;;  %v2805_v42 = vld [vmem:[%s2799_s21 + $0x1] sm:$0xff]  ;;  %s2815_s23 = sld [smem:[#allocation3 + $0x28]]  ;;  %v2834_v54 = vld [vmem:[%s2799_s21 + $0x19] sm:$0xff]  ;;  %v2864_v4 = vld [vmem:[%s2799_s21 + $0x31] sm:$0xff] }
 0x117   : > { %v797_v40 = vstv %s2779_s16  ;;  %v790_v45 = vmul.f32 %v789_v39, %v2802_v41  ;;  %v2818_v47 = vld [vmem:[%s2799_s21 + $0x2] sm:$0xff]  ;;  %s2820_s24 = sld [smem:[#allocation3 + $0x29]]  ;;  %v2846_v56 = vld [vmem:[%s2799_s21 + $0x1a] sm:$0xff]  ;;  %v2874_v9 = vld [vmem:[%s2799_s21 + $0x32] sm:$0xff] }
 0x118   : > { %v798_v46 = vmul.f32 %v797_v40, %v2805_v42  ;;  %s2822_s25 = sld [smem:[#allocation3 + $0x2a]]  ;;  %v788_v11 = vld [vmem:[%s2799_s21 + $0x8] sm:$0x7f]  ;;  %v2887_v18 = vld [vmem:[%s2799_s21 + $0x1b0] sm:$0xff]  ;;  %v1972_v22 = vld [vmem:[%s2799_s21 + $0x20] sm:$0x7f] }
 0x119   : > { %s2789_s19 = scalar_lea.vmem %s4610_s4, %s2782_s17  ;;  %s2828_s5 = sld [smem:[#allocation3 + $0x2b]]  ;;  %v791_v15 = vmul.f32 %v789_v39, %v788_v11  ;;  %v796_v16 = vld [vmem:[%s2799_s21 + $0x9] sm:$0x7f]  ;;  %v1975_v25 = vld [vmem:[%s2799_s21 + $0x21] sm:$0x7f]  ;;  %v2900_v26 = vld [vmem:[%s2799_s21 + $0x1b1] sm:$0xff] }
 0x11a   : > { %v2070_v35 = vld [vmem:[%s2789_s19 + $0x100] sm:$0xff]  ;;  %v2071_v37 = vld [vmem:[%s2789_s19 + $0x108] sm:$0x7f]  ;;  %v800_v48 = vadd.f32 %v798_v46, %v790_v45  ;;  %v805_v49 = vstv %s2797_s20  ;;  %s2836_s26 = sld [smem:[#allocation3 + $0x2c]]  ;;  %v799_v20 = vmul.f32 %v797_v40, %v796_v16  ;;  %v1990_v11 = vld [vmem:[%s2799_s21 + $0x1b8] sm:$0x7f] }
 0x11b   : > { %v751_v36 = vld [vmem:[%s2789_s19] sm:$0xff]  ;;  %1080 = vperm.xlu1 %2323, %v2070_v35   ;;  %v752_v38 = vld [vmem:[%s2789_s19 + $0x8] sm:$0x7f]  ;;  %v806_v53 = vmul.f32 %v805_v49, %v2818_v47  ;;  %s4611_s3 = sld [smem:[#allocation29_spill]]  ;;  %v813_v55 = vstv %s2807_s22  ;;  %v2912_v35 = vld [vmem:[%s2799_s21 + $0x1b2] sm:$0xff] }
 0x11c   : > { %755 = vperm.xlu0 %2322, %v751_v36   ;;  %v2182_v43 = vld [vmem:[%s2789_s19 + $0x208] sm:$0x7f]  ;;  %v2181_v44 = vld [vmem:[%s2789_s19 + $0x200] sm:$0xff]  ;;  %s2848_s30 = sld [smem:[#allocation3 + $0x2d]]  ;;  %v814_v58 = vmul.f32 %v2826_v50, %v813_v55  ;;  %v821_v59 = vstv %s2815_s23  ;;  %v801_v28 = vadd.f32 %v799_v20, %v791_v15  ;;  %v815_v29 = vmul.f32 %v1972_v22, %v813_v55  ;;  %v1984_v55 = vld [vmem:[%s2799_s21 + $0x39] sm:$0x7f] }
 0x11d   : > { %v2293_v51 = vld [vmem:[%s2789_s19 + $0x308] sm:$0x7f]  ;;  %v2292_v52 = vld [vmem:[%s2789_s19 + $0x300] sm:$0xff]  ;;  %v808_v57 = vadd.f32 %v806_v53, %v800_v48  ;;  %v822_v60 = vmul.f32 %v2834_v54, %v821_v59  ;;  %v829_v61 = vstv %s2820_s24  ;;  %s2857_s7 = sld [smem:[#allocation3 + $0x2e]] }
 0x11e   : > { %v830_v2 = vmul.f32 %v2846_v56, %v829_v61  ;;  %v837_v3 = vstv %s2822_s25  ;;  %s2867_s8 = sld [smem:[#allocation3 + $0x2f]]  ;;  %v804_v17 = vld [vmem:[%s2799_s21 + $0xa] sm:$0x7f]  ;;  %v1978_v33 = vld [vmem:[%s2799_s21 + $0x22] sm:$0x7f] }
 0x11f   : > { %1085 = vperm.xlu1 %2323, %v2071_v37   ;;  %v816_v1 = vadd.f32 %v814_v58, %v808_v57  ;;  %v845_v5 = vstv %s2828_s5  ;;  %v838_v8 = vmul.f32 %v2855_v62, %v837_v3  ;;  %s2877_s9 = sld [smem:[#allocation3 + $0x30]]  ;;  %v807_v21 = vmul.f32 %v805_v49, %v804_v17  ;;  %v2934_v57 = vld [vmem:[%s2799_s21 + $0x1c9] sm:$0xff]  ;;  %v1993_v17 = vld [vmem:[%s2799_s21 + $0x1b9] sm:$0x7f]  ;;  %v2974_v20 = vld [vmem:[%s2799_s21 + $0x1e1] sm:$0xff] }
 0x120   : > { %760 = vperm.xlu0 %2322, %v752_v38   ;;  %v853_v10 = vstv %s2836_s26  ;;  %v846_v14 = vmul.f32 %v2864_v4, %v845_v5  ;;  %s2890_s10 = sld [smem:[#allocation3 + $0x31]]  ;;  %v823_v38 = vmul.f32 %v1975_v25, %v821_v59  ;;  %v831_v48 = vmul.f32 %v1978_v33, %v829_v61  ;;  %v1996_v25 = vld [vmem:[%s2799_s21 + $0x1ba] sm:$0x7f] }
 0x121   : > { %s2842_s29 = scalar_lea.vmem %s4611_s3, %s2782_s17  ;;  %v824_v7 = vadd.f32 %v822_v60, %v816_v1  ;;  %v854_v24 = vmul.f32 %v2874_v9, %v853_v10  ;;  %s2903_s11 = sld [smem:[#allocation3 + $0x32]]  ;;  %v809_v37 = vadd.f32 %v807_v21, %v801_v28  ;;  %v2946_v1 = vld [vmem:[%s2799_s21 + $0x1ca] sm:$0xff]  ;;  %v2988_v28 = vld [vmem:[%s2799_s21 + $0x1e2] sm:$0xff] }
 0x122   : > { %v767_v63 = vld [vmem:[%s2842_s29 + $0x8] sm:$0x7f]  ;;  %v766_v0 = vld [vmem:[%s2842_s29] sm:$0xff]  ;;  %v861_v19 = vstv %s2848_s30  ;;  %s2915_s12 = sld [smem:[#allocation3 + $0x33]] }
 0x123   : > { %1409 = vperm.xlu1 %2323, %v2182_v43   ;;  %v2074_v6 = vld [vmem:[%s2842_s29 + $0x108] sm:$0x7f]  ;;  %v2073_v12 = vld [vmem:[%s2842_s29 + $0x100] sm:$0xff]  ;;  %v832_v13 = vadd.f32 %v830_v2, %v824_v7  ;;  %v869_v27 = vstv %s2857_s7  ;;  %v862_v34 = vmul.f32 %v2887_v18, %v861_v19  ;;  %v1981_v43 = vld [vmem:[%s2799_s21 + $0x38] sm:$0x7f]  ;;  %s2925_s13 = sld [smem:[#allocation3 + $0x34]]  ;;  %v817_v46 = vadd.f32 %v815_v29, %v809_v37 }
 0x124   : > { %1404 = vperm.xlu0 %2322, %v2181_v44   ;;  %v2185_v30 = vld [vmem:[%s2842_s29 + $0x208] sm:$0x7f]  ;;  %v2184_v31 = vld [vmem:[%s2842_s29 + $0x200] sm:$0xff]  ;;  %v877_v36 = vstv %s2867_s8  ;;  %v870_v40 = vmul.f32 %v2900_v26, %v869_v27  ;;  %s2937_s15 = sld [smem:[#allocation3 + $0x35]]  ;;  %v839_v60 = vmul.f32 %v1981_v43, %v837_v3  ;;  %v847_v3 = vmul.f32 %v1984_v55, %v845_v5  ;;  %v2002_v43 = vld [vmem:[%s2799_s21 + $0x1d1] sm:$0x7f] }
 0x125   : > { %v840_v23 = vadd.f32 %v838_v8, %v832_v13  ;;  %v2922_v44 = vld [vmem:[%s2799_s21 + $0x1c8] sm:$0xff]  ;;  %v885_v45 = vstv %s2877_s9  ;;  %v878_v53 = vmul.f32 %v2912_v35, %v877_v36  ;;  %v825_v59 = vadd.f32 %v823_v38, %v817_v46  ;;  %s2949_s16 = sld [smem:[#allocation3 + $0x36]]  ;;  %v3002_v33 = vld [vmem:[%s2799_s21 + $0x360] sm:$0xff] }
 0x126   : > { %v2296_v49 = vld [vmem:[%s2842_s29 + $0x308] sm:$0x7f]  ;;  %v893_v58 = vstv %s2890_s10  ;;  %s2956_s1 = sld [smem:[#allocation3 + $0x37]] }
 0x127   : > { %1733 = vperm.xlu1 %2323, %v2293_v51   ;;  %v848_v32 = vadd.f32 %v846_v14, %v840_v23  ;;  %v2295_v51 = vld [vmem:[%s2842_s29 + $0x300] sm:$0xff]  ;;  %v901_v2 = vstv %s2903_s11  ;;  %v894_v8 = vmul.f32 %v2934_v57, %v893_v58  ;;  %s2963_s2 = sld [smem:[#allocation3 + $0x38]] }
 0x128   : > { %1728 = vperm.xlu0 %2322, %v2292_v52   ;;  %v909_v13 = vstv %s2915_s12  ;;  %v902_v16 = vmul.f32 %v2946_v1, %v901_v2  ;;  %s2970_s18 = sld [smem:[#allocation3 + $0x39]]  ;;  %v3016_v46 = vld [vmem:[%s2799_s21 + $0x361] sm:$0xff] }
 0x129   : > { %v856_v39 = vadd.f32 %v854_v24, %v848_v32  ;;  %v917_v21 = vstv %s2925_s13  ;;  %s2977_s19 = sld [smem:[#allocation3 + $0x3a]] }
 0x12a   : > { %s2984_s20 = sld [smem:[#allocation3 + $0x3b]]  ;;  %v925_v29 = vstv %s2937_s15  ;;  %v918_v32 = vmul.f32 %v2974_v20, %v917_v21 }
 0x12b   : > { %775 = vperm.xlu1 %2323, %v767_v63   ;;  %v864_v52 = vadd.f32 %v862_v34, %v856_v39  ;;  %v886_v63 = vmul.f32 %v2922_v44, %v885_v45  ;;  %s2991_s22 = sld [smem:[#allocation3 + $0x3c]]  ;;  %v1999_v34 = vld [vmem:[%s2799_s21 + $0x1d0] sm:$0x7f]  ;;  %v933_v37 = vstv %s2949_s16 }
 0x12c   : > { %770 = vperm.xlu0 %2322, %v766_v0   ;;  %v1987_v0 = vld [vmem:[%s2799_s21 + $0x3a] sm:$0x7f]  ;;  %s2998_s23 = sld [smem:[#allocation3 + $0x3d]] }
 0x12d   : > { %v872_v61 = vadd.f32 %v870_v40, %v864_v52  ;;  %v855_v5 = vmul.f32 %v1987_v0, %v853_v10  ;;  %v863_v10 = vmul.f32 %v1990_v11, %v861_v19  ;;  %v871_v19 = vmul.f32 %v1993_v17, %v869_v27  ;;  %s3005_s24 = sld [smem:[#allocation3 + $0x3e]] }
 0x12e   : > { %v879_v27 = vmul.f32 %v1996_v25, %v877_v36  ;;  %v926_v40 = vmul.f32 %v2988_v28, %v925_v29  ;;  %s3012_s25 = sld [smem:[#allocation3]]  ;;  %v887_v36 = vmul.f32 %v1999_v34, %v885_v45  ;;  %v934_v52 = vmul.f32 %v3002_v33, %v933_v37  ;;  %v2014_v34 = vld [vmem:[%s2799_s21 + $0x1ea] sm:$0x7f] }
 0x12f   : > { %1100 = vperm.xlu1 %2323, %v2074_v6   ;;  %v833_v6 = vadd.f32 %v831_v48, %v825_v59  ;;  %v880_v7 = vadd.f32 %v878_v53, %v872_v61  ;;  %v941_v48 = vstv %s2956_s1  ;;  %s3019_s5 = sld [smem:[#allocation3 + $0x1]]  ;;  %v3027_v53 = vld [vmem:[%s2799_s21 + $0x362] sm:$0xff]  ;;  %v949_v55 = vstv %s2963_s2  ;;  %v2005_v59 = vld [vmem:[%s2799_s21 + $0x1d2] sm:$0x7f] }
 0x130   : > { %1095 = vperm.xlu0 %2322, %v2073_v12   ;;  %v2960_v12 = vld [vmem:[%s2799_s21 + $0x1e0] sm:$0xff]  ;;  %s3030_s26 = sld [smem:[#allocation3 + $0x2]]  ;;  %v957_v61 = vstv %s2970_s18  ;;  %v965_v45 = vstv %s2977_s19  ;;  %v950_v11 = vmul.f32 %v3027_v53, %v949_v55 }
 0x131   : > { %v841_v14 = vadd.f32 %v839_v60, %v833_v6  ;;  %v888_v15 = vadd.f32 %v886_v63, %v880_v7  ;;  %v910_v24 = vmul.f32 %v2960_v12, %v909_v13  ;;  %v3034_v60 = vld [vmem:[%s2799_s21 + $0x378] sm:$0xff]  ;;  %s3041_s27 = sld [smem:[#allocation3 + $0x3]]  ;;  %v895_v6 = vmul.f32 %v2002_v43, %v893_v58 }
 0x132   : > { %v3038_v63 = vld [vmem:[%s2799_s21 + $0x379] sm:$0xff]  ;;  %v942_v7 = vmul.f32 %v3016_v46, %v941_v48  ;;  %s3048_s28 = sld [smem:[#allocation3 + $0x4]]  ;;  %v958_v17 = vmul.f32 %v3034_v60, %v957_v61 }
 0x133   : > { %1424 = vperm.xlu1 %2323, %v2185_v30   ;;  %v849_v22 = vadd.f32 %v847_v3, %v841_v14  ;;  %v896_v23 = vadd.f32 %v894_v8, %v888_v15  ;;  %v2008_v8 = vld [vmem:[%s2799_s21 + $0x1e8] sm:$0x7f]  ;;  %v3055_v14 = vld [vmem:[%s2799_s21 + $0x37a] sm:$0xff]  ;;  %s3058_s29 = sld [smem:[#allocation3 + $0x5]]  ;;  %v903_v15 = vmul.f32 %v2005_v59, %v901_v2 }
 0x134   : > { %1419 = vperm.xlu0 %2322, %v2184_v31   ;;  %s3069_s30 = sld [smem:[#allocation3 + $0x6]] }
 0x135   : > { %v857_v30 = vadd.f32 %v855_v5, %v849_v22  ;;  %v904_v31 = vadd.f32 %v902_v16, %v896_v23  ;;  %v973_v5 = vstv %s2984_s20  ;;  %v966_v22 = vmul.f32 %v3038_v63, %v965_v45  ;;  %v2011_v23 = vld [vmem:[%s2799_s21 + $0x1e9] sm:$0x7f]  ;;  %s3076_s7 = sld [smem:[#allocation3 + $0x7]] }
 0x136   : > { %v449_v2 = vstv %s3019_s5  ;;  %s3083_s8 = sld [smem:[#allocation3 + $0x3f]] }
 0x137   : > { %1748 = vperm.xlu1 %2323, %v2296_v49   ;;  %v865_v38 = vadd.f32 %v863_v10, %v857_v30  ;;  %v912_v39 = vadd.f32 %v910_v24, %v904_v31  ;;  %v441_v10 = vstv %s3012_s25  ;;  %v911_v30 = vmul.f32 %v2008_v8, %v909_v13  ;;  %s3094_s9 = sld [smem:[#allocation3 + $0x8]]  ;;  %v2020_v8 = vld [vmem:[%s2799_s21 + $0x369] sm:$0x7f] }
 0x138   : > { %1743 = vperm.xlu0 %2322, %v2295_v51   ;;  %v442_v24 = vmul.f32 %v2802_v41, %v441_v10  ;;  %v974_v31 = vmul.f32 %v3055_v14, %v973_v5  ;;  %v450_v41 = vmul.f32 %v2805_v42, %v449_v2  ;;  %v468_v13 = vstv %s3041_s27  ;;  %s3108_s10 = sld [smem:[#allocation3 + $0x9]] }
 0x139   : > { %v873_v49 = vadd.f32 %v871_v19, %v865_v38  ;;  %v920_v51 = vadd.f32 %v918_v32, %v912_v39  ;;  %v457_v32 = vstv %s3030_s26  ;;  %v919_v39 = vmul.f32 %v2011_v23, %v917_v21  ;;  %s3116_s11 = sld [smem:[#allocation3 + $0x40]]  ;;  %v2023_v23 = vld [vmem:[%s2799_s21 + $0x36a] sm:$0x7f] }
 0x13a   : > { %v458_v38 = vmul.f32 %v2818_v47, %v457_v32  ;;  %v452_v43 = vadd.f32 %v450_v41, %v442_v24  ;;  %v469_v42 = vmul.f32 %v2826_v50, %v468_v13  ;;  %v981_v47 = vstv %s2991_s22  ;;  %s3123_s12 = sld [smem:[#allocation3 + $0xa]] }
 0x13b   : > { %v881_v0 = vadd.f32 %v879_v27, %v873_v49  ;;  %v928_v3 = vadd.f32 %v926_v40, %v920_v51  ;;  %v476_v49 = vstv %s3048_s28  ;;  %v3104_v51 = vld [vmem:[%s2799_s21 + $0x390] sm:$0xff]  ;;  %v927_v21 = vmul.f32 %v2014_v34, %v925_v29  ;;  %s3130_s13 = sld [smem:[#allocation3 + $0x41]] }
 0x13c   : > { %v989_v50 = vstv %s2998_s23  ;;  %s3140_s15 = sld [smem:[#allocation3 + $0xb]]  ;;  %v997_v41 = vstv %s3005_s24 }
 0x13d   : > { %v889_v58 = vadd.f32 %v887_v36, %v881_v0  ;;  %v936_v16 = vadd.f32 %v934_v52, %v928_v3  ;;  %v2017_v36 = vld [vmem:[%s2799_s21 + $0x368] sm:$0x7f]  ;;  %v484_v52 = vstv %s3058_s29  ;;  %v460_v3 = vadd.f32 %v458_v38, %v452_v43  ;;  %s3148_s16 = sld [smem:[#allocation3 + $0x42]]  ;;  %v2026_v38 = vld [vmem:[%s2799_s21 + $0x380] sm:$0x7f] }
 0x13e   : > { %s3159_s1 = sld [smem:[#allocation3 + $0xc]] }
 0x13f   : > { %v897_v25 = vadd.f32 %v895_v6, %v889_v58  ;;  %v944_v19 = vadd.f32 %v942_v7, %v936_v16  ;;  %v3113_v6 = vld [vmem:[%s2799_s21 + $0x391] sm:$0xff]  ;;  %v477_v7 = vmul.f32 %v2834_v54, %v476_v49  ;;  %v935_v58 = vmul.f32 %v2017_v36, %v933_v37  ;;  %s3163_s3 = sld [smem:[#allocation3 + $0x43]]  ;;  %v2029_v36 = vld [vmem:[%s2799_s21 + $0x381] sm:$0x7f] }
 0x140   : > { %v982_v16 = vmul.f32 %v3104_v51, %v981_v47  ;;  %v471_v54 = vadd.f32 %v469_v42, %v460_v3  ;;  %v990_v24 = vmul.f32 %v3113_v6, %v989_v50  ;;  %v503_v37 = vstv %s3076_s7  ;;  %s3174_s2 = sld [smem:[#allocation3 + $0xd]] }
 0x141   : > { %v905_v27 = vadd.f32 %v903_v15, %v897_v25  ;;  %v952_v40 = vadd.f32 %v950_v11, %v944_v19  ;;  %v495_v11 = vstv %s3069_s30  ;;  %v943_v25 = vmul.f32 %v2020_v8, %v941_v48  ;;  %v3145_v19 = vld [vmem:[%s2799_s21 + $0x392] sm:$0xff]  ;;  %s3182_s4 = sld [smem:[#allocation3 + $0x44]] }
 0x142   : > { %v496_v34 = vmul.f32 %v2855_v62, %v495_v11  ;;  %v1005_v48 = vstv %s3083_s8  ;;  %v504_v62 = vmul.f32 %v2864_v4, %v503_v37  ;;  %v959_v3 = vmul.f32 %v2026_v38, %v957_v61  ;;  %s3189_s18 = sld [smem:[#allocation3 + $0xe]] }
 0x143   : > { %v913_v59 = vadd.f32 %v911_v30, %v905_v27  ;;  %v960_v0 = vadd.f32 %v958_v17, %v952_v40  ;;  %v485_v17 = vmul.f32 %v2846_v56, %v484_v52  ;;  %v479_v56 = vadd.f32 %v477_v7, %v471_v54  ;;  %v3155_v27 = vld [vmem:[%s2799_s21 + $0x510] sm:$0xff]  ;;  %v2032_v7 = vld [vmem:[%s2799_s21 + $0x382] sm:$0x7f]  ;;  %s3196_s14 = sld [smem:[#allocation3 + $0x45]] }
 0x144   : > { %v951_v40 = vmul.f32 %v2023_v23, %v949_v55  ;;  %v1006_v4 = vmul.f32 %v3155_v27, %v1005_v48  ;;  %v967_v54 = vmul.f32 %v2029_v36, %v965_v45  ;;  %v1013_v23 = vstv %s3116_s11  ;;  %s3208_s19 = sld [smem:[#allocation3 + $0xf]] }
 0x145   : > { %v921_v29 = vadd.f32 %v919_v39, %v913_v59  ;;  %v968_v15 = vadd.f32 %v966_v22, %v960_v0  ;;  %v487_v42 = vadd.f32 %v485_v17, %v479_v56  ;;  %v440_v59 = vld [vmem:[%s2799_s21 + $0x8] sm:$0x7f]  ;;  %v521_v0 = vstv %s3108_s10  ;;  %v3205_v56 = vld [vmem:[%s2799_s21 + $0x511] sm:$0xff]  ;;  %s3213_s25 = sld [smem:[#allocation3 + $0x46]] }
 0x146   : > { %v443_v17 = vmul.f32 %v441_v10, %v440_v59  ;;  %v537_v45 = vstv %s3140_s15  ;;  %v1021_v38 = vstv %s3130_s13  ;;  %s3223_s20 = sld [smem:[#allocation3 + $0x10]]  ;;  %v1014_v36 = vmul.f32 %v3205_v56, %v1013_v23 }
 0x147   : > { %v929_v22 = vadd.f32 %v927_v21, %v921_v29  ;;  %v976_v30 = vadd.f32 %v974_v31, %v968_v15  ;;  %v511_v31 = vstv %s3094_s9  ;;  %v998_v21 = vmul.f32 %v3145_v19, %v997_v41  ;;  %v448_v15 = vld [vmem:[%s2799_s21 + $0x9] sm:$0x7f]  ;;  %s3231_s5 = sld [smem:[#allocation3 + $0x47]] }
 0x148   : > { %v498_v29 = vadd.f32 %v496_v34, %v487_v42  ;;  %v451_v34 = vmul.f32 %v449_v2, %v448_v15  ;;  %v1029_v59 = vstv %s3148_s16  ;;  %s3241_s22 = sld [smem:[#allocation3 + $0x11]]  ;;  %v1037_v15 = vstv %s3163_s3 }
 0x149   : > { %v937_v39 = vadd.f32 %v935_v58, %v929_v22  ;;  %v984_v43 = vadd.f32 %v982_v16, %v976_v30  ;;  %v512_v58 = vmul.f32 %v2874_v9, %v511_v31  ;;  %v529_v16 = vstv %s3123_s12  ;;  %s3252_s6 = sld [smem:[#allocation3 + $0x12]] }
 0x14a   : > { %v522_v9 = vmul.f32 %v2887_v18, %v521_v0  ;;  %v975_v22 = vmul.f32 %v2032_v7, %v973_v5  ;;  %v530_v5 = vmul.f32 %v2900_v26, %v529_v16  ;;  %v3238_v7 = vld [vmem:[%s2799_s21 + $0x528] sm:$0xff]  ;;  %s3259_s26 = sld [smem:[#allocation3 + $0x13]] }
 0x14b   : > { %v945_v55 = vadd.f32 %v943_v25, %v937_v39  ;;  %v992_v8 = vadd.f32 %v990_v24, %v984_v43  ;;  %v506_v24 = vadd.f32 %v504_v62, %v498_v29  ;;  %v2035_v25 = vld [vmem:[%s2799_s21 + $0x398] sm:$0x7f]  ;;  %v456_v39 = vld [vmem:[%s2799_s21 + $0xa] sm:$0x7f]  ;;  %v547_v43 = vstv %s3159_s1  ;;  %s3290_s23 = sld [smem:[#allocation3 + $0x14]] }
 0x14c   : > { %4612 = sst [smem:[#allocation8_spill]] %s3223_s20  ;;  %v983_v42 = vmul.f32 %v2035_v25, %v981_v47  ;;  %v453_v62 = vadd.f32 %v451_v34, %v443_v17  ;;  %v555_v47 = vstv %s3174_s2  ;;  %v459_v29 = vmul.f32 %v457_v32, %v456_v39 }
 0x14d   : > { %v953_v61 = vadd.f32 %v951_v40, %v945_v55  ;;  %v1000_v30 = vadd.f32 %v998_v21, %v992_v8  ;;  %v514_v18 = vadd.f32 %v512_v58, %v506_v24  ;;  %v3220_v40 = vld [vmem:[%s2799_s21 + $0x512] sm:$0xff]  ;;  %v538_v21 = vmul.f32 %v2912_v35, %v537_v45  ;;  %s3297_s27 = sld [smem:[#allocation3 + $0x15]] }
 0x14e   : > { %v2038_v55 = vld [vmem:[%s2799_s21 + $0x399] sm:$0x7f]  ;;  %v1022_v58 = vmul.f32 %v3220_v40, %v1021_v38  ;;  %v4549_v32 = vstv %s3189_s18  ;;  %v4547_v39 = vstv %s3208_s19  ;;  %s3318_s24 = sld [smem:[#allocation3 + $0x16]] }
 0x14f   : > { %v961_v10 = vadd.f32 %v959_v3, %v953_v61  ;;  %v524_v26 = vadd.f32 %v522_v9, %v514_v18  ;;  %v1008_v3 = vadd.f32 %v1006_v4, %v1000_v30  ;;  %v548_v4 = vmul.f32 %v2922_v44, %v547_v43  ;;  %v1870_v61 = vld [vmem:[%s2799_s21 + $0x20] sm:$0x7f]  ;;  %v3272_v18 = vld [vmem:[%s2799_s21 + $0x52a] sm:$0xff]  ;;  %s3322_s0 = sld [smem:[#allocation3 + $0x17]] }
 0x150   : > { %v991_v24 = vmul.f32 %v2038_v55, %v989_v50  ;;  %v461_v9 = vadd.f32 %v459_v29, %v453_v62  ;;  %v1030_v44 = vmul.f32 %v3238_v7, %v1029_v59  ;;  %v556_v30 = vmul.f32 %v2934_v57, %v555_v47  ;;  %v3275_v50 = vld [vmem:[%s2799_s21 + $0x540] sm:$0xff]  ;;  %s3336_s17 = sld [smem:[#allocation3 + $0x18]] }
 0x151   : > { %v969_v2 = vadd.f32 %v967_v54, %v961_v10  ;;  %v532_v35 = vadd.f32 %v530_v5, %v524_v26  ;;  %v3256_v54 = vld [vmem:[%s2799_s21 + $0x529] sm:$0xff]  ;;  %v2041_v10 = vld [vmem:[%s2799_s21 + $0x39a] sm:$0x7f]  ;;  %v1016_v34 = vadd.f32 %v1014_v36, %v1008_v3  ;;  %v1053_v5 = vstv %s3196_s14  ;;  %v1873_v26 = vld [vmem:[%s2799_s21 + $0x21] sm:$0x7f]  ;;  %s3344_s28 = sld [smem:[#allocation3 + $0x19]] }
 0x152   : > { %v1061_v57 = vstv %s3213_s25  ;;  %v564_v36 = vmul.f32 %v2946_v1, %v4549_v32  ;;  %v4548_v55 = vstv %s3223_s20  ;;  %v999_v3 = vmul.f32 %v2041_v10, %v997_v41  ;;  %v2050_v10 = vld [vmem:[%s2799_s21 + $0x51a] sm:$0x7f]  ;;  %s3355_s8 = sld [smem:[#allocation3 + $0x1a]] }
 0x153   : > { %v977_v8 = vadd.f32 %v975_v22, %v969_v2  ;;  %v1045_v22 = vstv %s3182_s4  ;;  %v540_v25 = vadd.f32 %v538_v21, %v532_v35  ;;  %v470_v2 = vmul.f32 %v1870_v61, %v468_v13  ;;  %v3294_v21 = vld [vmem:[%s2799_s21 + $0x541] sm:$0xff]  ;;  %s3360_s20 = sld [smem:[#allocation3 + $0x1b]] }
 0x154   : > { %v3305_v1 = vmul.f32 %v3272_v18, %v1045_v22  ;;  %v3310_v35 = vmul.f32 %v3275_v50, %v1053_v5  ;;  %v574_v41 = vmul.f32 %v2960_v12, %v4547_v39  ;;  %v1876_v39 = vld [vmem:[%s2799_s21 + $0x22] sm:$0x7f]  ;;  %s3378_s11 = sld [smem:[#allocation3 + $0x1c]] }
 0x155   : > { %v985_v17 = vadd.f32 %v983_v42, %v977_v8  ;;  %v3284_v42 = vmul.f32 %v3256_v54, %v1037_v15  ;;  %v550_v62 = vadd.f32 %v548_v4, %v540_v25  ;;  %v2044_v8 = vld [vmem:[%s2799_s21 + $0x518] sm:$0x7f]  ;;  %v472_v29 = vadd.f32 %v470_v2, %v461_v9  ;;  %v3313_v4 = vld [vmem:[%s2799_s21 + $0x542] sm:$0xff]  ;;  %s3390_s3 = sld [smem:[#allocation3 + $0x1d]] }
 0x156   : > { %v4551_v9 = vstv %s3241_s22  ;;  %v2047_v25 = vld [vmem:[%s2799_s21 + $0x519] sm:$0x7f]  ;;  %v478_v2 = vmul.f32 %v1873_v26, %v476_v49  ;;  %v599_v49 = vstv %s3252_s6  ;;  %v607_v26 = vstv %s3259_s26  ;;  %s3397_s29 = sld [smem:[#allocation3 + $0x1e]] }
 0x157   : > { %v993_v13 = vadd.f32 %v991_v24, %v985_v17  ;;  %v558_v61 = vadd.f32 %v556_v30, %v550_v62  ;;  %v1024_v17 = vadd.f32 %v1022_v58, %v1016_v34  ;;  %v1069_v24 = vstv %s3231_s5  ;;  %v2053_v62 = vld [vmem:[%s2799_s21 + $0x530] sm:$0x7f]  ;;  %s3417_s4 = sld [smem:[#allocation3 + $0x48]] }
 0x158   : > { %v3331_v30 = vmul.f32 %v3294_v21, %v1061_v57  ;;  %v582_v58 = vmul.f32 %v2974_v20, %v4548_v55  ;;  %v1007_v34 = vmul.f32 %v2044_v8, %v1005_v48  ;;  %v480_v20 = vadd.f32 %v478_v2, %v472_v29  ;;  %v1879_v2 = vld [vmem:[%s2799_s21 + $0x38] sm:$0x7f]  ;;  %s3427_s14 = sld [smem:[#allocation3 + $0x49]] }
 0x159   : > { %v566_v12 = vadd.f32 %v564_v36, %v558_v61  ;;  %v1001_v36 = vadd.f32 %v999_v3, %v993_v13  ;;  %v2056_v61 = vld [vmem:[%s2799_s21 + $0x531] sm:$0x7f]  ;;  %v3350_v55 = vmul.f32 %v3313_v4, %v1069_v24  ;;  %v590_v8 = vmul.f32 %v2988_v28, %v4551_v9  ;;  %s3433_s30 = sld [smem:[#allocation3 + $0x4a]] }
 0x15a   : > { %v1015_v32 = vmul.f32 %v2047_v25, %v1013_v23  ;;  %v2059_v13 = vld [vmem:[%s2799_s21 + $0x532] sm:$0x7f]  ;;  %v1032_v3 = vadd.f32 %v1030_v44, %v1024_v17  ;;  %v1023_v29 = vmul.f32 %v2050_v10, %v1021_v38  ;;  %v486_v28 = vmul.f32 %v1876_v39, %v484_v52  ;;  %v2062_v52 = vld [vmem:[%s2799_s21 + $0x548] sm:$0x7f]  ;;  %s3440_s7 = sld [smem:[#allocation3 + $0x4b]] }
 0x15b   : > { %v576_v48 = vadd.f32 %v574_v41, %v566_v12  ;;  %v3366_v41 = vmul.f32 %v2053_v62, %v1029_v59  ;;  %v1882_v12 = vld [vmem:[%s2799_s21 + $0x39] sm:$0x7f]  ;;  %v600_v23 = vmul.f32 %v3002_v33, %v599_v49  ;;  %v608_v44 = vmul.f32 %v3016_v46, %v607_v26  ;;  %v2065_v59 = vld [vmem:[%s2799_s21 + $0x549] sm:$0x7f]  ;;  %s3445_s9 = sld [smem:[#allocation3 + $0x4c]] }
 0x15c   : > { %v3382_v38 = vmul.f32 %v2056_v61, %v1037_v15  ;;  %v615_v39 = vstv %s3290_s23  ;;  %v625_v17 = vstv %s3297_s27  ;;  %v1009_v25 = vadd.f32 %v1007_v34, %v1001_v36  ;;  %v1885_v33 = vld [vmem:[%s2799_s21 + $0x3a] sm:$0x7f]  ;;  %s3453_s10 = sld [smem:[#allocation3 + $0x1f]] }
 0x15d   : > { %v584_v9 = vadd.f32 %v582_v58, %v576_v48  ;;  %v488_v10 = vadd.f32 %v486_v28, %v480_v20  ;;  %v633_v46 = vstv %s3318_s24  ;;  %v497_v15 = vmul.f32 %v1879_v2, %v495_v11  ;;  %v1888_v20 = vld [vmem:[%s2799_s21 + $0x1b8] sm:$0x7f]  ;;  %s3464_s12 = sld [smem:[#allocation3 + $0x4d]] }
 0x15e   : > { %v505_v62 = vmul.f32 %v1882_v12, %v503_v37  ;;  %v1040_v61 = vadd.f32 %v3284_v42, %v1032_v3  ;;  %v3401_v34 = vmul.f32 %v2059_v13, %v1045_v22  ;;  %v3409_v36 = vmul.f32 %v2065_v59, %v1061_v57  ;;  %v1891_v13 = vld [vmem:[%s2799_s21 + $0x1b9] sm:$0x7f]  ;;  %v2068_v3 = vld [vmem:[%s2799_s21 + $0x54a] sm:$0x7f]  ;;  %s3482_s13 = sld [smem:[#allocation3 + $0x20]] }
 0x15f   : > { %v592_v58 = vadd.f32 %v590_v8, %v584_v9  ;;  %v3405_v9 = vmul.f32 %v2062_v52, %v1053_v5  ;;  %v616_v37 = vmul.f32 %v3027_v53, %v615_v39  ;;  %v499_v42 = vadd.f32 %v497_v15, %v488_v10  ;;  %4613 = sst [smem:[#allocation9_spill]] %s3433_s30 }
 0x160   : > { %v513_v48 = vmul.f32 %v1885_v33, %v511_v31  ;;  %v626_v22 = vmul.f32 %v3034_v60, %v625_v17  ;;  %v634_v5 = vmul.f32 %v3038_v63, %v633_v46  ;;  %v641_v57 = vstv %s3322_s0  ;;  %s3490_s15 = sld [smem:[#allocation3 + $0x4e]] }
 0x161   : > { %v602_v11 = vadd.f32 %v600_v23, %v592_v58  ;;  %v1017_v8 = vadd.f32 %v1015_v32, %v1009_v25  ;;  %v651_v31 = vstv %s3336_s17  ;;  %v507_v28 = vadd.f32 %v505_v62, %v499_v42  ;;  %v1894_v23 = vld [vmem:[%s2799_s21 + $0x1ba] sm:$0x7f]  ;;  %v1897_v58 = vld [vmem:[%s2799_s21 + $0x1d0] sm:$0x7f]  ;;  %s3506_s16 = sld [smem:[#allocation3 + $0x4f]] }
 0x162   : > { %v523_v2 = vmul.f32 %v1888_v20, %v521_v0  ;;  %v1048_v60 = vadd.f32 %v3305_v1, %v1040_v61  ;;  %v659_v63 = vstv %s3344_s28  ;;  %v667_v32 = vstv %s3355_s8  ;;  %v1112_v20 = vld [vmem:[%s2799_s21 + $0x8] sm:$0x7f]  ;;  %v1903_v42 = vld [vmem:[%s2799_s21 + $0x1d2] sm:$0x7f]  ;;  %s3508_s1 = sld [smem:[#allocation3 + $0x21]] }
 0x163   : > { %v610_v53 = vadd.f32 %v608_v44, %v602_v11  ;;  %v677_v12 = vstv %s3360_s20  ;;  %v685_v52 = vstv %s3378_s11  ;;  %v515_v59 = vadd.f32 %v513_v48, %v507_v28  ;;  %s3521_s2 = sld [smem:[#allocation3 + $0x50]] }
 0x164   : > { %v531_v0 = vmul.f32 %v1891_v13, %v529_v16  ;;  %v642_v1 = vmul.f32 %v3055_v14, %v641_v57  ;;  %v652_v25 = vmul.f32 %v3104_v51, %v651_v31  ;;  %v1025_v10 = vadd.f32 %v1023_v29, %v1017_v8  ;;  %v1900_v14 = vld [vmem:[%s2799_s21 + $0x1d1] sm:$0x7f]  ;;  %s4616_s25 = sld [smem:[#allocation8_spill]] }
 0x165   : > { %v618_v44 = vadd.f32 %v616_v37, %v610_v53  ;;  %v3457_v33 = vmul.f32 %v2068_v3, %v1069_v24  ;;  %v693_v15 = vstv %s3390_s3  ;;  %v525_v62 = vadd.f32 %v523_v2, %v515_v59  ;;  %v2083_v3 = vld [vmem:[%s2799_s21 + $0x20] sm:$0x7f]  ;;  %s3534_s5 = sld [smem:[#allocation3 + $0x51]] }
 0x166   : > { %v539_v61 = vmul.f32 %v1894_v23, %v537_v45  ;;  %v660_v51 = vmul.f32 %v3113_v6, %v659_v63  ;;  %v668_v24 = vmul.f32 %v3145_v19, %v667_v32  ;;  %v3475_v29 = vmul.f32 %v3155_v27, %v677_v12  ;;  %v1120_v27 = vld [vmem:[%s2799_s21 + $0x9] sm:$0x7f]  ;;  %s3597_s6 = sld [smem:[#allocation3 + $0x55]] }
 0x167   : > { %v628_v16 = vadd.f32 %v626_v22, %v618_v44  ;;  %v3480_v45 = vmul.f32 %v3205_v56, %v685_v52  ;;  %v1056_v6 = vadd.f32 %v3310_v35, %v1048_v60  ;;  %v533_v37 = vadd.f32 %v531_v0, %v525_v62  ;;  %4614 = sst [smem:[#allocation10_spill]] %s3506_s16  ;;  %v2086_v0 = vld [vmem:[%s2799_s21 + $0x21] sm:$0x7f] }
 0x168   : > { %v549_v19 = vmul.f32 %v1897_v58, %v547_v43  ;;  %v3495_v56 = vmul.f32 %v3220_v40, %v693_v15  ;;  %v1033_v35 = vadd.f32 %v3366_v41, %v1025_v10  ;;  %v557_v48 = vmul.f32 %v1900_v14, %v555_v47  ;;  %v1128_v43 = vld [vmem:[%s2799_s21 + $0xa] sm:$0x7f]  ;;  %s3612_s26 = sld [smem:[#allocation3 + $0x57]] }
 0x169   : > { %v636_v11 = vadd.f32 %v634_v5, %v628_v16  ;;  %v1113_v22 = vstv %s3417_s4  ;;  %v541_v8 = vadd.f32 %v539_v61, %v533_v37  ;;  %v1121_v53 = vstv %s3427_s14  ;;  %v1906_v41 = vld [vmem:[%s2799_s21 + $0x1e8] sm:$0x7f]  ;;  %s3627_s23 = sld [smem:[#allocation3 + $0x58]] }
 0x16a   : > { %v1115_v13 = vmul.f32 %v1113_v22, %v1112_v20  ;;  %v4615_v40 = vstv %s3189_s18  ;;  %v1123_v28 = vmul.f32 %v1121_v53, %v1120_v27  ;;  %v1129_v2 = vstv %s3433_s30  ;;  %s3525_s18 = sld [smem:[#allocation3 + $0x22]]  ;;  %v1909_v16 = vld [vmem:[%s2799_s21 + $0x1e9] sm:$0x7f]  ;;  %v2089_v37 = vld [vmem:[%s2799_s21 + $0x22] sm:$0x7f] }
 0x16b   : > { %v644_v5 = vadd.f32 %v642_v1, %v636_v11  ;;  %v565_v47 = vmul.f32 %v1903_v42, %v4615_v40  ;;  %v1137_v60 = vstv %s3440_s7  ;;  %v551_v44 = vadd.f32 %v549_v19, %v541_v8  ;;  %s3537_s30 = sld [smem:[#allocation3 + $0x23]]  ;;  %v2092_v40 = vld [vmem:[%s2799_s21 + $0x38] sm:$0x7f] }
 0x16c   : > { %v1131_v59 = vmul.f32 %v1129_v2, %v1128_v43  ;;  %v1145_v1 = vstv %s3445_s9  ;;  %v703_v10 = vstv %s3397_s29  ;;  %v711_v58 = vstv %s3453_s10  ;;  %v1912_v43 = vld [vmem:[%s2799_s21 + $0x1ea] sm:$0x7f]  ;;  %s3647_s27 = sld [smem:[#allocation3 + $0x59]] }
 0x16d   : > { %v654_v23 = vadd.f32 %v652_v25, %v644_v5  ;;  %v1125_v62 = vadd.f32 %v1123_v28, %v1115_v13  ;;  %v1139_v25 = vmul.f32 %v2083_v3, %v1137_v60  ;;  %v559_v14 = vadd.f32 %v557_v48, %v551_v44  ;;  %v1915_v28 = vld [vmem:[%s2799_s21 + $0x368] sm:$0x7f]  ;;  %s3655_s24 = sld [smem:[#allocation3 + $0x5a]] }
 0x16e   : > { %v4617_v20 = vstv %s3208_s19  ;;  %v1153_v19 = vstv %s3464_s12  ;;  %v719_v42 = vstv %s3482_s13  ;;  %v1041_v27 = vadd.f32 %v3382_v38, %v1033_v35  ;;  %s3547_s19 = sld [smem:[#allocation3 + $0x52]] }
 0x16f   : > { %v662_v61 = vadd.f32 %v660_v51, %v654_v23  ;;  %v575_v11 = vmul.f32 %v1906_v41, %v4617_v20  ;;  %v1133_v51 = vadd.f32 %v1131_v59, %v1125_v62  ;;  %v1147_v48 = vmul.f32 %v2086_v0, %v1145_v1  ;;  %v1918_v62 = vld [vmem:[%s2799_s21 + $0x369] sm:$0x7f]  ;;  %s3667_s0 = sld [smem:[#allocation3 + $0x5b]] }
 0x170   : > { %v567_v8 = vadd.f32 %v565_v47, %v559_v14  ;;  %v4618_v13 = vstv %s4616_s25  ;;  %v1161_v41 = vstv %s3490_s15  ;;  %v1064_v38 = vadd.f32 %v3331_v30, %v1056_v6  ;;  %v2095_v30 = vld [vmem:[%s2799_s21 + $0x39] sm:$0x7f]  ;;  %s3567_s25 = sld [smem:[#allocation3 + $0x53]] }
 0x171   : > { %v670_v5 = vadd.f32 %v668_v24, %v662_v61  ;;  %v583_v3 = vmul.f32 %v1909_v16, %v4618_v13  ;;  %v3553_v35 = vmul.f32 %v3238_v7, %v703_v10  ;;  %v1141_v23 = vadd.f32 %v1139_v25, %v1133_v51  ;;  %s3680_s17 = sld [smem:[#allocation3 + $0x5c]] }
 0x172   : > { %v1155_v24 = vmul.f32 %v2089_v37, %v1153_v19  ;;  %v3561_v47 = vmul.f32 %v3256_v54, %v711_v58  ;;  %v577_v44 = vadd.f32 %v575_v11, %v567_v8  ;;  %v4619_v59 = vstv %s3241_s22  ;;  %v2098_v11 = vld [vmem:[%s2799_s21 + $0x3a] sm:$0x7f]  ;;  %s3583_s22 = sld [smem:[#allocation3 + $0x54]] }
 0x173   : > { %v591_v0 = vmul.f32 %v1912_v43, %v4619_v59  ;;  %v1169_v6 = vstv %s3506_s16  ;;  %v3572_v7 = vmul.f32 %v3272_v18, %v719_v42  ;;  %v1049_v16 = vadd.f32 %v3401_v34, %v1041_v27  ;;  %v1921_v27 = vld [vmem:[%s2799_s21 + $0x36a] sm:$0x7f]  ;;  %s3604_s16 = sld [smem:[#allocation3 + $0x56]] }
 0x174   : > { %v1149_v54 = vadd.f32 %v1147_v48, %v1141_v23  ;;  %v1163_v25 = vmul.f32 %v2092_v40, %v1161_v41  ;;  %v680_v61 = vadd.f32 %v3475_v29, %v670_v5  ;;  %v585_v14 = vadd.f32 %v583_v3, %v577_v44  ;;  %v2101_v5 = vld [vmem:[%s2799_s21 + $0x1b8] sm:$0x7f]  ;;  %v1924_v3 = vld [vmem:[%s2799_s21 + $0x380] sm:$0x7f]  ;;  %s3693_s20 = sld [smem:[#allocation3 + $0x5d]] }
 0x175   : > { %v601_v20 = vmul.f32 %v1915_v28, %v599_v49  ;;  %v1177_v18 = vstv %s3521_s2  ;;  %v3586_v34 = vadd.f32 %v3350_v55, %v1064_v38  ;;  %v729_v37 = vstv %s3508_s1  ;;  %s3703_s28 = sld [smem:[#allocation3 + $0x5e]] }
 0x176   : > { %v1157_v43 = vadd.f32 %v1155_v24, %v1149_v54  ;;  %v1171_v51 = vmul.f32 %v2095_v30, %v1169_v6  ;;  %v737_v29 = vstv %s3525_s18  ;;  %v593_v48 = vadd.f32 %v591_v0, %v585_v14  ;;  %v1927_v24 = vld [vmem:[%s2799_s21 + $0x381] sm:$0x7f]  ;;  %v1933_v54 = vld [vmem:[%s2799_s21 + $0x398] sm:$0x7f]  ;;  %s3711_s8 = sld [smem:[#allocation3 + $0x5f]] }
 0x177   : > { %v609_v49 = vmul.f32 %v1918_v62, %v607_v26  ;;  %v1185_v8 = vstv %s3534_s5  ;;  %v745_v55 = vstv %s3537_s30  ;;  %v1057_v13 = vadd.f32 %v3405_v9, %v1049_v16  ;;  %v2104_v9 = vld [vmem:[%s2799_s21 + $0x1b9] sm:$0x7f]  ;;  %v1930_v0 = vld [vmem:[%s2799_s21 + $0x382] sm:$0x7f]  ;;  %s3725_s11 = sld [smem:[#allocation3 + $0x60]] }
 0x178   : > { %v1165_v40 = vadd.f32 %v1163_v25, %v1157_v43  ;;  %v1179_v38 = vmul.f32 %v2098_v11, %v1177_v18  ;;  %v688_v26 = vadd.f32 %v3480_v45, %v680_v61  ;;  %v603_v28 = vadd.f32 %v601_v20, %v593_v48  ;;  %v2107_v25 = vld [vmem:[%s2799_s21 + $0x1ba] sm:$0x7f]  ;;  %s3743_s3 = sld [smem:[#allocation3 + $0x61]] }
 0x179   : > { %v617_v23 = vmul.f32 %v1921_v27, %v615_v39  ;;  %v1193_v44 = vstv %s3547_s19  ;;  %v3617_v59 = vmul.f32 %v3275_v50, %v729_v37  ;;  %v3622_v45 = vmul.f32 %v3294_v21, %v737_v29  ;;  %v1936_v21 = vld [vmem:[%s2799_s21 + $0x399] sm:$0x7f]  ;;  %s3755_s10 = sld [smem:[#allocation3 + $0x62]] }
 0x17a   : > { %v1173_v39 = vadd.f32 %v1171_v51, %v1165_v40  ;;  %v1187_v30 = vmul.f32 %v2101_v5, %v1185_v8  ;;  %v3632_v16 = vmul.f32 %v3313_v4, %v745_v55  ;;  %v611_v62 = vadd.f32 %v609_v49, %v603_v28  ;;  %v1939_v4 = vld [vmem:[%s2799_s21 + $0x39a] sm:$0x7f]  ;;  %v2113_v28 = vld [vmem:[%s2799_s21 + $0x1d1] sm:$0x7f]  ;;  %s3763_s13 = sld [smem:[#allocation3 + $0x63]] }
 0x17b   : > { %v627_v50 = vmul.f32 %v1924_v3, %v625_v17  ;;  %v1201_v61 = vstv %s3567_s25  ;;  %v1065_v14 = vadd.f32 %v3409_v36, %v1057_v13  ;;  %v635_v20 = vmul.f32 %v1927_v24, %v633_v46  ;;  %v1942_v11 = vld [vmem:[%s2799_s21 + $0x518] sm:$0x7f]  ;;  %v2110_v46 = vld [vmem:[%s2799_s21 + $0x1d0] sm:$0x7f]  ;;  %s3774_s1 = sld [smem:[#allocation3 + $0x64]] }
 0x17c   : > { %v1181_v27 = vadd.f32 %v1179_v38, %v1173_v39  ;;  %v1195_v17 = vmul.f32 %v2104_v9, %v1193_v44  ;;  %v696_v43 = vadd.f32 %v3495_v56, %v688_v26  ;;  %v619_v51 = vadd.f32 %v617_v23, %v611_v62  ;;  %v1945_v48 = vld [vmem:[%s2799_s21 + $0x519] sm:$0x7f]  ;;  %v1951_v3 = vld [vmem:[%s2799_s21 + $0x530] sm:$0x7f]  ;;  %s3785_s4 = sld [smem:[#allocation3 + $0x65]] }
 0x17d   : > { %v643_v36 = vmul.f32 %v1930_v0, %v641_v57  ;;  %v1209_v49 = vstv %s3583_s22  ;;  %v653_v5 = vmul.f32 %v1933_v54, %v651_v31  ;;  %v3661_v13 = vmul.f32 %v1936_v21, %v659_v63  ;;  %v1948_v56 = vld [vmem:[%s2799_s21 + $0x51a] sm:$0x7f]  ;;  %v1954_v63 = vld [vmem:[%s2799_s21 + $0x531] sm:$0x7f]  ;;  %s3804_s14 = sld [smem:[#allocation3 + $0x66]] }
 0x17e   : > { %v1189_v40 = vadd.f32 %v1187_v30, %v1181_v27  ;;  %v1203_v57 = vmul.f32 %v2107_v25, %v1201_v61  ;;  %v629_v38 = vadd.f32 %v627_v50, %v619_v51  ;;  %v3671_v26 = vmul.f32 %v1939_v4, %v667_v32  ;;  %v1957_v32 = vld [vmem:[%s2799_s21 + $0x532] sm:$0x7f]  ;;  %v3731_v51 = vld [vmem:[%s2799_s21 + $0x1] sm:$0xff]  ;;  %s3818_s30 = sld [smem:[#allocation3 + $0x67]] }
 0x17f   : > { %v3675_v31 = vmul.f32 %v1942_v11, %v677_v12  ;;  %v1217_v23 = vstv %s3597_s6  ;;  %v3683_v24 = vadd.f32 %v3457_v33, %v1065_v14  ;;  %v3687_v9 = vmul.f32 %v1945_v48, %v685_v52  ;;  %v1960_v12 = vld [vmem:[%s2799_s21 + $0x548] sm:$0x7f]  ;;  %v2116_v50 = vld [vmem:[%s2799_s21 + $0x1d2] sm:$0x7f]  ;;  %4621 = sst [smem:[#allocation8_spill]] %s3755_s10 }
 0x180   : > { %v1197_v0 = vadd.f32 %v1195_v17, %v1189_v40  ;;  %v1211_v39 = vmul.f32 %v2110_v46, %v1209_v49  ;;  %v706_v30 = vadd.f32 %v3553_v35, %v696_v43  ;;  %v637_v33 = vadd.f32 %v635_v20, %v629_v38  ;;  %v1963_v52 = vld [vmem:[%s2799_s21 + $0x549] sm:$0x7f]  ;;  %v3728_v43 = vld [vmem:[%s2799_s21] sm:$0xff]  ;;  %v3758_v40 = vld [vmem:[%s2799_s21 + $0x18] sm:$0xff]  ;;  %s3825_s7 = sld [smem:[#allocation3 + $0x68]] }
 0x181   : > { %v3698_v62 = vmul.f32 %v1948_v56, %v693_v15  ;;  %v1225_v54 = vstv %s3604_s16  ;;  %v1219_v25 = vmul.f32 %v2113_v28, %v1217_v23  ;;  %v2119_v35 = vld [vmem:[%s2799_s21 + $0x1e8] sm:$0x7f]  ;;  %v1233_v14 = vstv %s3612_s26  ;;  %4622 = sst [smem:[#allocation9_spill]] %s3774_s1 }
 0x182   : > { %v1205_v21 = vadd.f32 %v1203_v57, %v1197_v0  ;;  %v2122_v20 = vld [vmem:[%s2799_s21 + $0x1e9] sm:$0x7f]  ;;  %v1241_v4 = vstv %s3627_s23  ;;  %v645_v15 = vadd.f32 %v643_v36, %v637_v33  ;;  %v3715_v11 = vmul.f32 %v1951_v3, %v703_v10  ;;  %4623 = sst [smem:[#allocation11_spill]] %s3785_s4 }
 0x183   : > { %v3719_v27 = vmul.f32 %v1954_v63, %v711_v58  ;;  %v3723_v17 = vmul.f32 %v1957_v32, %v719_v42  ;;  %v3735_v36 = vmul.f32 %v1960_v12, %v729_v37  ;;  %v3739_v10 = vmul.f32 %v1963_v52, %v737_v29  ;;  %v3746_v48 = vld [vmem:[%s2799_s21 + $0x2] sm:$0xff]  ;;  %v1966_v56 = vld [vmem:[%s2799_s21 + $0x54a] sm:$0x7f]  ;;  %v3780_v52 = vld [vmem:[%s2799_s21 + $0x19] sm:$0xff]  ;;  %s3841_s9 = sld [smem:[#allocation3 + $0x6c]] }
 0x184   : > { %v1213_v58 = vadd.f32 %v1211_v39, %v1205_v21  ;;  %v1227_v42 = vmul.f32 %v2116_v50, %v1225_v54  ;;  %v714_v46 = vadd.f32 %v3561_v47, %v706_v30  ;;  %v1235_v37 = vmul.f32 %v2119_v35, %v1233_v14  ;;  %v2125_v38 = vld [vmem:[%s2799_s21 + $0x1ea] sm:$0x7f]  ;;  %s3849_s18 = sld [smem:[#allocation3 + $0x6d]] }
 0x185   : > { %v1243_v29 = vmul.f32 %v2122_v20, %v1241_v4  ;;  %v1249_v3 = vstv %s3647_s27  ;;  %v2128_v47 = vld [vmem:[%s2799_s21 + $0x368] sm:$0x7f]  ;;  %v1257_v63 = vstv %s3655_s24  ;;  %v1114_v28 = vmul.f32 %v1113_v22, %v3728_v43  ;;  %s3862_s15 = sld [smem:[#allocation3 + $0x6e]] }
 0x186   : > { %v1221_v57 = vadd.f32 %v1219_v25, %v1213_v58  ;;  %v1122_v32 = vmul.f32 %v1121_v53, %v3731_v51  ;;  %v655_v12 = vadd.f32 %v653_v5, %v645_v15  ;;  %v2131_v0 = vld [vmem:[%s2799_s21 + $0x369] sm:$0x7f]  ;;  %v1265_v39 = vstv %s3667_s0  ;;  %v2137_v53 = vld [vmem:[%s2799_s21 + $0x380] sm:$0x7f]  ;;  %s3870_s29 = sld [smem:[#allocation3 + $0x6f]] }
 0x187   : > { %v4557_v30 = vstv %s3680_s17  ;;  %v1130_v33 = vmul.f32 %v1129_v2, %v3746_v48  ;;  %v2134_v50 = vld [vmem:[%s2799_s21 + $0x36a] sm:$0x7f]  ;;  %v4555_v5 = vstv %s3693_s20  ;;  %v1138_v25 = vmul.f32 %v3758_v40, %v1137_v60  ;;  %v3800_v58 = vld [vmem:[%s2799_s21 + $0x1a] sm:$0xff]  ;;  %s3888_s12 = sld [smem:[#allocation3 + $0x70]] }
 0x188   : > { %v1229_v22 = vadd.f32 %v1227_v42, %v1221_v57  ;;  %v1124_v21 = vadd.f32 %v1122_v32, %v1114_v28  ;;  %v722_v35 = vadd.f32 %v3572_v7, %v714_v46  ;;  %v3793_v2 = vmul.f32 %v1966_v56, %v745_v55  ;;  %v2140_v57 = vld [vmem:[%s2799_s21 + $0x381] sm:$0x7f]  ;;  %s3916_s2 = sld [smem:[#allocation3 + $0x69]] }
 0x189   : > { %v1251_v20 = vmul.f32 %v2125_v38, %v1249_v3  ;;  %v1259_v15 = vmul.f32 %v2128_v47, %v1257_v63  ;;  %v4554_v28 = vstv %s3703_s28  ;;  %v1146_v7 = vmul.f32 %v3780_v52, %v1145_v1  ;;  %v3821_v38 = vld [vmem:[%s2799_s21 + $0x30] sm:$0xff]  ;;  %v2143_v1 = vld [vmem:[%s2799_s21 + $0x382] sm:$0x7f]  ;;  %s3947_s5 = sld [smem:[#allocation3 + $0x73]] }
 0x18a   : > { %v1237_v42 = vadd.f32 %v1235_v37, %v1229_v22  ;;  %v1132_v60 = vadd.f32 %v1130_v33, %v1124_v21  ;;  %v663_v55 = vadd.f32 %v3661_v13, %v655_v12  ;;  %v1267_v46 = vmul.f32 %v2131_v0, %v1265_v39  ;;  %v2146_v22 = vld [vmem:[%s2799_s21 + $0x398] sm:$0x7f]  ;;  %s3963_s19 = sld [smem:[#allocation3 + $0x74]] }
 0x18b   : > { %v1275_v56 = vmul.f32 %v2134_v50, %v4557_v30  ;;  %v3816_v37 = vmul.f32 %v2137_v53, %v4555_v5  ;;  %v4556_v32 = vstv %s3711_s8  ;;  %v1154_v12 = vmul.f32 %v3800_v58, %v1153_v19  ;;  %v3839_v53 = vld [vmem:[%s2799_s21 + $0x31] sm:$0xff]  ;;  %v2149_v19 = vld [vmem:[%s2799_s21 + $0x399] sm:$0x7f]  ;;  %4625 = sst [smem:[#allocation10_spill]] %s3862_s15 }
 0x18c   : > { %v1245_v47 = vadd.f32 %v1243_v29, %v1237_v42  ;;  %v1140_v13 = vadd.f32 %v1138_v25, %v1132_v60  ;;  %v732_v0 = vadd.f32 %v3617_v59, %v722_v35  ;;  %v3833_v33 = vmul.f32 %v2140_v57, %v4554_v28  ;;  %v2152_v59 = vld [vmem:[%s2799_s21 + $0x39a] sm:$0x7f]  ;;  %v3860_v5 = vld [vmem:[%s2799_s21 + $0x32] sm:$0xff]  ;;  %s3969_s25 = sld [smem:[#allocation3 + $0x6b]] }
 0x18d   : > { %v4567_v29 = vstv %s3725_s11  ;;  %v4560_v50 = vstv %s3743_s3  ;;  %v4559_v25 = vstv %s3755_s10  ;;  %v1162_v42 = vmul.f32 %v3821_v38, %v1161_v41  ;;  %s3901_s10 = sld [smem:[#allocation3 + $0x71]] }
 0x18e   : > { %v1253_v21 = vadd.f32 %v1251_v20, %v1245_v47  ;;  %v1148_v35 = vadd.f32 %v1146_v7, %v1140_v13  ;;  %v671_v57 = vadd.f32 %v3671_v26, %v663_v55  ;;  %v3854_v60 = vmul.f32 %v2143_v1, %v4556_v32  ;;  %v2155_v20 = vld [vmem:[%s2799_s21 + $0x518] sm:$0x7f]  ;;  %s3999_s22 = sld [smem:[#allocation3 + $0x76]] }
 0x18f   : > { %v4566_v47 = vstv %s3763_s13  ;;  %v4565_v28 = vstv %s3774_s1  ;;  %v2158_v7 = vld [vmem:[%s2799_s21 + $0x519] sm:$0x7f]  ;;  %v4564_v26 = vstv %s3785_s4  ;;  %v1170_v1 = vmul.f32 %v3839_v53, %v1169_v6  ;;  %s3924_s1 = sld [smem:[#allocation3 + $0x72]] }
 0x190   : > { %v1261_v41 = vadd.f32 %v1259_v15, %v1253_v21  ;;  %v2161_v13 = vld [vmem:[%s2799_s21 + $0x51a] sm:$0x7f]  ;;  %v1156_v55 = vadd.f32 %v1154_v12, %v1148_v35  ;;  %v740_v32 = vadd.f32 %v3622_v45, %v732_v0  ;;  %v3875_v30 = vmul.f32 %v2146_v22, %v4567_v29  ;;  %v3886_v12 = vld [vmem:[%s2799_s21 + $0x1b0] sm:$0xff]  ;;  %s3933_s4 = sld [smem:[#allocation3 + $0x6a]]  ;;  %v2197_v29 = vld [vmem:[%s2799_s21 + $0x21] sm:$0x7f] }
 0x191   : > { %v3879_v15 = vmul.f32 %v2149_v19, %v4560_v50  ;;  %v3883_v21 = vmul.f32 %v2152_v59, %v4559_v25  ;;  %v2164_v35 = vld [vmem:[%s2799_s21 + $0x530] sm:$0x7f]  ;;  %v4563_v45 = vstv %s3804_s14  ;;  %v1178_v22 = vmul.f32 %v3860_v5, %v1177_v18  ;;  %s4015_s6 = sld [smem:[#allocation3 + $0x77]] }
 0x192   : > { %v1269_v6 = vadd.f32 %v1267_v46, %v1261_v41  ;;  %v1164_v0 = vadd.f32 %v1162_v42, %v1156_v55  ;;  %v3896_v19 = vld [vmem:[%s2799_s21 + $0x1b1] sm:$0xff]  ;;  %v681_v25 = vadd.f32 %v3675_v31, %v671_v57  ;;  %v3906_v46 = vmul.f32 %v2155_v20, %v4566_v47  ;;  %v1436_v57 = vld [vmem:[%s2799_s21 + $0x8] sm:$0x7f]  ;;  %s4034_s16 = sld [smem:[#allocation3 + $0x78]] }
 0x193   : > { %v3899_v59 = vld [vmem:[%s2799_s21 + $0x1b2] sm:$0xff]  ;;  %v3910_v42 = vmul.f32 %v2158_v7, %v4565_v28  ;;  %v3914_v18 = vmul.f32 %v2161_v13, %v4564_v26  ;;  %v4587_v55 = vstv %s3818_s30  ;;  %v1186_v31 = vmul.f32 %v3886_v12, %v1185_v8  ;;  %v1444_v20 = vld [vmem:[%s2799_s21 + $0x9] sm:$0x7f]  ;;  %s4053_s26 = sld [smem:[#allocation3 + $0x79]] }
 0x194   : > { %v1277_v41 = vadd.f32 %v1275_v56, %v1269_v6  ;;  %v1172_v50 = vadd.f32 %v1170_v1, %v1164_v0  ;;  %v3927_v7 = vadd.f32 %v3632_v16, %v740_v32  ;;  %v3931_v56 = vmul.f32 %v2164_v35, %v4563_v45  ;;  %v1452_v1 = vld [vmem:[%s2799_s21 + $0xa] sm:$0x7f]  ;;  %v2167_v16 = vld [vmem:[%s2799_s21 + $0x531] sm:$0x7f]  ;;  %v2194_v45 = vld [vmem:[%s2799_s21 + $0x20] sm:$0x7f] }
 0x195   : > { %v1194_v13 = vmul.f32 %v3896_v19, %v1193_v44  ;;  %v1202_v8 = vmul.f32 %v3899_v59, %v1201_v61  ;;  %v4575_v35 = vstv %s3841_s9  ;;  %v4572_v0 = vstv %s3849_s18  ;;  %v3951_v61 = vld [vmem:[%s2799_s21 + $0x1c8] sm:$0xff]  ;;  %s4071_s23 = sld [smem:[#allocation3 + $0x7a]] }
 0x196   : > { %v1285_v6 = vadd.f32 %v3816_v37, %v1277_v41  ;;  %v1180_v32 = vadd.f32 %v1178_v22, %v1172_v50  ;;  %v689_v44 = vadd.f32 %v3687_v9, %v681_v25  ;;  %v1439_v26 = vmul.f32 %v4575_v35, %v1436_v57  ;;  %v3972_v25 = vld [vmem:[%s2799_s21 + $0x1c9] sm:$0xff]  ;;  %v2212_v35 = vld [vmem:[%s2799_s21 + $0x1b8] sm:$0x7f]  ;;  %s4097_s27 = sld [smem:[#allocation3 + $0x7b]] }
 0x197   : > { %v1447_v37 = vmul.f32 %v4572_v0, %v1444_v20  ;;  %v4570_v41 = vstv %s3862_s15  ;;  %v4569_v47 = vstv %s3870_s29  ;;  %v3967_v9 = vmul.f32 %v2167_v16, %v4587_v55  ;;  %v2200_v16 = vld [vmem:[%s2799_s21 + $0x22] sm:$0x7f]  ;;  %s3983_s15 = sld [smem:[#allocation3 + $0x75]] }
 0x198   : > { %v1293_v50 = vadd.f32 %v3833_v33, %v1285_v6  ;;  %v1188_v22 = vadd.f32 %v1186_v31, %v1180_v32  ;;  %v1455_v28 = vmul.f32 %v4570_v41, %v1452_v1  ;;  %v1463_v31 = vmul.f32 %v2194_v45, %v4569_v47  ;;  %v2203_v41 = vld [vmem:[%s2799_s21 + $0x38] sm:$0x7f]  ;;  %4626 = sst [smem:[#allocation12_spill]] %s4034_s16 }
 0x199   : > { %v1449_v33 = vadd.f32 %v1447_v37, %v1439_v26  ;;  %v4571_v57 = vstv %s3888_s12  ;;  %v1210_v6 = vmul.f32 %v3951_v61, %v1209_v49  ;;  %v4573_v32 = vstv %s3901_s10  ;;  %v3988_v37 = vld [vmem:[%s2799_s21 + $0x1ca] sm:$0xff]  ;;  %s4119_s24 = sld [smem:[#allocation3 + $0x7c]] }
 0x19a   : > { %v1301_v20 = vadd.f32 %v3854_v60, %v1293_v50  ;;  %v1196_v1 = vadd.f32 %v1194_v13, %v1188_v22  ;;  %v697_v26 = vadd.f32 %v3698_v62, %v689_v44  ;;  %v4584_v45 = vstv %s3825_s7  ;;  %v2170_v50 = vld [vmem:[%s2799_s21 + $0x532] sm:$0x7f]  ;;  %s4144_s0 = sld [smem:[#allocation3 + $0x7d]] }
 0x19b   : > { %v1457_v60 = vadd.f32 %v1455_v28, %v1449_v33  ;;  %v1471_v13 = vmul.f32 %v2197_v29, %v4571_v57  ;;  %v1218_v47 = vmul.f32 %v3972_v25, %v1217_v23  ;;  %v4574_v62 = vstv %s3924_s1  ;;  %v4004_v29 = vld [vmem:[%s2799_s21 + $0x1e0] sm:$0xff]  ;;  %v2206_v57 = vld [vmem:[%s2799_s21 + $0x39] sm:$0x7f] }
 0x19c   : > { %v1309_v49 = vadd.f32 %v3875_v30, %v1301_v20  ;;  %v1204_v22 = vadd.f32 %v1202_v8, %v1196_v1  ;;  %v4583_v44 = vstv %s3916_s2  ;;  %v4581_v28 = vstv %s3933_s4  ;;  %v2173_v20 = vld [vmem:[%s2799_s21 + $0x548] sm:$0x7f] }
 0x19d   : > { %v1465_v33 = vadd.f32 %v1463_v31, %v1457_v60  ;;  %v1479_v30 = vmul.f32 %v2200_v16, %v4573_v32  ;;  %v1226_v1 = vmul.f32 %v3988_v37, %v1225_v54  ;;  %v4576_v0 = vstv %s3947_s5  ;;  %v1081_v54 = vpop.permute.xlu1 %1080 }
 0x19e   : > { %v1317_v8 = vadd.f32 %v3879_v15, %v1309_v49  ;;  %v1212_v23 = vadd.f32 %v1210_v6, %v1204_v22  ;;  %v707_v31 = vadd.f32 %v3715_v11, %v697_v26  ;;  %v4020_v16 = vmul.f32 %v2170_v50, %v4584_v45  ;;  %v4023_v15 = vld [vmem:[%s2799_s21 + $0x1e1] sm:$0xff]  ;;  %v2176_v22 = vld [vmem:[%s2799_s21 + $0x549] sm:$0x7f]  ;;  %v2209_v26 = vld [vmem:[%s2799_s21 + $0x3a] sm:$0x7f] }
 0x19f   : > { %v1473_v6 = vadd.f32 %v1471_v13, %v1465_v33  ;;  %v1487_v60 = vmul.f32 %v2203_v41, %v4574_v62  ;;  %v1234_v11 = vmul.f32 %v4004_v29, %v1233_v14  ;;  %v4577_v50 = vstv %s3963_s19  ;;  %v4042_v33 = vld [vmem:[%s2799_s21 + $0x1e2] sm:$0xff]  ;;  %v2179_v14 = vld [vmem:[%s2799_s21 + $0x54a] sm:$0x7f] }
 0x1a0   : > { %v1325_v49 = vadd.f32 %v3883_v21, %v1317_v8  ;;  %v1220_v32 = vadd.f32 %v1218_v47, %v1212_v23  ;;  %v4038_v13 = vmul.f32 %v2173_v20, %v4583_v44  ;;  %v4580_v41 = vstv %s3969_s25 }
 0x1a1   : > { %v1481_v21 = vadd.f32 %v1479_v30, %v1473_v6  ;;  %v1495_v8 = vmul.f32 %v2206_v57, %v4576_v0  ;;  %v1242_v62 = vmul.f32 %v4023_v15, %v1241_v4  ;;  %v4578_v20 = vstv %s3983_s15 }
 0x1a2   : > { %v1333_v47 = vadd.f32 %v3906_v46, %v1325_v49  ;;  %v1228_v23 = vadd.f32 %v1226_v1, %v1220_v32  ;;  %v715_v30 = vadd.f32 %v3719_v27, %v707_v31  ;;  %v4058_v57 = vmul.f32 %v2176_v22, %v4581_v28  ;;  %v4061_v46 = vld [vmem:[%s2799_s21 + $0x360] sm:$0xff]  ;;  %v756_v1 = vpop.permute.xlu0 %755  ;;  %v2215_v27 = vld [vmem:[%s2799_s21 + $0x1b9] sm:$0x7f] }
 0x1a3   : > { %v1489_v6 = vadd.f32 %v1487_v60, %v1481_v21  ;;  %v1503_v32 = vmul.f32 %v2209_v26, %v4577_v50  ;;  %v1250_v0 = vmul.f32 %v4042_v33, %v1249_v3  ;;  %v4579_v31 = vstv %s3999_s22  ;;  %v4081_v26 = vld [vmem:[%s2799_s21 + $0x361] sm:$0xff]  ;;  %v1086_v21 = vpop.permute.xlu1 %1085 }
 0x1a4   : > { %v1341_v4 = vadd.f32 %v3910_v42, %v1333_v47  ;;  %v1236_v49 = vadd.f32 %v1234_v11, %v1228_v23  ;;  %v4074_v22 = vmul.f32 %v1081_v54, %v3586_v34  ;;  %v4078_v60 = vmul.f32 %v2179_v14, %v4580_v41  ;;  %v4084_v42 = vld [vmem:[%s2799_s21 + $0x362] sm:$0xff]  ;;  %v4093_v14 = vld [vmem:[%s2799_s21 + $0x378] sm:$0xff] }
 0x1a5   : > { %v1497_v11 = vadd.f32 %v1495_v8, %v1489_v6  ;;  %v1511_v3 = vmul.f32 %v2212_v35, %v4578_v20  ;;  %v1258_v54 = vmul.f32 %v4061_v46, %v1257_v63  ;;  %4627 = vst [vmem:[#allocation13_spill] sm:$0xff] %v4093_v14  ;;  %v2218_v23 = vld [vmem:[%s2799_s21 + $0x1ba] sm:$0x7f]  ;;  %v4582_v50 = vstv %s4015_s6 }
 0x1a6   : > { %v1349_v47 = vadd.f32 %v3914_v18, %v1341_v4  ;;  %v1244_v34 = vadd.f32 %v1242_v62, %v1236_v49  ;;  %v4100_v35 = vmul.f32 %v756_v1, %v3927_v7  ;;  %v723_v18 = vadd.f32 %v3723_v17, %v715_v30  ;;  %v4104_v62 = vld [vmem:[%s2799_s21 + $0x379] sm:$0xff]  ;;  %v2221_v17 = vld [vmem:[%s2799_s21 + $0x1d0] sm:$0x7f] }
 0x1a7   : > { %4628 = vst [vmem:[#allocation14_spill] sm:$0xff] %v4104_v62  ;;  %v1505_v8 = vadd.f32 %v1503_v32, %v1497_v11  ;;  %v1519_v63 = vmul.f32 %v2215_v27, %v4579_v31  ;;  %v1266_v4 = vmul.f32 %v4081_v26, %v1265_v39  ;;  %v4629_v49 = vstv %s3680_s17  ;;  %v4115_v7 = vld [vmem:[%s2799_s21 + $0x37a] sm:$0xff]  ;;  %v4126_v39 = vld [vmem:[%s2799_s21 + $0x390] sm:$0xff]  ;;  %s4637_s17 = sld [smem:[#allocation8_spill]] }
 0x1a8   : > { %v1252_v6 = vadd.f32 %v1250_v0, %v1244_v34  ;;  %v1274_v20 = vmul.f32 %v4084_v42, %v4629_v49  ;;  %4630 = vst [vmem:[#allocation15_spill] sm:$0xff] %v4115_v7  ;;  %v4586_v30 = vstv %s4034_s16  ;;  %v1357_v32 = vadd.f32 %v3931_v56, %v1349_v47  ;;  %4632 = vst [vmem:[#allocation16_spill] sm:$0xff] %v4126_v39  ;;  %v4129_v27 = vld [vmem:[%s2799_s21 + $0x391] sm:$0xff]  ;;  %s4177_s16 = sld [smem:[#allocation3 + $0x7f]] }
 0x1a9   : > { %v4631_v1 = vstv %s3693_s20  ;;  %4633 = vst [vmem:[#allocation17_spill] sm:$0xff] %v4129_v27  ;;  %v1513_v11 = vadd.f32 %v1511_v3, %v1505_v8  ;;  %v1527_v34 = vmul.f32 %v2218_v23, %v4582_v50  ;;  %v4134_v49 = vmul.f32 %v1086_v21, %v3683_v24  ;;  %v4140_v47 = vld [vmem:[%s2799_s21 + $0x392] sm:$0xff]  ;;  %v4147_v23 = vpop.permute.xlu0 %760  ;;  %s4160_s20 = sld [smem:[#allocation3 + $0x7e]] }
 0x1aa   : > { %v1282_v0 = vmul.f32 %v4093_v14, %v4631_v1  ;;  %v1260_v31 = vadd.f32 %v1258_v54, %v1252_v6  ;;  %v4634_v41 = vstv %s3703_s28  ;;  %4635 = vst [vmem:[#allocation18_spill] sm:$0xff] %v4140_v47  ;;  %v2224_v1 = vld [vmem:[%s2799_s21 + $0x1d1] sm:$0x7f]  ;;  %v4593_v28 = vstv %s4053_s26  ;;  %s4640_s28 = sld [smem:[#allocation9_spill]] }
 0x1ab   : > { %v1290_v56 = vmul.f32 %v4104_v62, %v4634_v41  ;;  %v733_v3 = vadd.f32 %v3735_v36, %v723_v18  ;;  %v4636_v24 = vstv %s3711_s8  ;;  %v4153_v41 = vld [vmem:[%s2799_s21 + $0x510] sm:$0xff]  ;;  %v1521_v8 = vadd.f32 %v1519_v63, %v1513_v11  ;;  %v4162_v36 = vpop.permute.xlu1 %1409  ;;  %s4644_s8 = sld [smem:[#allocation11_spill]] }
 0x1ac   : > { %v1298_v21 = vmul.f32 %v4115_v7, %v4636_v24  ;;  %4638 = vst [vmem:[#allocation19_spill] sm:$0xff] %v4153_v41  ;;  %v4156_v54 = vld [vmem:[%s2799_s21 + $0x511] sm:$0xff]  ;;  %v1535_v6 = vmul.f32 %v2221_v17, %v4586_v30  ;;  %v1268_v18 = vadd.f32 %v1266_v4, %v1260_v31  ;;  %v4641_v50 = vstv %s3725_s11  ;;  %v4186_v30 = vld [vmem:[%s2799_s21 + $0x528] sm:$0xff]  ;;  %s4208_s11 = sld [smem:[#allocation3 + $0x80]] }
 0x1ad   : > { %4639 = vst [vmem:[#allocation20_spill] sm:$0xff] %v4156_v54  ;;  %v1306_v24 = vmul.f32 %v4126_v39, %v4641_v50  ;;  %v4642_v44 = vstv %s3743_s3  ;;  %v4173_v63 = vld [vmem:[%s2799_s21 + $0x512] sm:$0xff]  ;;  %v1365_v31 = vadd.f32 %v3967_v9, %v1357_v32  ;;  %v4645_v4 = vstv %s4637_s17  ;;  %4646 = vst [vmem:[#allocation22_spill] sm:$0xff] %v4186_v30  ;;  %s4224_s3 = sld [smem:[#allocation3 + $0x81]] }
 0x1ae   : > { %v4170_v45 = vmul.f32 %v4129_v27, %v4642_v44  ;;  %4643 = vst [vmem:[#allocation21_spill] sm:$0xff] %v4173_v63  ;;  %v2227_v17 = vld [vmem:[%s2799_s21 + $0x1d2] sm:$0x7f]  ;;  %v4183_v50 = vmul.f32 %v4140_v47, %v4645_v4  ;;  %v4189_v44 = vld [vmem:[%s2799_s21 + $0x529] sm:$0xff]  ;;  %v1529_v55 = vadd.f32 %v1527_v34, %v1521_v8  ;;  %v1543_v27 = vmul.f32 %v2224_v1, %v4593_v28  ;;  %v4220_v8 = vld [vmem:[%s2799_s21 + $0x541] sm:$0xff] }
 0x1af   : > { %4647 = vst [vmem:[#allocation23_spill] sm:$0xff] %v4189_v44  ;;  %v1276_v11 = vadd.f32 %v1274_v20, %v1268_v18  ;;  %v4648_v39 = vstv %s3763_s13  ;;  %v4204_v4 = vld [vmem:[%s2799_s21 + $0x52a] sm:$0xff]  ;;  %v741_v20 = vadd.f32 %v3739_v10, %v733_v3  ;;  %4653 = vst [vmem:[#allocation26_spill] sm:$0xff] %v4220_v8  ;;  %v4656_v3 = vstv %s3818_s30  ;;  %s4238_s13 = sld [smem:[#allocation3 + $0x82]] }
 0x1b0   : > { %v4196_v7 = vmul.f32 %v4153_v41, %v4648_v39  ;;  %v4649_v9 = vstv %s4640_s28  ;;  %4650 = vst [vmem:[#allocation24_spill] sm:$0xff] %v4204_v4  ;;  %v2230_v47 = vld [vmem:[%s2799_s21 + $0x1e8] sm:$0x7f]  ;;  %v4217_v39 = vld [vmem:[%s2799_s21 + $0x540] sm:$0xff]  ;;  %v1537_v18 = vadd.f32 %v1535_v6, %v1529_v55  ;;  %v1373_v55 = vadd.f32 %v4020_v16, %v1365_v31  ;;  %s4264_s30 = sld [smem:[#allocation3 + $0x84]] }
 0x1b1   : > { %v4201_v32 = vmul.f32 %v4156_v54, %v4649_v9  ;;  %v4651_v34 = vstv %s4644_s8  ;;  %4652 = vst [vmem:[#allocation25_spill] sm:$0xff] %v4217_v39  ;;  %v4654_v9 = vstv %s4071_s23  ;;  %v1284_v62 = vadd.f32 %v1282_v0, %v1276_v11  ;;  %v4246_v0 = vpop.permute.xlu0 %1404  ;;  %s4404_s28 = sld [smem:[#allocation3 + $0x8b]] }
 0x1b2   : > { %v4214_v1 = vmul.f32 %v4173_v63, %v4651_v34  ;;  %v1551_v28 = vmul.f32 %v2227_v17, %v4654_v9  ;;  %v4655_v54 = vstv %s3804_s14  ;;  %v4234_v34 = vmul.f32 %v4189_v44, %v4656_v3  ;;  %v2233_v63 = vld [vmem:[%s2799_s21 + $0x1e9] sm:$0x7f]  ;;  %s4250_s14 = sld [smem:[#allocation3 + $0x83]] }
 0x1b3   : > { %v4229_v10 = vmul.f32 %v4186_v30, %v4655_v54  ;;  %v4657_v6 = vstv %s3825_s7  ;;  %v1545_v54 = vadd.f32 %v1543_v27, %v1537_v18  ;;  %v4658_v11 = vstv %s4097_s27  ;;  %s4662_s7 = sld [smem:[#allocation10_spill]]  ;;  %v2245_v44 = vld [vmem:[%s2799_s21 + $0x36a] sm:$0x7f] }
 0x1b4   : > { %v4244_v17 = vmul.f32 %v4204_v4, %v4657_v6  ;;  %v1559_v9 = vmul.f32 %v2230_v47, %v4658_v11  ;;  %v1292_v3 = vadd.f32 %v1290_v56, %v1284_v62  ;;  %v4659_v41 = vstv %s3916_s2  ;;  %v2236_v4 = vld [vmem:[%s2799_s21 + $0x1ea] sm:$0x7f]  ;;  %v4266_v47 = vpop.permute.xlu1 %1733  ;;  %s4282_s2 = sld [smem:[#allocation3 + $0x86]] }
 0x1b5   : > { %v4255_v16 = vmul.f32 %v4217_v39, %v4659_v41  ;;  %v4660_v31 = vstv %s3933_s4  ;;  %4661 = vst [vmem:[#allocation27_spill] sm:$0xff] %v4266_v47  ;;  %v749_v62 = vadd.f32 %v3793_v2, %v741_v20  ;;  %v1553_v56 = vadd.f32 %v1551_v28, %v1545_v54  ;;  %s4271_s4 = sld [smem:[#allocation3 + $0x85]]  ;;  %v2239_v39 = vld [vmem:[%s2799_s21 + $0x368] sm:$0x7f] }
 0x1b6   : > { %v4260_v6 = vmul.f32 %v4220_v8, %v4660_v31  ;;  %v4663_v18 = vstv %s4119_s24  ;;  %v4664_v11 = vstv %s3841_s9  ;;  %v1300_v27 = vadd.f32 %v1298_v21, %v1292_v3  ;;  %v4277_v8 = vld [vmem:[%s2799_s21 + $0x542] sm:$0xff]  ;;  %s4314_s9 = sld [smem:[#allocation3 + $0x87]] }
 0x1b7   : > { %v1567_v41 = vmul.f32 %v2233_v63, %v4663_v18  ;;  %v1438_v31 = vmul.f32 %v4664_v11, %v3728_v43  ;;  %v4665_v2 = vstv %s3849_s18  ;;  %v1381_v63 = vadd.f32 %v4038_v13, %v1373_v55  ;;  %v2242_v21 = vld [vmem:[%s2799_s21 + $0x369] sm:$0x7f]  ;;  %s4673_s18 = sld [smem:[#allocation7_spill]] }
 0x1b8   : > { %v1446_v28 = vmul.f32 %v4665_v2, %v3731_v51  ;;  %v1561_v20 = vadd.f32 %v1559_v9, %v1553_v56  ;;  %v4666_v54 = vstv %s4144_s0  ;;  %v1308_v11 = vadd.f32 %v1306_v24, %v1300_v27  ;;  %v4309_v27 = vpop.permute.xlu0 %1728  ;;  %s4683_s8 = sld [smem:[#allocation12_spill]] }
 0x1b9   : > { %v1575_v43 = vmul.f32 %v2236_v4, %v4666_v54  ;;  %v4667_v3 = vstv %s4662_s7  ;;  %v1597_v30 = vstv %s4208_s11  ;;  %v4668_v14 = vstv %s3870_s29  ;;  %v2248_v54 = vld [vmem:[%s2799_s21 + $0x380] sm:$0x7f]  ;;  %s4416_s7 = sld [smem:[#allocation3 + $0x8c]] }
 0x1ba   : > { %v1454_v18 = vmul.f32 %v4667_v3, %v3746_v48  ;;  %v1448_v47 = vadd.f32 %v1446_v28, %v1438_v31  ;;  %v1462_v51 = vmul.f32 %v3758_v40, %v4668_v14  ;;  %v4300_v13 = vmul.f32 %v4147_v23, %v749_v62 }
 0x1bb   : > { %v4669_v55 = vstv %s3969_s25  ;;  %v1569_v9 = vadd.f32 %v1567_v41, %v1561_v20  ;;  %v4670_v48 = vstv %s4160_s20  ;;  %v1316_v56 = vadd.f32 %v4170_v45, %v1308_v11  ;;  %v776_v41 = vpop.permute.xlu1 %775 }
 0x1bc   : > { %v4305_v4 = vmul.f32 %v4277_v8, %v4669_v55  ;;  %v1583_v24 = vmul.f32 %v2239_v39, %v4670_v48  ;;  %v4671_v31 = vstv %s4177_s16  ;;  %v1456_v14 = vadd.f32 %v1454_v18, %v1448_v47  ;;  %v2251_v47 = vld [vmem:[%s2799_s21 + $0x381] sm:$0x7f]  ;;  %v2263_v48 = vld [vmem:[%s2799_s21 + $0x39a] sm:$0x7f] }
 0x1bd   : > { %v1591_v40 = vmul.f32 %v2242_v21, %v4671_v31  ;;  %v4672_v23 = vstv %s3888_s12  ;;  %v1389_v39 = vadd.f32 %v4058_v57, %v1381_v63  ;;  %v1577_v2 = vadd.f32 %v1575_v43, %v1569_v9  ;;  %v2254_v63 = vld [vmem:[%s2799_s21 + $0x382] sm:$0x7f]  ;;  %v2260_v9 = vld [vmem:[%s2799_s21 + $0x399] sm:$0x7f]  ;;  %s4676_s12 = sld [smem:[#allocation28_spill]] }
 0x1be   : > { %v1470_v62 = vmul.f32 %v3780_v52, %v4672_v23  ;;  %v1599_v45 = vmul.f32 %v2245_v44, %v1597_v30  ;;  %v1605_v28 = vstv %s4224_s3  ;;  %v1324_v20 = vadd.f32 %v4183_v50, %v1316_v56  ;;  %v2257_v50 = vld [vmem:[%s2799_s21 + $0x398] sm:$0x7f] }
 0x1bf   : > { %v1613_v21 = vstv %s4238_s13  ;;  %v1464_v52 = vadd.f32 %v1462_v51, %v1456_v14  ;;  %v4674_v3 = vstv %s3901_s10  ;;  %v1585_v57 = vadd.f32 %v1583_v24, %v1577_v2  ;;  %s4454_s10 = sld [smem:[#allocation3 + $0x8f]] }
 0x1c0   : > { %v1478_v18 = vmul.f32 %v3800_v58, %v4674_v3  ;;  %v1621_v43 = vstv %s4250_s14  ;;  %v1629_v44 = vstv %s4264_s30  ;;  %v1637_v11 = vstv %s4271_s4 }
 0x1c1   : > { %v1332_v55 = vadd.f32 %v4196_v7, %v1324_v20  ;;  %v4603_v56 = vstv %s4282_s2  ;;  %v1472_v51 = vadd.f32 %v1470_v62, %v1464_v52  ;;  %v4675_v31 = vstv %s3924_s1  ;;  %v771_v62 = vpop.permute.xlu0 %770  ;;  %s4367_s1 = sld [smem:[#allocation3 + $0x88]] }
 0x1c2   : > { %v1486_v58 = vmul.f32 %v3821_v38, %v4675_v31  ;;  %v1397_v7 = vadd.f32 %v4078_v60, %v1389_v39  ;;  %v1593_v24 = vadd.f32 %v1591_v40, %v1585_v57  ;;  %v1607_v14 = vmul.f32 %v2248_v54, %v1605_v28  ;;  %v1101_v60 = vpop.permute.xlu1 %1100 }
 0x1c3   : > { %s4346_s25 = scalar_lea.vmem %s4676_s12, %s4673_s18  ;;  %v1615_v23 = vmul.f32 %v2251_v47, %v1613_v21  ;;  %v1340_v2 = vadd.f32 %v4201_v32, %v1332_v55  ;;  %v1623_v38 = vmul.f32 %v2254_v63, %v1621_v43  ;;  %v1480_v20 = vadd.f32 %v1478_v18, %v1472_v51 }
 0x1c4   : > { %v4677_v52 = vstv %s3947_s5  ;;  %v1601_v40 = vadd.f32 %v1599_v45, %v1593_v24  ;;  %v1631_v39 = vmul.f32 %v2257_v50, %v1629_v44  ;;  %v1639_v54 = vmul.f32 %v2260_v9, %v1637_v11  ;;  %v421_v32 = vld [vmem:[%s4346_s25 + $0x8] sm:$0x7f]  ;;  %v420_v45 = vld [vmem:[%s4346_s25] sm:$0xff]  ;;  %s4385_s5 = sld [smem:[#allocation3 + $0x89]] }
 0x1c5   : > { %v1494_v3 = vmul.f32 %v3839_v53, %v4677_v52  ;;  %v4365_v47 = vmul.f32 %v2263_v48, %v4603_v56  ;;  %v1348_v18 = vadd.f32 %v4214_v1, %v1340_v2  ;;  %v1653_v57 = vstv %s4314_s9  ;;  %v423_v52 = vld [vmem:[%s4346_s25 + $0x108] sm:$0x7f] }
 0x1c6   : > { %v1488_v53 = vadd.f32 %v1486_v58, %v1480_v20  ;;  %v4678_v63 = vstv %s3963_s19  ;;  %v1413_v50 = vmul.f32 %v4162_v36, %v1397_v7  ;;  %v1609_v51 = vadd.f32 %v1607_v14, %v1601_v40  ;;  %v422_v36 = vld [vmem:[%s4346_s25 + $0x100] sm:$0xff] }
 0x1c7   : > { %v1502_v55 = vmul.f32 %v3860_v5, %v4678_v63  ;;  %v4679_v9 = vstv %s3983_s15  ;;  %v4680_v31 = vstv %s3999_s22  ;;  %v1356_v56 = vadd.f32 %v4229_v10, %v1348_v18  ;;  %s4394_s15 = sld [smem:[#allocation3 + $0x8a]] }
 0x1c8   : > { %v1510_v48 = vmul.f32 %v3886_v12, %v4679_v9  ;;  %v1518_v24 = vmul.f32 %v3896_v19, %v4680_v31  ;;  %v1496_v1 = vadd.f32 %v1494_v3, %v1488_v53  ;;  %v4681_v58 = vstv %s4015_s6  ;;  %v1096_v19 = vpop.permute.xlu0 %1095  ;;  %s4682_s6 = sld [smem:[#allocation31_spill]] }
 0x1c9   : > { %v1526_v5 = vmul.f32 %v3899_v59, %v4681_v58  ;;  %v429_v2 = vmax.f32 %v421_v32, 0.0  ;;  %v1617_v7 = vadd.f32 %v1615_v23, %v1609_v51  ;;  %v779_v14 = vadd.f32 %v776_v41, %v4300_v13  ;;  %v1425_v41 = vpop.permute.xlu1 %1424  ;;  %v2266_v32 = vld [vmem:[%s2799_s21 + $0x518] sm:$0x7f] }
 0x1ca   : > { %v428_v12 = vmax.f32 %v420_v45, 0.0  ;;  %v778_v20 = vadd.f32 %v771_v62, %v4100_v35  ;;  %v1364_v40 = vadd.f32 %v4234_v34, %v1356_v56  ;;  %v1504_v10 = vadd.f32 %v1502_v55, %v1496_v1  ;;  %v425_v35 = vld [vmem:[%s4346_s25 + $0x208] sm:$0x7f]  ;;  %v2269_v45 = vld [vmem:[%s2799_s21 + $0x519] sm:$0x7f] }
 0x1cb   : > { %v431_v59 = vmax.f32 %v423_v52, 0.0  ;;  %v1104_v13 = vadd.f32 %v1101_v60, %v4134_v49  ;;  %v1625_v23 = vadd.f32 %v1623_v38, %v1617_v7  ;;  %v781_v34 = vsub.f32 %v779_v14, %v429_v2  ;;  %v2272_v52 = vld [vmem:[%s2799_s21 + $0x51a] sm:$0x7f]  ;;  %v2275_v7 = vld [vmem:[%s2799_s21 + $0x530] sm:$0x7f] }
 0x1cc   : > { %v780_v56 = vsub.f32 %v778_v20, %v428_v12  ;;  %v430_v62 = vmax.f32 %v422_v36, 0.0  ;;  %v1372_v3 = vadd.f32 %v4244_v17, %v1364_v40  ;;  %v1512_v18 = vadd.f32 %v1510_v48, %v1504_v10  ;;  %v1420_v40 = vpop.permute.xlu0 %1419  ;;  %v2278_v10 = vld [vmem:[%s2799_s21 + $0x531] sm:$0x7f] }
 0x1cd   : > { %v1106_v53 = vsub.f32 %v1104_v13, %v431_v59  ;;  %v1103_v49 = vadd.f32 %v1096_v19, %v4074_v22  ;;  %v1633_v60 = vadd.f32 %v1631_v39, %v1625_v23  ;;  %v1661_v63 = vstv %s4367_s1 }
 0x1ce   : > { %s4400_s17 = scalar_lea.vmem %s4682_s6, %s4673_s18  ;;  %v433_v38 = vmax.f32 %v425_v35, 0.0  ;;  %v1428_v55 = vadd.f32 %v1425_v41, %v1413_v50  ;;  %v1380_v17 = vadd.f32 %v4255_v16, %v1372_v3  ;;  %v1520_v51 = vadd.f32 %v1518_v24, %v1512_v18  ;;  %s4428_s18 = sld [smem:[#allocation3 + $0x8d]] }
 0x1cf   : > { %785 = vst.msk [vmem:[%s4400_s17 + $0x8] sm:$0x7f] %vm335_vm4, %v781_v34  ;;  %v4684_v22 = vstv %s4683_s8  ;;  %2077 = vst.msk [vmem:[%s4400_s17 + $0x108] sm:$0x7f] %vm335_vm4, %v1106_v53  ;;  %v1105_v9 = vsub.f32 %v1103_v49, %v430_v62  ;;  %v1641_v48 = vadd.f32 %v1639_v54, %v1633_v60  ;;  %v1655_v50 = vmul.f32 %v2266_v32, %v1653_v57  ;;  %v2281_v34 = vld [vmem:[%s2799_s21 + $0x532] sm:$0x7f] }
 0x1d0   : > { %783 = vst.msk [vmem:[%s4400_s17] sm:$0xff] %vm36_vm0, %v780_v56  ;;  %v1534_v39 = vmul.f32 %v3951_v61, %v4684_v22  ;;  %v1430_v16 = vsub.f32 %v1428_v55, %v433_v38  ;;  %v1388_v31 = vadd.f32 %v4260_v6, %v1380_v17  ;;  %v1669_v1 = vstv %s4385_s5  ;;  %v424_v6 = vld [vmem:[%s4346_s25 + $0x200] sm:$0xff]  ;;  %v2287_v22 = vld [vmem:[%s2799_s21 + $0x549] sm:$0x7f] }
 0x1d1   : > { %v1528_v61 = vadd.f32 %v1526_v5, %v1520_v51  ;;  %v4685_v24 = vstv %s4053_s26  ;;  %2076 = vst.msk [vmem:[%s4400_s17 + $0x100] sm:$0xff] %vm36_vm0, %v1105_v9  ;;  %v1649_v54 = vadd.f32 %v4365_v47, %v1641_v48  ;;  %v1663_v2 = vmul.f32 %v2269_v45, %v1661_v63  ;;  %s4444_s26 = sld [smem:[#allocation3 + $0x8e]] }
 0x1d2   : > { %v1542_v58 = vmul.f32 %v3972_v25, %v4685_v24  ;;  %2188 = vst.msk [vmem:[%s4400_s17 + $0x208] sm:$0x7f] %vm335_vm4, %v1430_v16  ;;  %v1396_v36 = vadd.f32 %v4305_v4, %v1388_v31  ;;  %v1677_v14 = vstv %s4394_s15  ;;  %v4686_v5 = vstv %s4071_s23  ;;  %v2290_v31 = vld [vmem:[%s2799_s21 + $0x54a] sm:$0x7f] }
 0x1d3   : > { %v1536_v25 = vadd.f32 %v1534_v39, %v1528_v61  ;;  %v1550_v12 = vmul.f32 %v3988_v37, %v4686_v5  ;;  %v1657_v47 = vadd.f32 %v1655_v50, %v1649_v54  ;;  %v1671_v20 = vmul.f32 %v2272_v52, %v1669_v1 }
 0x1d4   : > { %v1685_v19 = vstv %s4404_s28  ;;  %v1412_v4 = vmul.f32 %v4246_v0, %v1396_v36  ;;  %v4687_v13 = vstv %s4097_s27  ;;  %v432_v37 = vmax.f32 %v424_v6, 0.0 }
 0x1d5   : > { %v1544_v59 = vadd.f32 %v1542_v58, %v1536_v25  ;;  %v1558_v41 = vmul.f32 %v4004_v29, %v4687_v13  ;;  %v1665_v35 = vadd.f32 %v1663_v2, %v1657_v47  ;;  %v1679_v23 = vmul.f32 %v2275_v7, %v1677_v14  ;;  %v2284_v29 = vld [vmem:[%s2799_s21 + $0x548] sm:$0x7f]  ;;  %v4692_v25 = vld [vmem:[#allocation13_spill] sm:$0xff]  ;;  %v4695_v13 = vld [vmem:[#allocation27_spill] sm:$0xff]  ;;  %s4708_s21 = sld [smem:[#allocation6_spill]] }
 0x1d6   : > { %v1693_v56 = vstv %s4416_s7  ;;  %v4688_v0 = vstv %s4119_s24  ;;  %v1427_v32 = vadd.f32 %v1420_v40, %v1412_v4  ;;  %v1687_v53 = vmul.f32 %v2278_v10, %v1685_v19  ;;  %v427_v40 = vld [vmem:[%s4346_s25 + $0x308] sm:$0x7f] }
 0x1d7   : > { %v1552_v62 = vadd.f32 %v1550_v12, %v1544_v59  ;;  %v1566_v3 = vmul.f32 %v4023_v15, %v4688_v0  ;;  %v1673_v18 = vadd.f32 %v1671_v20, %v1665_v35  ;;  %v1701_v49 = vstv %s4428_s18  ;;  %v4693_v20 = vld [vmem:[#allocation14_spill] sm:$0xff]  ;;  %v1749_v59 = vpop.permute.xlu1 %1748  ;;  %v4696_v35 = vld [vmem:[#allocation16_spill] sm:$0xff] }
 0x1d8   : > { %v4689_v38 = vstv %s4144_s0  ;;  %v1429_v17 = vsub.f32 %v1427_v32, %v432_v37  ;;  %v1695_v51 = vmul.f32 %v2281_v34, %v1693_v56  ;;  %v1709_v39 = vstv %s4444_s26 }
 0x1d9   : > { %v1560_v60 = vadd.f32 %v1558_v41, %v1552_v62  ;;  %v1574_v55 = vmul.f32 %v4042_v33, %v4689_v38  ;;  %v1681_v45 = vadd.f32 %v1679_v23, %v1673_v18  ;;  %v4690_v9 = vstv %s4160_s20  ;;  %v4697_v62 = vld [vmem:[#allocation17_spill] sm:$0xff]  ;;  %v4699_v18 = vld [vmem:[#allocation18_spill] sm:$0xff] }
 0x1da   : > { %v1582_v48 = vmul.f32 %v4061_v46, %v4690_v9  ;;  %2187 = vst.msk [vmem:[%s4400_s17 + $0x200] sm:$0xff] %vm36_vm0, %v1429_v17  ;;  %v1703_v16 = vmul.f32 %v2284_v29, %v1701_v49  ;;  %v1717_v52 = vstv %s4454_s10  ;;  %v4691_v61 = vstv %s4177_s16 }
 0x1db   : > { %v1568_v15 = vadd.f32 %v1566_v3, %v1560_v60  ;;  %v1689_v50 = vadd.f32 %v1687_v53, %v1681_v45  ;;  %v1590_v24 = vmul.f32 %v4081_v26, %v4691_v61  ;;  %v1711_v54 = vmul.f32 %v2287_v22, %v1709_v39  ;;  %v4700_v60 = vld [vmem:[#allocation19_spill] sm:$0xff]  ;;  %s417_s14 = sadd.s32 1, %s4708_s21  }
 0x1dc   : > { %v1598_v6 = vmul.f32 %v4084_v42, %v1597_v30  ;;  %v1719_v36 = vmul.f32 %v2290_v31, %v1717_v52  ;;  %v1606_v5 = vmul.f32 %v4692_v25, %v1605_v28  ;;  %v1614_v26 = vmul.f32 %v4693_v20, %v1613_v21  ;;  %v4694_v42 = vld [vmem:[#allocation15_spill] sm:$0xff]  ;;  %p414_p6 = scmp.ge.s32.totalorder %s417_s14, 16  }
 0x1dd   : > { %v1576_v33 = vadd.f32 %v1574_v55, %v1568_v15  ;;  %v1697_v58 = vadd.f32 %v1695_v51, %v1689_v50  ;;  %v1622_v30 = vmul.f32 %v4694_v42, %v1621_v43  ;;  %v435_v28 = vmax.f32 %v427_v40, 0.0  ;;  %v4702_v51 = vld [vmem:[#allocation21_spill] sm:$0xff]  ;;  %v4703_v15 = vld [vmem:[#allocation22_spill] sm:$0xff]  ;;  %v4704_v50 = vld [vmem:[#allocation23_spill] sm:$0xff] }
 0x1de   : > { %v1630_v23 = vmul.f32 %v4696_v35, %v1629_v44  ;;  %v1638_v0 = vmul.f32 %v4697_v62, %v1637_v11  ;;  %v4698_v43 = vstv %s4282_s2  ;;  %v1654_v38 = vmul.f32 %v4700_v60, %v1653_v57  ;;  %v4701_v44 = vld [vmem:[#allocation20_spill] sm:$0xff] }
 0x1df   : > { %v1584_v2 = vadd.f32 %v1582_v48, %v1576_v33  ;;  %v1705_v46 = vadd.f32 %v1703_v16, %v1697_v58  ;;  %v1646_v53 = vmul.f32 %v4699_v18, %v4698_v43  ;;  %v1662_v17 = vmul.f32 %v4701_v44, %v1661_v63  ;;  %v4705_v33 = vld [vmem:[#allocation24_spill] sm:$0xff] }
 0x1e0   : > { %v1670_v11 = vmul.f32 %v4702_v51, %v1669_v1  ;;  %v1678_v9 = vmul.f32 %v4703_v15, %v1677_v14  ;;  %v1686_v16 = vmul.f32 %v4704_v50, %v1685_v19  ;;  %v1694_v57 = vmul.f32 %v4705_v33, %v1693_v56 }
 0x1e1   : > { %v1592_v7 = vadd.f32 %v1590_v24, %v1584_v2  ;;  %v1713_v12 = vadd.f32 %v1711_v54, %v1705_v46  ;;  %v4706_v24 = vld [vmem:[#allocation25_spill] sm:$0xff]  ;;  %v4707_v54 = vld [vmem:[#allocation26_spill] sm:$0xff]  ;;  %v1718_v1 = vmul.f32 %v4277_v8, %v1717_v52 }
 0x1e2   : > { %v1702_v63 = vmul.f32 %v4706_v24, %v1701_v49  ;;  %v1710_v2 = vmul.f32 %v4707_v54, %v1709_v39 }
 0x1e3   : > { %v1600_v47 = vadd.f32 %v1598_v6, %v1592_v7  ;;  %v1721_v4 = vadd.f32 %v1719_v36, %v1713_v12  ;;  %v426_v36 = vld [vmem:[%s4346_s25 + $0x300] sm:$0xff]  ;;  %v1744_v7 = vpop.permute.xlu0 %1743 }
 0x1e4   : > { %v434_v19 = vmax.f32 %v426_v36, 0.0 }
 0x1e5   : > { %v1608_v10 = vadd.f32 %v1606_v5, %v1600_v47  ;;  %v1737_v41 = vmul.f32 %v4695_v13, %v1721_v4 }
 0x1e7   : > { %v1616_v37 = vadd.f32 %v1614_v26, %v1608_v10  ;;  %v1752_v21 = vadd.f32 %v1749_v59, %v1737_v41 }
 0x1e9   : > { %v1624_v34 = vadd.f32 %v1622_v30, %v1616_v37  ;;  %v1754_v3 = vsub.f32 %v1752_v21, %v435_v28 }
 0x1eb   : > { %v1632_v32 = vadd.f32 %v1630_v23, %v1624_v34  ;;  %2299 = vst.msk [vmem:[%s4400_s17 + $0x308] sm:$0x7f] %vm335_vm4, %v1754_v3 }
 0x1ed   : > { %v1640_v29 = vadd.f32 %v1638_v0, %v1632_v32 }
 0x1ef   : > { %v1648_v55 = vadd.f32 %v1646_v53, %v1640_v29 }
 0x1f1   : > { %v1656_v45 = vadd.f32 %v1654_v38, %v1648_v55 }
 0x1f3   : > { %v1664_v22 = vadd.f32 %v1662_v17, %v1656_v45 }
 0x1f5   : > { %v1672_v48 = vadd.f32 %v1670_v11, %v1664_v22 }
 0x1f7   : > { %v1680_v31 = vadd.f32 %v1678_v9, %v1672_v48 }
 0x1f9   : > { %v1688_v61 = vadd.f32 %v1686_v16, %v1680_v31 }
 0x1fb   : > { %v1696_v58 = vadd.f32 %v1694_v57, %v1688_v61 }
 0x1fd   : > { %v1704_v6 = vadd.f32 %v1702_v63, %v1696_v58 }
 0x1ff   : > { %v1712_v46 = vadd.f32 %v1710_v2, %v1704_v6 }
 0x201   : > { %v1720_v14 = vadd.f32 %v1718_v1, %v1712_v46 }
 0x203   : > { %v1736_v25 = vmul.f32 %v4309_v27, %v1720_v14 }
 0x205   : > { %v1751_v5 = vadd.f32 %v1744_v7, %v1736_v25  ;;  %416 = sbr.rel (!%p414_p6) target bundleno = 271 (0x10f), region = 104 }
 0x207   : > { %v1753_v12 = vsub.f32 %v1751_v5, %v434_v19 }
 0x209   : > { %2298 = vst.msk [vmem:[%s4400_s17 + $0x300] sm:$0xff] %vm36_vm0, %v1753_v12 }
 0x20a   :  { %1762 = vsyncpa [#allocation4], 1 }

</bundles_post_ra>
